<compile_context>
chip_gen: v7x
topology: tpu7x:2x2x1
jax: 0.10.0
libtpu: 0.0.40
codegen_flags: <defaults>
</compile_context>

<pallas_src>
import jax
import jax.numpy as jnp
from jax import lax
from jax.experimental import pallas as pl
from jax.experimental.pallas import tpu as pltpu

_SQRT1_2 = 0.7071067811865476
_A1, _A2, _A3, _A4, _A5 = 0.254829592, -0.284496736, 1.421413741, -1.453152027, 1.061405429
_PERF = 0.3275911

C1, C2, C3 = 12, 6, 3      # channel counts per stage (see TODO above)
_BR = 8                    # sublane rows per pixel block -> block = (BR, 128) = 1024 pixels


def _fast_recip(x):
    # EUP approximate reciprocal + one Newton step: ~full f32 accuracy, divide stays off the VALU.
    r = pl.reciprocal(x, approx=True)
    return r * (2.0 - x * r)


def _erf_core(z):
    # For z >= 0: returns poly(t)*exp(-z^2) with erf(z) = 1 - poly(t)*exp(-z^2)
    # (Abramowitz & Stegun 7.1.26, |err| <= 1.5e-7).
    t = _fast_recip(1.0 + _PERF * z)
    poly = ((((_A5 * t + _A4) * t + _A3) * t + _A2) * t + _A1) * t
    return poly * jnp.exp(-z * z)


def _gelu(x):
    # exact (erf-based) GELU, matching PyTorch F.gelu default approximate='none'
    u = x * _SQRT1_2
    z = jnp.abs(u)
    core = _erf_core(z)
    erf = jnp.where(u >= 0.0, 1.0 - core, core - 1.0)
    return 0.5 * x * (1.0 + erf)


def _gelu_nonpos(x):
    # GELU specialized for x <= 0:  1 + erf(x/sqrt2) = poly*exp(-z^2) with z = -x/sqrt2 >= 0.
    z = -x * _SQRT1_2
    return 0.5 * x * _erf_core(z)


# ---------------- fused Pallas kernel ----------------

def fused_kernel(taps_ref, w1_ref, b1_ref, w2_ref, b2_ref, w3_ref, b3_ref, o_ref):
    # taps_ref: (9, BR, 128) f32 VMEM -- tap t=3*ky+kx of the padded image, already subsampled to
    #                                    the conv2-aligned output grid; pixels are lane/sublane-dense.
    # w*/b*_ref: flattened weights / pre-shifted biases in SMEM (read as scalars).
    # o_ref: (3, BR, 128) f32 VMEM    -- conv3 interior (halo handled by the wrapper).
    taps = [taps_ref[t] for t in range(9)]                 # 9 x (BR, 128)

    # conv1 (3x3, stride 2) as broadcast-FMA at the pixels conv2 consumes; bias already has the -1.
    v1 = []
    for c in range(C1):
        acc = taps[0] * w1_ref[c * 9]
        for t in range(1, 9):
            acc = acc + taps[t] * w1_ref[c * 9 + t]
        v1.append(acc + b1_ref[c])

    # relu
    v3 = [jnp.maximum(v, 0.0) for v in v1]

    # softmax over channels (per pixel, pure VPU/EUP elementwise)
    m = v3[0]
    for v in v3[1:]:
        m = jnp.maximum(m, v)
    e = [jnp.exp(v - m) for v in v3]
    denom = e[0]
    for v in e[1:]:
        denom = denom + v
    inv = _fast_recip(denom)
    v4 = [ei * inv for ei in e]

    # (-1) -> celu(alpha=1) -> gelu.  softmax output <= 1  =>  d <= 0  =>  celu(d) = exp(d)-1 <= 0,
    # so the celu select and the gelu sign/abs select are both dropped.
    v7 = [_gelu_nonpos(jnp.exp(v - 1.0) - 1.0) for v in v4]

    # conv2 (1x1) + (bias-0.5 pre-folded) -> gelu
    v10 = []
    for c2 in range(C2):
        acc = v7[0] * w2_ref[c2 * C1]
        for c in range(1, C1):
            acc = acc + v7[c] * w2_ref[c2 * C1 + c]
        v10.append(_gelu(acc + b2_ref[c2]))

    # conv3 (1x1) + (bias-0.5 pre-folded) -> relu6   (interior pixels only)
    for c3 in range(C3):
        acc = v10[0] * w3_ref[c3 * C2]
        for c2 in range(1, C2):
            acc = acc + v10[c2] * w3_ref[c3 * C2 + c2]
        o_ref[c3] = jnp.clip(acc + b3_ref[c3], 0.0, 6.0)


# ---------------- model wrapper (layout glue in plain JAX) ----------------

def model_forward(x_nchw, params):
    W1, B1, W2, B2, W3, B3 = params                         # torch OIHW conv weights
    n, cin, h, w = x_nchw.shape
    x2d = x_nchw[:, 0]                                      # (n, h, w); in_channels = 1 only
    xp = jnp.pad(x2d, ((0, 0), (1, 1), (1, 1)))             # conv1 padding=1

    h1 = (h + 2 - 3) // 2 + 1
    w1s = (w + 2 - 3) // 2 + 1
    h2 = (h1 - 1) // 2 + 1                                   # conv2 stride-2 output grid
    w2s = (w1s - 1) // 2 + 1
    p_img = h2 * w2s
    p_total = n * p_img

    # conv1 taps folded with the conv2 stride-2 subsample: tap t=3*ky+kx is the stride-4 phase plane
    # xp[:, ky::4, kx::4] cropped to (h2, w2s).  Batch is folded into the pixel axis.
    taps = jnp.stack(
        [xp[:, ky:ky + 4 * h2:4, kx:kx + 4 * w2s:4] for ky in range(3) for kx in range(3)],
        axis=0,
    ).reshape(9, p_total)

    # Lane/sublane-dense pixel layout: pad to a multiple of BR*128 and reshape to (R, 128).
    block_pixels = _BR * 128
    p_pad = ((p_total + block_pixels - 1) // block_pixels) * block_pixels
    taps = jnp.pad(taps, ((0, 0), (0, p_pad - p_total)))     # zero-pad: downstream ops stay finite
    r_rows = p_pad // 128
    taps = taps.reshape(9, r_rows, 128)
    nblk = r_rows // _BR

    w1f = W1.reshape(-1)                                      # (108,) index [c*9  + t]
    w2f = W2.reshape(-1)                                      # (72,)  index [c2*12 + c]
    w3f = W3.reshape(-1)                                      # (18,)  index [c3*6  + c2]
    b1s = B1 - 1.0                                            # fold the activation shifts
    b2s = B2 - 0.5
    b3s = B3 - 0.5

    smem = pl.BlockSpec(memory_space=pltpu.MemorySpace.SMEM)

    out = pl.pallas_call(
        fused_kernel,
        out_shape=jax.ShapeDtypeStruct((C3, r_rows, 128), jnp.float32),
        grid_spec=pltpu.PrefetchScalarGridSpec(
            num_scalar_prefetch=0,
            grid=(nblk,),
            in_specs=[pl.BlockSpec((9, _BR, 128), lambda i: (0, i, 0)),
                      smem, smem, smem, smem, smem, smem],
            out_specs=pl.BlockSpec((C3, _BR, 128), lambda i: (0, i, 0)),
        ),
        compiler_params=pltpu.CompilerParams(dimension_semantics=("parallel",)),
    )(taps, w1f, b1s, w2f, b2s, w3f, b3s)

    # strip pixel padding and restore (n, C3, h2, w2s)
    inner = out.reshape(C3, p_pad)[:, :p_total].reshape(C3, n, h2, w2s)
    inner = jnp.transpose(inner, (1, 0, 2, 3))

    # conv3 zero-pad halo: padded pixels see only the bias -> relu6(bias - 0.5).
    border = jnp.clip(B3 - 0.5, 0.0, 6.0)[None, :, None, None]
    full = jnp.pad(inner - border, ((0, 0), (0, 0), (2, 2), (2, 2))) + border
    return full                                               # NCHW: (n, 3, h2+4, w2s+4)


def init_params(key):
    ks = jax.random.split(key, 6)

    def conv_init(kw, kb, shape):                             # shape = (O, I, KH, KW)
        fan_in = shape[1] * shape[2] * shape[3]
        bound = 1.0 / (fan_in ** 0.5)
        wgt = jax.random.uniform(kw, shape, jnp.float32, -bound, bound)
        bias = jax.random.uniform(kb, (shape[0],), jnp.float32, -bound, bound)
        return wgt, bias

    W1, B1 = conv_init(ks[0], ks[1], (C1, 1, 3, 3))
    W2, B2 = conv_init(ks[2], ks[3], (C2, C1, 1, 1))
    W3, B3 = conv_init(ks[4], ks[5], (C3, C2, 1, 1))
    return W1, B1, W2, B2, W3, B3


def reference_forward(x, params):
    """Pure-JAX/XLA reference (no Pallas) for verification."""
    W1, B1, W2, B2, W3, B3 = params
    dn = ("NCHW", "OIHW", "NCHW")
    v1 = lax.conv_general_dilated(x, W1, (2, 2), ((1, 1), (1, 1)), dimension_numbers=dn)
    v1 = v1 + B1[None, :, None, None]
    v3 = jnp.maximum(v1 - 1.0, 0.0)
    v4 = jax.nn.softmax(v3, axis=1)
    v5 = v4 - 1.0
    v6 = jnp.where(v5 > 0.0, v5, jnp.expm1(v5))
    v7 = jax.nn.gelu(v6, approximate=False)
    v8 = lax.conv_general_dilated(v7, W2, (2, 2), ((0, 0), (0, 0)),
                                  rhs_dilation=(2, 2), dimension_numbers=dn)
    v8 = v8 + B2[None, :, None, None]
    v10 = jax.nn.gelu(v8 - 0.5, approximate=False)
    v11 = lax.conv_general_dilated(v10, W3, (1, 1), ((2, 2), (2, 2)),
                                   rhs_dilation=(2, 2), dimension_numbers=dn)
    v11 = v11 + B3[None, :, None, None]
    return jnp.clip(v11 - 0.5, 0.0, 6.0)


if __name__ == "__main__":
    key = jax.random.PRNGKey(0)
    kx, kp = jax.random.split(key)
    # small stand-in for (1,1,224,224); batch=2 exercises the batch-folding, 96x96 -> 2 pixel blocks
    x = jax.random.normal(kx, (2, 1, 96, 96), jnp.float32)
    params = init_params(kp)

    out = jax.jit(model_forward)(x, params)
    out = jax.block_until_ready(out)

    ref = reference_forward(x, params)
    assert out.shape == (2, 3, 28, 28), out.shape
    assert jnp.allclose(out, ref, atol=1e-4, rtol=1e-4), float(jnp.max(jnp.abs(out - ref)))
    print("KERNEL_OK")
</pallas_src>

<mosaic_0001>
module attributes {stable_mosaic.version = 11 : i64} {
  func.func @fused_kernel(%arg0: i32, %arg1: memref<9x8x128xf32, #tpu.memory_space<vmem>>, %arg2: memref<108xf32, #tpu.memory_space<smem>>, %arg3: memref<12xf32, #tpu.memory_space<smem>>, %arg4: memref<72xf32, #tpu.memory_space<smem>>, %arg5: memref<6xf32, #tpu.memory_space<smem>>, %arg6: memref<18xf32, #tpu.memory_space<smem>>, %arg7: memref<3xf32, #tpu.memory_space<smem>>, %arg8: memref<3x8x128xf32, #tpu.memory_space<vmem>>) attributes {dimension_semantics = [#tpu.dimension_semantics<parallel>], iteration_bounds = array<i64: 2>, scalar_prefetch = 0 : i64, scratch_operands = 0 : i64, tpu.core_type = #tpu.core_type<tc>, window_params = [{transform_indices = @transform_0, window_bounds = array<i64: 9, 8, 128>}, {transform_indices = @transform_1, window_bounds = array<i64: 108>}, {transform_indices = @transform_2, window_bounds = array<i64: 12>}, {transform_indices = @transform_3, window_bounds = array<i64: 72>}, {transform_indices = @transform_4, window_bounds = array<i64: 6>}, {transform_indices = @transform_5, window_bounds = array<i64: 18>}, {transform_indices = @transform_6, window_bounds = array<i64: 3>}, {transform_indices = @transform_7, window_bounds = array<i64: 3, 8, 128>}]} {
    %c0 = arith.constant 0 : index
    %c0_0 = arith.constant 0 : index
    %c0_1 = arith.constant 0 : index
    %0 = vector.load %arg1[%c0, %c0_0, %c0_1] : memref<9x8x128xf32, #tpu.memory_space<vmem>>, vector<1x8x128xf32>
    %1 = vector.shape_cast %0 : vector<1x8x128xf32> to vector<8x128xf32>
    %c1 = arith.constant 1 : index
    %c0_2 = arith.constant 0 : index
    %c0_3 = arith.constant 0 : index
    %2 = vector.load %arg1[%c1, %c0_2, %c0_3] : memref<9x8x128xf32, #tpu.memory_space<vmem>>, vector<1x8x128xf32>
    %3 = vector.shape_cast %2 : vector<1x8x128xf32> to vector<8x128xf32>
    %c2 = arith.constant 2 : index
    %c0_4 = arith.constant 0 : index
    %c0_5 = arith.constant 0 : index
    %4 = vector.load %arg1[%c2, %c0_4, %c0_5] : memref<9x8x128xf32, #tpu.memory_space<vmem>>, vector<1x8x128xf32>
    %5 = vector.shape_cast %4 : vector<1x8x128xf32> to vector<8x128xf32>
    %c3 = arith.constant 3 : index
    %c0_6 = arith.constant 0 : index
    %c0_7 = arith.constant 0 : index
    %6 = vector.load %arg1[%c3, %c0_6, %c0_7] : memref<9x8x128xf32, #tpu.memory_space<vmem>>, vector<1x8x128xf32>
    %7 = vector.shape_cast %6 : vector<1x8x128xf32> to vector<8x128xf32>
    %c4 = arith.constant 4 : index
    %c0_8 = arith.constant 0 : index
    %c0_9 = arith.constant 0 : index
    %8 = vector.load %arg1[%c4, %c0_8, %c0_9] : memref<9x8x128xf32, #tpu.memory_space<vmem>>, vector<1x8x128xf32>
    %9 = vector.shape_cast %8 : vector<1x8x128xf32> to vector<8x128xf32>
    %c5 = arith.constant 5 : index
    %c0_10 = arith.constant 0 : index
    %c0_11 = arith.constant 0 : index
    %10 = vector.load %arg1[%c5, %c0_10, %c0_11] : memref<9x8x128xf32, #tpu.memory_space<vmem>>, vector<1x8x128xf32>
    %11 = vector.shape_cast %10 : vector<1x8x128xf32> to vector<8x128xf32>
    %c6 = arith.constant 6 : index
    %c0_12 = arith.constant 0 : index
    %c0_13 = arith.constant 0 : index
    %12 = vector.load %arg1[%c6, %c0_12, %c0_13] : memref<9x8x128xf32, #tpu.memory_space<vmem>>, vector<1x8x128xf32>
    %13 = vector.shape_cast %12 : vector<1x8x128xf32> to vector<8x128xf32>
    %c7 = arith.constant 7 : index
    %c0_14 = arith.constant 0 : index
    %c0_15 = arith.constant 0 : index
    %14 = vector.load %arg1[%c7, %c0_14, %c0_15] : memref<9x8x128xf32, #tpu.memory_space<vmem>>, vector<1x8x128xf32>
    %15 = vector.shape_cast %14 : vector<1x8x128xf32> to vector<8x128xf32>
    %c8 = arith.constant 8 : index
    %c0_16 = arith.constant 0 : index
    %c0_17 = arith.constant 0 : index
    %16 = vector.load %arg1[%c8, %c0_16, %c0_17] : memref<9x8x128xf32, #tpu.memory_space<vmem>>, vector<1x8x128xf32>
    %17 = vector.shape_cast %16 : vector<1x8x128xf32> to vector<8x128xf32>
    %c0_18 = arith.constant 0 : index
    %18 = memref.load %arg2[%c0_18] : memref<108xf32, #tpu.memory_space<smem>>
    %19 = vector.broadcast %18 : f32 to vector<8x128xf32>
    %20 = arith.mulf %1, %19 : vector<8x128xf32>
    %c1_19 = arith.constant 1 : index
    %21 = memref.load %arg2[%c1_19] : memref<108xf32, #tpu.memory_space<smem>>
    %22 = vector.broadcast %21 : f32 to vector<8x128xf32>
    %23 = arith.mulf %3, %22 : vector<8x128xf32>
    %24 = arith.addf %20, %23 : vector<8x128xf32>
    %c2_20 = arith.constant 2 : index
    %25 = memref.load %arg2[%c2_20] : memref<108xf32, #tpu.memory_space<smem>>
    %26 = vector.broadcast %25 : f32 to vector<8x128xf32>
    %27 = arith.mulf %5, %26 : vector<8x128xf32>
    %28 = arith.addf %24, %27 : vector<8x128xf32>
    %c3_21 = arith.constant 3 : index
    %29 = memref.load %arg2[%c3_21] : memref<108xf32, #tpu.memory_space<smem>>
    %30 = vector.broadcast %29 : f32 to vector<8x128xf32>
    %31 = arith.mulf %7, %30 : vector<8x128xf32>
    %32 = arith.addf %28, %31 : vector<8x128xf32>
    %c4_22 = arith.constant 4 : index
    %33 = memref.load %arg2[%c4_22] : memref<108xf32, #tpu.memory_space<smem>>
    %34 = vector.broadcast %33 : f32 to vector<8x128xf32>
    %35 = arith.mulf %9, %34 : vector<8x128xf32>
    %36 = arith.addf %32, %35 : vector<8x128xf32>
    %c5_23 = arith.constant 5 : index
    %37 = memref.load %arg2[%c5_23] : memref<108xf32, #tpu.memory_space<smem>>
    %38 = vector.broadcast %37 : f32 to vector<8x128xf32>
    %39 = arith.mulf %11, %38 : vector<8x128xf32>
    %40 = arith.addf %36, %39 : vector<8x128xf32>
    %c6_24 = arith.constant 6 : index
    %41 = memref.load %arg2[%c6_24] : memref<108xf32, #tpu.memory_space<smem>>
    %42 = vector.broadcast %41 : f32 to vector<8x128xf32>
    %43 = arith.mulf %13, %42 : vector<8x128xf32>
    %44 = arith.addf %40, %43 : vector<8x128xf32>
    %c7_25 = arith.constant 7 : index
    %45 = memref.load %arg2[%c7_25] : memref<108xf32, #tpu.memory_space<smem>>
    %46 = vector.broadcast %45 : f32 to vector<8x128xf32>
    %47 = arith.mulf %15, %46 : vector<8x128xf32>
    %48 = arith.addf %44, %47 : vector<8x128xf32>
    %c8_26 = arith.constant 8 : index
    %49 = memref.load %arg2[%c8_26] : memref<108xf32, #tpu.memory_space<smem>>
    %50 = vector.broadcast %49 : f32 to vector<8x128xf32>
    %51 = arith.mulf %17, %50 : vector<8x128xf32>
    %52 = arith.addf %48, %51 : vector<8x128xf32>
    %c0_27 = arith.constant 0 : index
    %53 = memref.load %arg3[%c0_27] : memref<12xf32, #tpu.memory_space<smem>>
    %54 = vector.broadcast %53 : f32 to vector<8x128xf32>
    %55 = arith.addf %52, %54 : vector<8x128xf32>
    %c9 = arith.constant 9 : index
    %56 = memref.load %arg2[%c9] : memref<108xf32, #tpu.memory_space<smem>>
    %57 = vector.broadcast %56 : f32 to vector<8x128xf32>
    %58 = arith.mulf %1, %57 : vector<8x128xf32>
    %c10 = arith.constant 10 : index
    %59 = memref.load %arg2[%c10] : memref<108xf32, #tpu.memory_space<smem>>
    %60 = vector.broadcast %59 : f32 to vector<8x128xf32>
    %61 = arith.mulf %3, %60 : vector<8x128xf32>
    %62 = arith.addf %58, %61 : vector<8x128xf32>
    %c11 = arith.constant 11 : index
    %63 = memref.load %arg2[%c11] : memref<108xf32, #tpu.memory_space<smem>>
    %64 = vector.broadcast %63 : f32 to vector<8x128xf32>
    %65 = arith.mulf %5, %64 : vector<8x128xf32>
    %66 = arith.addf %62, %65 : vector<8x128xf32>
    %c12 = arith.constant 12 : index
    %67 = memref.load %arg2[%c12] : memref<108xf32, #tpu.memory_space<smem>>
    %68 = vector.broadcast %67 : f32 to vector<8x128xf32>
    %69 = arith.mulf %7, %68 : vector<8x128xf32>
    %70 = arith.addf %66, %69 : vector<8x128xf32>
    %c13 = arith.constant 13 : index
    %71 = memref.load %arg2[%c13] : memref<108xf32, #tpu.memory_space<smem>>
    %72 = vector.broadcast %71 : f32 to vector<8x128xf32>
    %73 = arith.mulf %9, %72 : vector<8x128xf32>
    %74 = arith.addf %70, %73 : vector<8x128xf32>
    %c14 = arith.constant 14 : index
    %75 = memref.load %arg2[%c14] : memref<108xf32, #tpu.memory_space<smem>>
    %76 = vector.broadcast %75 : f32 to vector<8x128xf32>
    %77 = arith.mulf %11, %76 : vector<8x128xf32>
    %78 = arith.addf %74, %77 : vector<8x128xf32>
    %c15 = arith.constant 15 : index
    %79 = memref.load %arg2[%c15] : memref<108xf32, #tpu.memory_space<smem>>
    %80 = vector.broadcast %79 : f32 to vector<8x128xf32>
    %81 = arith.mulf %13, %80 : vector<8x128xf32>
    %82 = arith.addf %78, %81 : vector<8x128xf32>
    %c16 = arith.constant 16 : index
    %83 = memref.load %arg2[%c16] : memref<108xf32, #tpu.memory_space<smem>>
    %84 = vector.broadcast %83 : f32 to vector<8x128xf32>
    %85 = arith.mulf %15, %84 : vector<8x128xf32>
    %86 = arith.addf %82, %85 : vector<8x128xf32>
    %c17 = arith.constant 17 : index
    %87 = memref.load %arg2[%c17] : memref<108xf32, #tpu.memory_space<smem>>
    %88 = vector.broadcast %87 : f32 to vector<8x128xf32>
    %89 = arith.mulf %17, %88 : vector<8x128xf32>
    %90 = arith.addf %86, %89 : vector<8x128xf32>
    %c1_28 = arith.constant 1 : index
    %91 = memref.load %arg3[%c1_28] : memref<12xf32, #tpu.memory_space<smem>>
    %92 = vector.broadcast %91 : f32 to vector<8x128xf32>
    %93 = arith.addf %90, %92 : vector<8x128xf32>
    %c18 = arith.constant 18 : index
    %94 = memref.load %arg2[%c18] : memref<108xf32, #tpu.memory_space<smem>>
    %95 = vector.broadcast %94 : f32 to vector<8x128xf32>
    %96 = arith.mulf %1, %95 : vector<8x128xf32>
    %c19 = arith.constant 19 : index
    %97 = memref.load %arg2[%c19] : memref<108xf32, #tpu.memory_space<smem>>
    %98 = vector.broadcast %97 : f32 to vector<8x128xf32>
    %99 = arith.mulf %3, %98 : vector<8x128xf32>
    %100 = arith.addf %96, %99 : vector<8x128xf32>
    %c20 = arith.constant 20 : index
    %101 = memref.load %arg2[%c20] : memref<108xf32, #tpu.memory_space<smem>>
    %102 = vector.broadcast %101 : f32 to vector<8x128xf32>
    %103 = arith.mulf %5, %102 : vector<8x128xf32>
    %104 = arith.addf %100, %103 : vector<8x128xf32>
    %c21 = arith.constant 21 : index
    %105 = memref.load %arg2[%c21] : memref<108xf32, #tpu.memory_space<smem>>
    %106 = vector.broadcast %105 : f32 to vector<8x128xf32>
    %107 = arith.mulf %7, %106 : vector<8x128xf32>
    %108 = arith.addf %104, %107 : vector<8x128xf32>
    %c22 = arith.constant 22 : index
    %109 = memref.load %arg2[%c22] : memref<108xf32, #tpu.memory_space<smem>>
    %110 = vector.broadcast %109 : f32 to vector<8x128xf32>
    %111 = arith.mulf %9, %110 : vector<8x128xf32>
    %112 = arith.addf %108, %111 : vector<8x128xf32>
    %c23 = arith.constant 23 : index
    %113 = memref.load %arg2[%c23] : memref<108xf32, #tpu.memory_space<smem>>
    %114 = vector.broadcast %113 : f32 to vector<8x128xf32>
    %115 = arith.mulf %11, %114 : vector<8x128xf32>
    %116 = arith.addf %112, %115 : vector<8x128xf32>
    %c24 = arith.constant 24 : index
    %117 = memref.load %arg2[%c24] : memref<108xf32, #tpu.memory_space<smem>>
    %118 = vector.broadcast %117 : f32 to vector<8x128xf32>
    %119 = arith.mulf %13, %118 : vector<8x128xf32>
    %120 = arith.addf %116, %119 : vector<8x128xf32>
    %c25 = arith.constant 25 : index
    %121 = memref.load %arg2[%c25] : memref<108xf32, #tpu.memory_space<smem>>
    %122 = vector.broadcast %121 : f32 to vector<8x128xf32>
    %123 = arith.mulf %15, %122 : vector<8x128xf32>
    %124 = arith.addf %120, %123 : vector<8x128xf32>
    %c26 = arith.constant 26 : index
    %125 = memref.load %arg2[%c26] : memref<108xf32, #tpu.memory_space<smem>>
    %126 = vector.broadcast %125 : f32 to vector<8x128xf32>
    %127 = arith.mulf %17, %126 : vector<8x128xf32>
    %128 = arith.addf %124, %127 : vector<8x128xf32>
    %c2_29 = arith.constant 2 : index
    %129 = memref.load %arg3[%c2_29] : memref<12xf32, #tpu.memory_space<smem>>
    %130 = vector.broadcast %129 : f32 to vector<8x128xf32>
    %131 = arith.addf %128, %130 : vector<8x128xf32>
    %c27 = arith.constant 27 : index
    %132 = memref.load %arg2[%c27] : memref<108xf32, #tpu.memory_space<smem>>
    %133 = vector.broadcast %132 : f32 to vector<8x128xf32>
    %134 = arith.mulf %1, %133 : vector<8x128xf32>
    %c28 = arith.constant 28 : index
    %135 = memref.load %arg2[%c28] : memref<108xf32, #tpu.memory_space<smem>>
    %136 = vector.broadcast %135 : f32 to vector<8x128xf32>
    %137 = arith.mulf %3, %136 : vector<8x128xf32>
    %138 = arith.addf %134, %137 : vector<8x128xf32>
    %c29 = arith.constant 29 : index
    %139 = memref.load %arg2[%c29] : memref<108xf32, #tpu.memory_space<smem>>
    %140 = vector.broadcast %139 : f32 to vector<8x128xf32>
    %141 = arith.mulf %5, %140 : vector<8x128xf32>
    %142 = arith.addf %138, %141 : vector<8x128xf32>
    %c30 = arith.constant 30 : index
    %143 = memref.load %arg2[%c30] : memref<108xf32, #tpu.memory_space<smem>>
    %144 = vector.broadcast %143 : f32 to vector<8x128xf32>
    %145 = arith.mulf %7, %144 : vector<8x128xf32>
    %146 = arith.addf %142, %145 : vector<8x128xf32>
    %c31 = arith.constant 31 : index
    %147 = memref.load %arg2[%c31] : memref<108xf32, #tpu.memory_space<smem>>
    %148 = vector.broadcast %147 : f32 to vector<8x128xf32>
    %149 = arith.mulf %9, %148 : vector<8x128xf32>
    %150 = arith.addf %146, %149 : vector<8x128xf32>
    %c32 = arith.constant 32 : index
    %151 = memref.load %arg2[%c32] : memref<108xf32, #tpu.memory_space<smem>>
    %152 = vector.broadcast %151 : f32 to vector<8x128xf32>
    %153 = arith.mulf %11, %152 : vector<8x128xf32>
    %154 = arith.addf %150, %153 : vector<8x128xf32>
    %c33 = arith.constant 33 : index
    %155 = memref.load %arg2[%c33] : memref<108xf32, #tpu.memory_space<smem>>
    %156 = vector.broadcast %155 : f32 to vector<8x128xf32>
    %157 = arith.mulf %13, %156 : vector<8x128xf32>
    %158 = arith.addf %154, %157 : vector<8x128xf32>
    %c34 = arith.constant 34 : index
    %159 = memref.load %arg2[%c34] : memref<108xf32, #tpu.memory_space<smem>>
    %160 = vector.broadcast %159 : f32 to vector<8x128xf32>
    %161 = arith.mulf %15, %160 : vector<8x128xf32>
    %162 = arith.addf %158, %161 : vector<8x128xf32>
    %c35 = arith.constant 35 : index
    %163 = memref.load %arg2[%c35] : memref<108xf32, #tpu.memory_space<smem>>
    %164 = vector.broadcast %163 : f32 to vector<8x128xf32>
    %165 = arith.mulf %17, %164 : vector<8x128xf32>
    %166 = arith.addf %162, %165 : vector<8x128xf32>
    %c3_30 = arith.constant 3 : index
    %167 = memref.load %arg3[%c3_30] : memref<12xf32, #tpu.memory_space<smem>>
    %168 = vector.broadcast %167 : f32 to vector<8x128xf32>
    %169 = arith.addf %166, %168 : vector<8x128xf32>
    %c36 = arith.constant 36 : index
    %170 = memref.load %arg2[%c36] : memref<108xf32, #tpu.memory_space<smem>>
    %171 = vector.broadcast %170 : f32 to vector<8x128xf32>
    %172 = arith.mulf %1, %171 : vector<8x128xf32>
    %c37 = arith.constant 37 : index
    %173 = memref.load %arg2[%c37] : memref<108xf32, #tpu.memory_space<smem>>
    %174 = vector.broadcast %173 : f32 to vector<8x128xf32>
    %175 = arith.mulf %3, %174 : vector<8x128xf32>
    %176 = arith.addf %172, %175 : vector<8x128xf32>
    %c38 = arith.constant 38 : index
    %177 = memref.load %arg2[%c38] : memref<108xf32, #tpu.memory_space<smem>>
    %178 = vector.broadcast %177 : f32 to vector<8x128xf32>
    %179 = arith.mulf %5, %178 : vector<8x128xf32>
    %180 = arith.addf %176, %179 : vector<8x128xf32>
    %c39 = arith.constant 39 : index
    %181 = memref.load %arg2[%c39] : memref<108xf32, #tpu.memory_space<smem>>
    %182 = vector.broadcast %181 : f32 to vector<8x128xf32>
    %183 = arith.mulf %7, %182 : vector<8x128xf32>
    %184 = arith.addf %180, %183 : vector<8x128xf32>
    %c40 = arith.constant 40 : index
    %185 = memref.load %arg2[%c40] : memref<108xf32, #tpu.memory_space<smem>>
    %186 = vector.broadcast %185 : f32 to vector<8x128xf32>
    %187 = arith.mulf %9, %186 : vector<8x128xf32>
    %188 = arith.addf %184, %187 : vector<8x128xf32>
    %c41 = arith.constant 41 : index
    %189 = memref.load %arg2[%c41] : memref<108xf32, #tpu.memory_space<smem>>
    %190 = vector.broadcast %189 : f32 to vector<8x128xf32>
    %191 = arith.mulf %11, %190 : vector<8x128xf32>
    %192 = arith.addf %188, %191 : vector<8x128xf32>
    %c42 = arith.constant 42 : index
    %193 = memref.load %arg2[%c42] : memref<108xf32, #tpu.memory_space<smem>>
    %194 = vector.broadcast %193 : f32 to vector<8x128xf32>
    %195 = arith.mulf %13, %194 : vector<8x128xf32>
    %196 = arith.addf %192, %195 : vector<8x128xf32>
    %c43 = arith.constant 43 : index
    %197 = memref.load %arg2[%c43] : memref<108xf32, #tpu.memory_space<smem>>
    %198 = vector.broadcast %197 : f32 to vector<8x128xf32>
    %199 = arith.mulf %15, %198 : vector<8x128xf32>
    %200 = arith.addf %196, %199 : vector<8x128xf32>
    %c44 = arith.constant 44 : index
    %201 = memref.load %arg2[%c44] : memref<108xf32, #tpu.memory_space<smem>>
    %202 = vector.broadcast %201 : f32 to vector<8x128xf32>
    %203 = arith.mulf %17, %202 : vector<8x128xf32>
    %204 = arith.addf %200, %203 : vector<8x128xf32>
    %c4_31 = arith.constant 4 : index
    %205 = memref.load %arg3[%c4_31] : memref<12xf32, #tpu.memory_space<smem>>
    %206 = vector.broadcast %205 : f32 to vector<8x128xf32>
    %207 = arith.addf %204, %206 : vector<8x128xf32>
    %c45 = arith.constant 45 : index
    %208 = memref.load %arg2[%c45] : memref<108xf32, #tpu.memory_space<smem>>
    %209 = vector.broadcast %208 : f32 to vector<8x128xf32>
    %210 = arith.mulf %1, %209 : vector<8x128xf32>
    %c46 = arith.constant 46 : index
    %211 = memref.load %arg2[%c46] : memref<108xf32, #tpu.memory_space<smem>>
    %212 = vector.broadcast %211 : f32 to vector<8x128xf32>
    %213 = arith.mulf %3, %212 : vector<8x128xf32>
    %214 = arith.addf %210, %213 : vector<8x128xf32>
    %c47 = arith.constant 47 : index
    %215 = memref.load %arg2[%c47] : memref<108xf32, #tpu.memory_space<smem>>
    %216 = vector.broadcast %215 : f32 to vector<8x128xf32>
    %217 = arith.mulf %5, %216 : vector<8x128xf32>
    %218 = arith.addf %214, %217 : vector<8x128xf32>
    %c48 = arith.constant 48 : index
    %219 = memref.load %arg2[%c48] : memref<108xf32, #tpu.memory_space<smem>>
    %220 = vector.broadcast %219 : f32 to vector<8x128xf32>
    %221 = arith.mulf %7, %220 : vector<8x128xf32>
    %222 = arith.addf %218, %221 : vector<8x128xf32>
    %c49 = arith.constant 49 : index
    %223 = memref.load %arg2[%c49] : memref<108xf32, #tpu.memory_space<smem>>
    %224 = vector.broadcast %223 : f32 to vector<8x128xf32>
    %225 = arith.mulf %9, %224 : vector<8x128xf32>
    %226 = arith.addf %222, %225 : vector<8x128xf32>
    %c50 = arith.constant 50 : index
    %227 = memref.load %arg2[%c50] : memref<108xf32, #tpu.memory_space<smem>>
    %228 = vector.broadcast %227 : f32 to vector<8x128xf32>
    %229 = arith.mulf %11, %228 : vector<8x128xf32>
    %230 = arith.addf %226, %229 : vector<8x128xf32>
    %c51 = arith.constant 51 : index
    %231 = memref.load %arg2[%c51] : memref<108xf32, #tpu.memory_space<smem>>
    %232 = vector.broadcast %231 : f32 to vector<8x128xf32>
    %233 = arith.mulf %13, %232 : vector<8x128xf32>
    %234 = arith.addf %230, %233 : vector<8x128xf32>
    %c52 = arith.constant 52 : index
    %235 = memref.load %arg2[%c52] : memref<108xf32, #tpu.memory_space<smem>>
    %236 = vector.broadcast %235 : f32 to vector<8x128xf32>
    %237 = arith.mulf %15, %236 : vector<8x128xf32>
    %238 = arith.addf %234, %237 : vector<8x128xf32>
    %c53 = arith.constant 53 : index
    %239 = memref.load %arg2[%c53] : memref<108xf32, #tpu.memory_space<smem>>
    %240 = vector.broadcast %239 : f32 to vector<8x128xf32>
    %241 = arith.mulf %17, %240 : vector<8x128xf32>
    %242 = arith.addf %238, %241 : vector<8x128xf32>
    %c5_32 = arith.constant 5 : index
    %243 = memref.load %arg3[%c5_32] : memref<12xf32, #tpu.memory_space<smem>>
    %244 = vector.broadcast %243 : f32 to vector<8x128xf32>
    %245 = arith.addf %242, %244 : vector<8x128xf32>
    %c54 = arith.constant 54 : index
    %246 = memref.load %arg2[%c54] : memref<108xf32, #tpu.memory_space<smem>>
    %247 = vector.broadcast %246 : f32 to vector<8x128xf32>
    %248 = arith.mulf %1, %247 : vector<8x128xf32>
    %c55 = arith.constant 55 : index
    %249 = memref.load %arg2[%c55] : memref<108xf32, #tpu.memory_space<smem>>
    %250 = vector.broadcast %249 : f32 to vector<8x128xf32>
    %251 = arith.mulf %3, %250 : vector<8x128xf32>
    %252 = arith.addf %248, %251 : vector<8x128xf32>
    %c56 = arith.constant 56 : index
    %253 = memref.load %arg2[%c56] : memref<108xf32, #tpu.memory_space<smem>>
    %254 = vector.broadcast %253 : f32 to vector<8x128xf32>
    %255 = arith.mulf %5, %254 : vector<8x128xf32>
    %256 = arith.addf %252, %255 : vector<8x128xf32>
    %c57 = arith.constant 57 : index
    %257 = memref.load %arg2[%c57] : memref<108xf32, #tpu.memory_space<smem>>
    %258 = vector.broadcast %257 : f32 to vector<8x128xf32>
    %259 = arith.mulf %7, %258 : vector<8x128xf32>
    %260 = arith.addf %256, %259 : vector<8x128xf32>
    %c58 = arith.constant 58 : index
    %261 = memref.load %arg2[%c58] : memref<108xf32, #tpu.memory_space<smem>>
    %262 = vector.broadcast %261 : f32 to vector<8x128xf32>
    %263 = arith.mulf %9, %262 : vector<8x128xf32>
    %264 = arith.addf %260, %263 : vector<8x128xf32>
    %c59 = arith.constant 59 : index
    %265 = memref.load %arg2[%c59] : memref<108xf32, #tpu.memory_space<smem>>
    %266 = vector.broadcast %265 : f32 to vector<8x128xf32>
    %267 = arith.mulf %11, %266 : vector<8x128xf32>
    %268 = arith.addf %264, %267 : vector<8x128xf32>
    %c60 = arith.constant 60 : index
    %269 = memref.load %arg2[%c60] : memref<108xf32, #tpu.memory_space<smem>>
    %270 = vector.broadcast %269 : f32 to vector<8x128xf32>
    %271 = arith.mulf %13, %270 : vector<8x128xf32>
    %272 = arith.addf %268, %271 : vector<8x128xf32>
    %c61 = arith.constant 61 : index
    %273 = memref.load %arg2[%c61] : memref<108xf32, #tpu.memory_space<smem>>
    %274 = vector.broadcast %273 : f32 to vector<8x128xf32>
    %275 = arith.mulf %15, %274 : vector<8x128xf32>
    %276 = arith.addf %272, %275 : vector<8x128xf32>
    %c62 = arith.constant 62 : index
    %277 = memref.load %arg2[%c62] : memref<108xf32, #tpu.memory_space<smem>>
    %278 = vector.broadcast %277 : f32 to vector<8x128xf32>
    %279 = arith.mulf %17, %278 : vector<8x128xf32>
    %280 = arith.addf %276, %279 : vector<8x128xf32>
    %c6_33 = arith.constant 6 : index
    %281 = memref.load %arg3[%c6_33] : memref<12xf32, #tpu.memory_space<smem>>
    %282 = vector.broadcast %281 : f32 to vector<8x128xf32>
    %283 = arith.addf %280, %282 : vector<8x128xf32>
    %c63 = arith.constant 63 : index
    %284 = memref.load %arg2[%c63] : memref<108xf32, #tpu.memory_space<smem>>
    %285 = vector.broadcast %284 : f32 to vector<8x128xf32>
    %286 = arith.mulf %1, %285 : vector<8x128xf32>
    %c64 = arith.constant 64 : index
    %287 = memref.load %arg2[%c64] : memref<108xf32, #tpu.memory_space<smem>>
    %288 = vector.broadcast %287 : f32 to vector<8x128xf32>
    %289 = arith.mulf %3, %288 : vector<8x128xf32>
    %290 = arith.addf %286, %289 : vector<8x128xf32>
    %c65 = arith.constant 65 : index
    %291 = memref.load %arg2[%c65] : memref<108xf32, #tpu.memory_space<smem>>
    %292 = vector.broadcast %291 : f32 to vector<8x128xf32>
    %293 = arith.mulf %5, %292 : vector<8x128xf32>
    %294 = arith.addf %290, %293 : vector<8x128xf32>
    %c66 = arith.constant 66 : index
    %295 = memref.load %arg2[%c66] : memref<108xf32, #tpu.memory_space<smem>>
    %296 = vector.broadcast %295 : f32 to vector<8x128xf32>
    %297 = arith.mulf %7, %296 : vector<8x128xf32>
    %298 = arith.addf %294, %297 : vector<8x128xf32>
    %c67 = arith.constant 67 : index
    %299 = memref.load %arg2[%c67] : memref<108xf32, #tpu.memory_space<smem>>
    %300 = vector.broadcast %299 : f32 to vector<8x128xf32>
    %301 = arith.mulf %9, %300 : vector<8x128xf32>
    %302 = arith.addf %298, %301 : vector<8x128xf32>
    %c68 = arith.constant 68 : index
    %303 = memref.load %arg2[%c68] : memref<108xf32, #tpu.memory_space<smem>>
    %304 = vector.broadcast %303 : f32 to vector<8x128xf32>
    %305 = arith.mulf %11, %304 : vector<8x128xf32>
    %306 = arith.addf %302, %305 : vector<8x128xf32>
    %c69 = arith.constant 69 : index
    %307 = memref.load %arg2[%c69] : memref<108xf32, #tpu.memory_space<smem>>
    %308 = vector.broadcast %307 : f32 to vector<8x128xf32>
    %309 = arith.mulf %13, %308 : vector<8x128xf32>
    %310 = arith.addf %306, %309 : vector<8x128xf32>
    %c70 = arith.constant 70 : index
    %311 = memref.load %arg2[%c70] : memref<108xf32, #tpu.memory_space<smem>>
    %312 = vector.broadcast %311 : f32 to vector<8x128xf32>
    %313 = arith.mulf %15, %312 : vector<8x128xf32>
    %314 = arith.addf %310, %313 : vector<8x128xf32>
    %c71 = arith.constant 71 : index
    %315 = memref.load %arg2[%c71] : memref<108xf32, #tpu.memory_space<smem>>
    %316 = vector.broadcast %315 : f32 to vector<8x128xf32>
    %317 = arith.mulf %17, %316 : vector<8x128xf32>
    %318 = arith.addf %314, %317 : vector<8x128xf32>
    %c7_34 = arith.constant 7 : index
    %319 = memref.load %arg3[%c7_34] : memref<12xf32, #tpu.memory_space<smem>>
    %320 = vector.broadcast %319 : f32 to vector<8x128xf32>
    %321 = arith.addf %318, %320 : vector<8x128xf32>
    %c72 = arith.constant 72 : index
    %322 = memref.load %arg2[%c72] : memref<108xf32, #tpu.memory_space<smem>>
    %323 = vector.broadcast %322 : f32 to vector<8x128xf32>
    %324 = arith.mulf %1, %323 : vector<8x128xf32>
    %c73 = arith.constant 73 : index
    %325 = memref.load %arg2[%c73] : memref<108xf32, #tpu.memory_space<smem>>
    %326 = vector.broadcast %325 : f32 to vector<8x128xf32>
    %327 = arith.mulf %3, %326 : vector<8x128xf32>
    %328 = arith.addf %324, %327 : vector<8x128xf32>
    %c74 = arith.constant 74 : index
    %329 = memref.load %arg2[%c74] : memref<108xf32, #tpu.memory_space<smem>>
    %330 = vector.broadcast %329 : f32 to vector<8x128xf32>
    %331 = arith.mulf %5, %330 : vector<8x128xf32>
    %332 = arith.addf %328, %331 : vector<8x128xf32>
    %c75 = arith.constant 75 : index
    %333 = memref.load %arg2[%c75] : memref<108xf32, #tpu.memory_space<smem>>
    %334 = vector.broadcast %333 : f32 to vector<8x128xf32>
    %335 = arith.mulf %7, %334 : vector<8x128xf32>
    %336 = arith.addf %332, %335 : vector<8x128xf32>
    %c76 = arith.constant 76 : index
    %337 = memref.load %arg2[%c76] : memref<108xf32, #tpu.memory_space<smem>>
    %338 = vector.broadcast %337 : f32 to vector<8x128xf32>
    %339 = arith.mulf %9, %338 : vector<8x128xf32>
    %340 = arith.addf %336, %339 : vector<8x128xf32>
    %c77 = arith.constant 77 : index
    %341 = memref.load %arg2[%c77] : memref<108xf32, #tpu.memory_space<smem>>
    %342 = vector.broadcast %341 : f32 to vector<8x128xf32>
    %343 = arith.mulf %11, %342 : vector<8x128xf32>
    %344 = arith.addf %340, %343 : vector<8x128xf32>
    %c78 = arith.constant 78 : index
    %345 = memref.load %arg2[%c78] : memref<108xf32, #tpu.memory_space<smem>>
    %346 = vector.broadcast %345 : f32 to vector<8x128xf32>
    %347 = arith.mulf %13, %346 : vector<8x128xf32>
    %348 = arith.addf %344, %347 : vector<8x128xf32>
    %c79 = arith.constant 79 : index
    %349 = memref.load %arg2[%c79] : memref<108xf32, #tpu.memory_space<smem>>
    %350 = vector.broadcast %349 : f32 to vector<8x128xf32>
    %351 = arith.mulf %15, %350 : vector<8x128xf32>
    %352 = arith.addf %348, %351 : vector<8x128xf32>
    %c80 = arith.constant 80 : index
    %353 = memref.load %arg2[%c80] : memref<108xf32, #tpu.memory_space<smem>>
    %354 = vector.broadcast %353 : f32 to vector<8x128xf32>
    %355 = arith.mulf %17, %354 : vector<8x128xf32>
    %356 = arith.addf %352, %355 : vector<8x128xf32>
    %c8_35 = arith.constant 8 : index
    %357 = memref.load %arg3[%c8_35] : memref<12xf32, #tpu.memory_space<smem>>
    %358 = vector.broadcast %357 : f32 to vector<8x128xf32>
    %359 = arith.addf %356, %358 : vector<8x128xf32>
    %c81 = arith.constant 81 : index
    %360 = memref.load %arg2[%c81] : memref<108xf32, #tpu.memory_space<smem>>
    %361 = vector.broadcast %360 : f32 to vector<8x128xf32>
    %362 = arith.mulf %1, %361 : vector<8x128xf32>
    %c82 = arith.constant 82 : index
    %363 = memref.load %arg2[%c82] : memref<108xf32, #tpu.memory_space<smem>>
    %364 = vector.broadcast %363 : f32 to vector<8x128xf32>
    %365 = arith.mulf %3, %364 : vector<8x128xf32>
    %366 = arith.addf %362, %365 : vector<8x128xf32>
    %c83 = arith.constant 83 : index
    %367 = memref.load %arg2[%c83] : memref<108xf32, #tpu.memory_space<smem>>
    %368 = vector.broadcast %367 : f32 to vector<8x128xf32>
    %369 = arith.mulf %5, %368 : vector<8x128xf32>
    %370 = arith.addf %366, %369 : vector<8x128xf32>
    %c84 = arith.constant 84 : index
    %371 = memref.load %arg2[%c84] : memref<108xf32, #tpu.memory_space<smem>>
    %372 = vector.broadcast %371 : f32 to vector<8x128xf32>
    %373 = arith.mulf %7, %372 : vector<8x128xf32>
    %374 = arith.addf %370, %373 : vector<8x128xf32>
    %c85 = arith.constant 85 : index
    %375 = memref.load %arg2[%c85] : memref<108xf32, #tpu.memory_space<smem>>
    %376 = vector.broadcast %375 : f32 to vector<8x128xf32>
    %377 = arith.mulf %9, %376 : vector<8x128xf32>
    %378 = arith.addf %374, %377 : vector<8x128xf32>
    %c86 = arith.constant 86 : index
    %379 = memref.load %arg2[%c86] : memref<108xf32, #tpu.memory_space<smem>>
    %380 = vector.broadcast %379 : f32 to vector<8x128xf32>
    %381 = arith.mulf %11, %380 : vector<8x128xf32>
    %382 = arith.addf %378, %381 : vector<8x128xf32>
    %c87 = arith.constant 87 : index
    %383 = memref.load %arg2[%c87] : memref<108xf32, #tpu.memory_space<smem>>
    %384 = vector.broadcast %383 : f32 to vector<8x128xf32>
    %385 = arith.mulf %13, %384 : vector<8x128xf32>
    %386 = arith.addf %382, %385 : vector<8x128xf32>
    %c88 = arith.constant 88 : index
    %387 = memref.load %arg2[%c88] : memref<108xf32, #tpu.memory_space<smem>>
    %388 = vector.broadcast %387 : f32 to vector<8x128xf32>
    %389 = arith.mulf %15, %388 : vector<8x128xf32>
    %390 = arith.addf %386, %389 : vector<8x128xf32>
    %c89 = arith.constant 89 : index
    %391 = memref.load %arg2[%c89] : memref<108xf32, #tpu.memory_space<smem>>
    %392 = vector.broadcast %391 : f32 to vector<8x128xf32>
    %393 = arith.mulf %17, %392 : vector<8x128xf32>
    %394 = arith.addf %390, %393 : vector<8x128xf32>
    %c9_36 = arith.constant 9 : index
    %395 = memref.load %arg3[%c9_36] : memref<12xf32, #tpu.memory_space<smem>>
    %396 = vector.broadcast %395 : f32 to vector<8x128xf32>
    %397 = arith.addf %394, %396 : vector<8x128xf32>
    %c90 = arith.constant 90 : index
    %398 = memref.load %arg2[%c90] : memref<108xf32, #tpu.memory_space<smem>>
    %399 = vector.broadcast %398 : f32 to vector<8x128xf32>
    %400 = arith.mulf %1, %399 : vector<8x128xf32>
    %c91 = arith.constant 91 : index
    %401 = memref.load %arg2[%c91] : memref<108xf32, #tpu.memory_space<smem>>
    %402 = vector.broadcast %401 : f32 to vector<8x128xf32>
    %403 = arith.mulf %3, %402 : vector<8x128xf32>
    %404 = arith.addf %400, %403 : vector<8x128xf32>
    %c92 = arith.constant 92 : index
    %405 = memref.load %arg2[%c92] : memref<108xf32, #tpu.memory_space<smem>>
    %406 = vector.broadcast %405 : f32 to vector<8x128xf32>
    %407 = arith.mulf %5, %406 : vector<8x128xf32>
    %408 = arith.addf %404, %407 : vector<8x128xf32>
    %c93 = arith.constant 93 : index
    %409 = memref.load %arg2[%c93] : memref<108xf32, #tpu.memory_space<smem>>
    %410 = vector.broadcast %409 : f32 to vector<8x128xf32>
    %411 = arith.mulf %7, %410 : vector<8x128xf32>
    %412 = arith.addf %408, %411 : vector<8x128xf32>
    %c94 = arith.constant 94 : index
    %413 = memref.load %arg2[%c94] : memref<108xf32, #tpu.memory_space<smem>>
    %414 = vector.broadcast %413 : f32 to vector<8x128xf32>
    %415 = arith.mulf %9, %414 : vector<8x128xf32>
    %416 = arith.addf %412, %415 : vector<8x128xf32>
    %c95 = arith.constant 95 : index
    %417 = memref.load %arg2[%c95] : memref<108xf32, #tpu.memory_space<smem>>
    %418 = vector.broadcast %417 : f32 to vector<8x128xf32>
    %419 = arith.mulf %11, %418 : vector<8x128xf32>
    %420 = arith.addf %416, %419 : vector<8x128xf32>
    %c96 = arith.constant 96 : index
    %421 = memref.load %arg2[%c96] : memref<108xf32, #tpu.memory_space<smem>>
    %422 = vector.broadcast %421 : f32 to vector<8x128xf32>
    %423 = arith.mulf %13, %422 : vector<8x128xf32>
    %424 = arith.addf %420, %423 : vector<8x128xf32>
    %c97 = arith.constant 97 : index
    %425 = memref.load %arg2[%c97] : memref<108xf32, #tpu.memory_space<smem>>
    %426 = vector.broadcast %425 : f32 to vector<8x128xf32>
    %427 = arith.mulf %15, %426 : vector<8x128xf32>
    %428 = arith.addf %424, %427 : vector<8x128xf32>
    %c98 = arith.constant 98 : index
    %429 = memref.load %arg2[%c98] : memref<108xf32, #tpu.memory_space<smem>>
    %430 = vector.broadcast %429 : f32 to vector<8x128xf32>
    %431 = arith.mulf %17, %430 : vector<8x128xf32>
    %432 = arith.addf %428, %431 : vector<8x128xf32>
    %c10_37 = arith.constant 10 : index
    %433 = memref.load %arg3[%c10_37] : memref<12xf32, #tpu.memory_space<smem>>
    %434 = vector.broadcast %433 : f32 to vector<8x128xf32>
    %435 = arith.addf %432, %434 : vector<8x128xf32>
    %c99 = arith.constant 99 : index
    %436 = memref.load %arg2[%c99] : memref<108xf32, #tpu.memory_space<smem>>
    %437 = vector.broadcast %436 : f32 to vector<8x128xf32>
    %438 = arith.mulf %1, %437 : vector<8x128xf32>
    %c100 = arith.constant 100 : index
    %439 = memref.load %arg2[%c100] : memref<108xf32, #tpu.memory_space<smem>>
    %440 = vector.broadcast %439 : f32 to vector<8x128xf32>
    %441 = arith.mulf %3, %440 : vector<8x128xf32>
    %442 = arith.addf %438, %441 : vector<8x128xf32>
    %c101 = arith.constant 101 : index
    %443 = memref.load %arg2[%c101] : memref<108xf32, #tpu.memory_space<smem>>
    %444 = vector.broadcast %443 : f32 to vector<8x128xf32>
    %445 = arith.mulf %5, %444 : vector<8x128xf32>
    %446 = arith.addf %442, %445 : vector<8x128xf32>
    %c102 = arith.constant 102 : index
    %447 = memref.load %arg2[%c102] : memref<108xf32, #tpu.memory_space<smem>>
    %448 = vector.broadcast %447 : f32 to vector<8x128xf32>
    %449 = arith.mulf %7, %448 : vector<8x128xf32>
    %450 = arith.addf %446, %449 : vector<8x128xf32>
    %c103 = arith.constant 103 : index
    %451 = memref.load %arg2[%c103] : memref<108xf32, #tpu.memory_space<smem>>
    %452 = vector.broadcast %451 : f32 to vector<8x128xf32>
    %453 = arith.mulf %9, %452 : vector<8x128xf32>
    %454 = arith.addf %450, %453 : vector<8x128xf32>
    %c104 = arith.constant 104 : index
    %455 = memref.load %arg2[%c104] : memref<108xf32, #tpu.memory_space<smem>>
    %456 = vector.broadcast %455 : f32 to vector<8x128xf32>
    %457 = arith.mulf %11, %456 : vector<8x128xf32>
    %458 = arith.addf %454, %457 : vector<8x128xf32>
    %c105 = arith.constant 105 : index
    %459 = memref.load %arg2[%c105] : memref<108xf32, #tpu.memory_space<smem>>
    %460 = vector.broadcast %459 : f32 to vector<8x128xf32>
    %461 = arith.mulf %13, %460 : vector<8x128xf32>
    %462 = arith.addf %458, %461 : vector<8x128xf32>
    %c106 = arith.constant 106 : index
    %463 = memref.load %arg2[%c106] : memref<108xf32, #tpu.memory_space<smem>>
    %464 = vector.broadcast %463 : f32 to vector<8x128xf32>
    %465 = arith.mulf %15, %464 : vector<8x128xf32>
    %466 = arith.addf %462, %465 : vector<8x128xf32>
    %c107 = arith.constant 107 : index
    %467 = memref.load %arg2[%c107] : memref<108xf32, #tpu.memory_space<smem>>
    %468 = vector.broadcast %467 : f32 to vector<8x128xf32>
    %469 = arith.mulf %17, %468 : vector<8x128xf32>
    %470 = arith.addf %466, %469 : vector<8x128xf32>
    %c11_38 = arith.constant 11 : index
    %471 = memref.load %arg3[%c11_38] : memref<12xf32, #tpu.memory_space<smem>>
    %472 = vector.broadcast %471 : f32 to vector<8x128xf32>
    %473 = arith.addf %470, %472 : vector<8x128xf32>
    %cst = arith.constant 0.000000e+00 : f32
    %474 = vector.broadcast %cst : f32 to vector<8x128xf32>
    %475 = arith.maximumf %55, %474 : vector<8x128xf32>
    %cst_39 = arith.constant 0.000000e+00 : f32
    %476 = vector.broadcast %cst_39 : f32 to vector<8x128xf32>
    %477 = arith.maximumf %93, %476 : vector<8x128xf32>
    %cst_40 = arith.constant 0.000000e+00 : f32
    %478 = vector.broadcast %cst_40 : f32 to vector<8x128xf32>
    %479 = arith.maximumf %131, %478 : vector<8x128xf32>
    %cst_41 = arith.constant 0.000000e+00 : f32
    %480 = vector.broadcast %cst_41 : f32 to vector<8x128xf32>
    %481 = arith.maximumf %169, %480 : vector<8x128xf32>
    %cst_42 = arith.constant 0.000000e+00 : f32
    %482 = vector.broadcast %cst_42 : f32 to vector<8x128xf32>
    %483 = arith.maximumf %207, %482 : vector<8x128xf32>
    %cst_43 = arith.constant 0.000000e+00 : f32
    %484 = vector.broadcast %cst_43 : f32 to vector<8x128xf32>
    %485 = arith.maximumf %245, %484 : vector<8x128xf32>
    %cst_44 = arith.constant 0.000000e+00 : f32
    %486 = vector.broadcast %cst_44 : f32 to vector<8x128xf32>
    %487 = arith.maximumf %283, %486 : vector<8x128xf32>
    %cst_45 = arith.constant 0.000000e+00 : f32
    %488 = vector.broadcast %cst_45 : f32 to vector<8x128xf32>
    %489 = arith.maximumf %321, %488 : vector<8x128xf32>
    %cst_46 = arith.constant 0.000000e+00 : f32
    %490 = vector.broadcast %cst_46 : f32 to vector<8x128xf32>
    %491 = arith.maximumf %359, %490 : vector<8x128xf32>
    %cst_47 = arith.constant 0.000000e+00 : f32
    %492 = vector.broadcast %cst_47 : f32 to vector<8x128xf32>
    %493 = arith.maximumf %397, %492 : vector<8x128xf32>
    %cst_48 = arith.constant 0.000000e+00 : f32
    %494 = vector.broadcast %cst_48 : f32 to vector<8x128xf32>
    %495 = arith.maximumf %435, %494 : vector<8x128xf32>
    %cst_49 = arith.constant 0.000000e+00 : f32
    %496 = vector.broadcast %cst_49 : f32 to vector<8x128xf32>
    %497 = arith.maximumf %473, %496 : vector<8x128xf32>
    %498 = arith.maximumf %475, %477 : vector<8x128xf32>
    %499 = arith.maximumf %498, %479 : vector<8x128xf32>
    %500 = arith.maximumf %499, %481 : vector<8x128xf32>
    %501 = arith.maximumf %500, %483 : vector<8x128xf32>
    %502 = arith.maximumf %501, %485 : vector<8x128xf32>
    %503 = arith.maximumf %502, %487 : vector<8x128xf32>
    %504 = arith.maximumf %503, %489 : vector<8x128xf32>
    %505 = arith.maximumf %504, %491 : vector<8x128xf32>
    %506 = arith.maximumf %505, %493 : vector<8x128xf32>
    %507 = arith.maximumf %506, %495 : vector<8x128xf32>
    %508 = arith.maximumf %507, %497 : vector<8x128xf32>
    %509 = arith.subf %475, %508 : vector<8x128xf32>
    %510 = math.exp %509 : vector<8x128xf32>
    %511 = arith.subf %477, %508 : vector<8x128xf32>
    %512 = math.exp %511 : vector<8x128xf32>
    %513 = arith.subf %479, %508 : vector<8x128xf32>
    %514 = math.exp %513 : vector<8x128xf32>
    %515 = arith.subf %481, %508 : vector<8x128xf32>
    %516 = math.exp %515 : vector<8x128xf32>
    %517 = arith.subf %483, %508 : vector<8x128xf32>
    %518 = math.exp %517 : vector<8x128xf32>
    %519 = arith.subf %485, %508 : vector<8x128xf32>
    %520 = math.exp %519 : vector<8x128xf32>
    %521 = arith.subf %487, %508 : vector<8x128xf32>
    %522 = math.exp %521 : vector<8x128xf32>
    %523 = arith.subf %489, %508 : vector<8x128xf32>
    %524 = math.exp %523 : vector<8x128xf32>
    %525 = arith.subf %491, %508 : vector<8x128xf32>
    %526 = math.exp %525 : vector<8x128xf32>
    %527 = arith.subf %493, %508 : vector<8x128xf32>
    %528 = math.exp %527 : vector<8x128xf32>
    %529 = arith.subf %495, %508 : vector<8x128xf32>
    %530 = math.exp %529 : vector<8x128xf32>
    %531 = arith.subf %497, %508 : vector<8x128xf32>
    %532 = math.exp %531 : vector<8x128xf32>
    %533 = arith.addf %510, %512 : vector<8x128xf32>
    %534 = arith.addf %533, %514 : vector<8x128xf32>
    %535 = arith.addf %534, %516 : vector<8x128xf32>
    %536 = arith.addf %535, %518 : vector<8x128xf32>
    %537 = arith.addf %536, %520 : vector<8x128xf32>
    %538 = arith.addf %537, %522 : vector<8x128xf32>
    %539 = arith.addf %538, %524 : vector<8x128xf32>
    %540 = arith.addf %539, %526 : vector<8x128xf32>
    %541 = arith.addf %540, %528 : vector<8x128xf32>
    %542 = arith.addf %541, %530 : vector<8x128xf32>
    %543 = arith.addf %542, %532 : vector<8x128xf32>
    %544 = tpu.reciprocal %543 {approx = true} : vector<8x128xf32> -> vector<8x128xf32>
    %545 = arith.mulf %543, %544 : vector<8x128xf32>
    %cst_50 = arith.constant 2.000000e+00 : f32
    %546 = vector.broadcast %cst_50 : f32 to vector<8x128xf32>
    %547 = arith.subf %546, %545 : vector<8x128xf32>
    %548 = arith.mulf %544, %547 : vector<8x128xf32>
    %549 = arith.mulf %510, %548 : vector<8x128xf32>
    %550 = arith.mulf %512, %548 : vector<8x128xf32>
    %551 = arith.mulf %514, %548 : vector<8x128xf32>
    %552 = arith.mulf %516, %548 : vector<8x128xf32>
    %553 = arith.mulf %518, %548 : vector<8x128xf32>
    %554 = arith.mulf %520, %548 : vector<8x128xf32>
    %555 = arith.mulf %522, %548 : vector<8x128xf32>
    %556 = arith.mulf %524, %548 : vector<8x128xf32>
    %557 = arith.mulf %526, %548 : vector<8x128xf32>
    %558 = arith.mulf %528, %548 : vector<8x128xf32>
    %559 = arith.mulf %530, %548 : vector<8x128xf32>
    %560 = arith.mulf %532, %548 : vector<8x128xf32>
    %cst_51 = arith.constant 1.000000e+00 : f32
    %561 = vector.broadcast %cst_51 : f32 to vector<8x128xf32>
    %562 = arith.subf %549, %561 : vector<8x128xf32>
    %563 = math.exp %562 : vector<8x128xf32>
    %cst_52 = arith.constant 1.000000e+00 : f32
    %564 = vector.broadcast %cst_52 : f32 to vector<8x128xf32>
    %565 = arith.subf %563, %564 : vector<8x128xf32>
    %cst_53 = arith.constant 0.000000e+00 : f32
    %566 = vector.broadcast %cst_53 : f32 to vector<8x128xf32>
    %567 = arith.subf %566, %565 : vector<8x128xf32>
    %cst_54 = arith.constant 0.707106769 : f32
    %568 = vector.broadcast %cst_54 : f32 to vector<8x128xf32>
    %569 = arith.mulf %567, %568 : vector<8x128xf32>
    %cst_55 = arith.constant 5.000000e-01 : f32
    %570 = vector.broadcast %cst_55 : f32 to vector<8x128xf32>
    %571 = arith.mulf %570, %565 : vector<8x128xf32>
    %cst_56 = arith.constant 0.327591091 : f32
    %572 = vector.broadcast %cst_56 : f32 to vector<8x128xf32>
    %573 = arith.mulf %572, %569 : vector<8x128xf32>
    %cst_57 = arith.constant 1.000000e+00 : f32
    %574 = vector.broadcast %cst_57 : f32 to vector<8x128xf32>
    %575 = arith.addf %574, %573 : vector<8x128xf32>
    %576 = tpu.reciprocal %575 {approx = true} : vector<8x128xf32> -> vector<8x128xf32>
    %577 = arith.mulf %575, %576 : vector<8x128xf32>
    %cst_58 = arith.constant 2.000000e+00 : f32
    %578 = vector.broadcast %cst_58 : f32 to vector<8x128xf32>
    %579 = arith.subf %578, %577 : vector<8x128xf32>
    %580 = arith.mulf %576, %579 : vector<8x128xf32>
    %cst_59 = arith.constant 1.06140542 : f32
    %581 = vector.broadcast %cst_59 : f32 to vector<8x128xf32>
    %582 = arith.mulf %581, %580 : vector<8x128xf32>
    %cst_60 = arith.constant -1.45315206 : f32
    %583 = vector.broadcast %cst_60 : f32 to vector<8x128xf32>
    %584 = arith.addf %582, %583 : vector<8x128xf32>
    %585 = arith.mulf %584, %580 : vector<8x128xf32>
    %cst_61 = arith.constant 1.42141378 : f32
    %586 = vector.broadcast %cst_61 : f32 to vector<8x128xf32>
    %587 = arith.addf %585, %586 : vector<8x128xf32>
    %588 = arith.mulf %587, %580 : vector<8x128xf32>
    %cst_62 = arith.constant -0.284496725 : f32
    %589 = vector.broadcast %cst_62 : f32 to vector<8x128xf32>
    %590 = arith.addf %588, %589 : vector<8x128xf32>
    %591 = arith.mulf %590, %580 : vector<8x128xf32>
    %cst_63 = arith.constant 0.254829586 : f32
    %592 = vector.broadcast %cst_63 : f32 to vector<8x128xf32>
    %593 = arith.addf %591, %592 : vector<8x128xf32>
    %594 = arith.mulf %593, %580 : vector<8x128xf32>
    %cst_64 = arith.constant 0.000000e+00 : f32
    %595 = vector.broadcast %cst_64 : f32 to vector<8x128xf32>
    %596 = arith.subf %595, %569 : vector<8x128xf32>
    %597 = arith.mulf %596, %569 : vector<8x128xf32>
    %598 = math.exp %597 : vector<8x128xf32>
    %599 = arith.mulf %594, %598 : vector<8x128xf32>
    %600 = arith.mulf %571, %599 : vector<8x128xf32>
    %cst_65 = arith.constant 1.000000e+00 : f32
    %601 = vector.broadcast %cst_65 : f32 to vector<8x128xf32>
    %602 = arith.subf %550, %601 : vector<8x128xf32>
    %603 = math.exp %602 : vector<8x128xf32>
    %cst_66 = arith.constant 1.000000e+00 : f32
    %604 = vector.broadcast %cst_66 : f32 to vector<8x128xf32>
    %605 = arith.subf %603, %604 : vector<8x128xf32>
    %cst_67 = arith.constant 0.000000e+00 : f32
    %606 = vector.broadcast %cst_67 : f32 to vector<8x128xf32>
    %607 = arith.subf %606, %605 : vector<8x128xf32>
    %cst_68 = arith.constant 0.707106769 : f32
    %608 = vector.broadcast %cst_68 : f32 to vector<8x128xf32>
    %609 = arith.mulf %607, %608 : vector<8x128xf32>
    %cst_69 = arith.constant 5.000000e-01 : f32
    %610 = vector.broadcast %cst_69 : f32 to vector<8x128xf32>
    %611 = arith.mulf %610, %605 : vector<8x128xf32>
    %cst_70 = arith.constant 0.327591091 : f32
    %612 = vector.broadcast %cst_70 : f32 to vector<8x128xf32>
    %613 = arith.mulf %612, %609 : vector<8x128xf32>
    %cst_71 = arith.constant 1.000000e+00 : f32
    %614 = vector.broadcast %cst_71 : f32 to vector<8x128xf32>
    %615 = arith.addf %614, %613 : vector<8x128xf32>
    %616 = tpu.reciprocal %615 {approx = true} : vector<8x128xf32> -> vector<8x128xf32>
    %617 = arith.mulf %615, %616 : vector<8x128xf32>
    %cst_72 = arith.constant 2.000000e+00 : f32
    %618 = vector.broadcast %cst_72 : f32 to vector<8x128xf32>
    %619 = arith.subf %618, %617 : vector<8x128xf32>
    %620 = arith.mulf %616, %619 : vector<8x128xf32>
    %cst_73 = arith.constant 1.06140542 : f32
    %621 = vector.broadcast %cst_73 : f32 to vector<8x128xf32>
    %622 = arith.mulf %621, %620 : vector<8x128xf32>
    %cst_74 = arith.constant -1.45315206 : f32
    %623 = vector.broadcast %cst_74 : f32 to vector<8x128xf32>
    %624 = arith.addf %622, %623 : vector<8x128xf32>
    %625 = arith.mulf %624, %620 : vector<8x128xf32>
    %cst_75 = arith.constant 1.42141378 : f32
    %626 = vector.broadcast %cst_75 : f32 to vector<8x128xf32>
    %627 = arith.addf %625, %626 : vector<8x128xf32>
    %628 = arith.mulf %627, %620 : vector<8x128xf32>
    %cst_76 = arith.constant -0.284496725 : f32
    %629 = vector.broadcast %cst_76 : f32 to vector<8x128xf32>
    %630 = arith.addf %628, %629 : vector<8x128xf32>
    %631 = arith.mulf %630, %620 : vector<8x128xf32>
    %cst_77 = arith.constant 0.254829586 : f32
    %632 = vector.broadcast %cst_77 : f32 to vector<8x128xf32>
    %633 = arith.addf %631, %632 : vector<8x128xf32>
    %634 = arith.mulf %633, %620 : vector<8x128xf32>
    %cst_78 = arith.constant 0.000000e+00 : f32
    %635 = vector.broadcast %cst_78 : f32 to vector<8x128xf32>
    %636 = arith.subf %635, %609 : vector<8x128xf32>
    %637 = arith.mulf %636, %609 : vector<8x128xf32>
    %638 = math.exp %637 : vector<8x128xf32>
    %639 = arith.mulf %634, %638 : vector<8x128xf32>
    %640 = arith.mulf %611, %639 : vector<8x128xf32>
    %cst_79 = arith.constant 1.000000e+00 : f32
    %641 = vector.broadcast %cst_79 : f32 to vector<8x128xf32>
    %642 = arith.subf %551, %641 : vector<8x128xf32>
    %643 = math.exp %642 : vector<8x128xf32>
    %cst_80 = arith.constant 1.000000e+00 : f32
    %644 = vector.broadcast %cst_80 : f32 to vector<8x128xf32>
    %645 = arith.subf %643, %644 : vector<8x128xf32>
    %cst_81 = arith.constant 0.000000e+00 : f32
    %646 = vector.broadcast %cst_81 : f32 to vector<8x128xf32>
    %647 = arith.subf %646, %645 : vector<8x128xf32>
    %cst_82 = arith.constant 0.707106769 : f32
    %648 = vector.broadcast %cst_82 : f32 to vector<8x128xf32>
    %649 = arith.mulf %647, %648 : vector<8x128xf32>
    %cst_83 = arith.constant 5.000000e-01 : f32
    %650 = vector.broadcast %cst_83 : f32 to vector<8x128xf32>
    %651 = arith.mulf %650, %645 : vector<8x128xf32>
    %cst_84 = arith.constant 0.327591091 : f32
    %652 = vector.broadcast %cst_84 : f32 to vector<8x128xf32>
    %653 = arith.mulf %652, %649 : vector<8x128xf32>
    %cst_85 = arith.constant 1.000000e+00 : f32
    %654 = vector.broadcast %cst_85 : f32 to vector<8x128xf32>
    %655 = arith.addf %654, %653 : vector<8x128xf32>
    %656 = tpu.reciprocal %655 {approx = true} : vector<8x128xf32> -> vector<8x128xf32>
    %657 = arith.mulf %655, %656 : vector<8x128xf32>
    %cst_86 = arith.constant 2.000000e+00 : f32
    %658 = vector.broadcast %cst_86 : f32 to vector<8x128xf32>
    %659 = arith.subf %658, %657 : vector<8x128xf32>
    %660 = arith.mulf %656, %659 : vector<8x128xf32>
    %cst_87 = arith.constant 1.06140542 : f32
    %661 = vector.broadcast %cst_87 : f32 to vector<8x128xf32>
    %662 = arith.mulf %661, %660 : vector<8x128xf32>
    %cst_88 = arith.constant -1.45315206 : f32
    %663 = vector.broadcast %cst_88 : f32 to vector<8x128xf32>
    %664 = arith.addf %662, %663 : vector<8x128xf32>
    %665 = arith.mulf %664, %660 : vector<8x128xf32>
    %cst_89 = arith.constant 1.42141378 : f32
    %666 = vector.broadcast %cst_89 : f32 to vector<8x128xf32>
    %667 = arith.addf %665, %666 : vector<8x128xf32>
    %668 = arith.mulf %667, %660 : vector<8x128xf32>
    %cst_90 = arith.constant -0.284496725 : f32
    %669 = vector.broadcast %cst_90 : f32 to vector<8x128xf32>
    %670 = arith.addf %668, %669 : vector<8x128xf32>
    %671 = arith.mulf %670, %660 : vector<8x128xf32>
    %cst_91 = arith.constant 0.254829586 : f32
    %672 = vector.broadcast %cst_91 : f32 to vector<8x128xf32>
    %673 = arith.addf %671, %672 : vector<8x128xf32>
    %674 = arith.mulf %673, %660 : vector<8x128xf32>
    %cst_92 = arith.constant 0.000000e+00 : f32
    %675 = vector.broadcast %cst_92 : f32 to vector<8x128xf32>
    %676 = arith.subf %675, %649 : vector<8x128xf32>
    %677 = arith.mulf %676, %649 : vector<8x128xf32>
    %678 = math.exp %677 : vector<8x128xf32>
    %679 = arith.mulf %674, %678 : vector<8x128xf32>
    %680 = arith.mulf %651, %679 : vector<8x128xf32>
    %cst_93 = arith.constant 1.000000e+00 : f32
    %681 = vector.broadcast %cst_93 : f32 to vector<8x128xf32>
    %682 = arith.subf %552, %681 : vector<8x128xf32>
    %683 = math.exp %682 : vector<8x128xf32>
    %cst_94 = arith.constant 1.000000e+00 : f32
    %684 = vector.broadcast %cst_94 : f32 to vector<8x128xf32>
    %685 = arith.subf %683, %684 : vector<8x128xf32>
    %cst_95 = arith.constant 0.000000e+00 : f32
    %686 = vector.broadcast %cst_95 : f32 to vector<8x128xf32>
    %687 = arith.subf %686, %685 : vector<8x128xf32>
    %cst_96 = arith.constant 0.707106769 : f32
    %688 = vector.broadcast %cst_96 : f32 to vector<8x128xf32>
    %689 = arith.mulf %687, %688 : vector<8x128xf32>
    %cst_97 = arith.constant 5.000000e-01 : f32
    %690 = vector.broadcast %cst_97 : f32 to vector<8x128xf32>
    %691 = arith.mulf %690, %685 : vector<8x128xf32>
    %cst_98 = arith.constant 0.327591091 : f32
    %692 = vector.broadcast %cst_98 : f32 to vector<8x128xf32>
    %693 = arith.mulf %692, %689 : vector<8x128xf32>
    %cst_99 = arith.constant 1.000000e+00 : f32
    %694 = vector.broadcast %cst_99 : f32 to vector<8x128xf32>
    %695 = arith.addf %694, %693 : vector<8x128xf32>
    %696 = tpu.reciprocal %695 {approx = true} : vector<8x128xf32> -> vector<8x128xf32>
    %697 = arith.mulf %695, %696 : vector<8x128xf32>
    %cst_100 = arith.constant 2.000000e+00 : f32
    %698 = vector.broadcast %cst_100 : f32 to vector<8x128xf32>
    %699 = arith.subf %698, %697 : vector<8x128xf32>
    %700 = arith.mulf %696, %699 : vector<8x128xf32>
    %cst_101 = arith.constant 1.06140542 : f32
    %701 = vector.broadcast %cst_101 : f32 to vector<8x128xf32>
    %702 = arith.mulf %701, %700 : vector<8x128xf32>
    %cst_102 = arith.constant -1.45315206 : f32
    %703 = vector.broadcast %cst_102 : f32 to vector<8x128xf32>
    %704 = arith.addf %702, %703 : vector<8x128xf32>
    %705 = arith.mulf %704, %700 : vector<8x128xf32>
    %cst_103 = arith.constant 1.42141378 : f32
    %706 = vector.broadcast %cst_103 : f32 to vector<8x128xf32>
    %707 = arith.addf %705, %706 : vector<8x128xf32>
    %708 = arith.mulf %707, %700 : vector<8x128xf32>
    %cst_104 = arith.constant -0.284496725 : f32
    %709 = vector.broadcast %cst_104 : f32 to vector<8x128xf32>
    %710 = arith.addf %708, %709 : vector<8x128xf32>
    %711 = arith.mulf %710, %700 : vector<8x128xf32>
    %cst_105 = arith.constant 0.254829586 : f32
    %712 = vector.broadcast %cst_105 : f32 to vector<8x128xf32>
    %713 = arith.addf %711, %712 : vector<8x128xf32>
    %714 = arith.mulf %713, %700 : vector<8x128xf32>
    %cst_106 = arith.constant 0.000000e+00 : f32
    %715 = vector.broadcast %cst_106 : f32 to vector<8x128xf32>
    %716 = arith.subf %715, %689 : vector<8x128xf32>
    %717 = arith.mulf %716, %689 : vector<8x128xf32>
    %718 = math.exp %717 : vector<8x128xf32>
    %719 = arith.mulf %714, %718 : vector<8x128xf32>
    %720 = arith.mulf %691, %719 : vector<8x128xf32>
    %cst_107 = arith.constant 1.000000e+00 : f32
    %721 = vector.broadcast %cst_107 : f32 to vector<8x128xf32>
    %722 = arith.subf %553, %721 : vector<8x128xf32>
    %723 = math.exp %722 : vector<8x128xf32>
    %cst_108 = arith.constant 1.000000e+00 : f32
    %724 = vector.broadcast %cst_108 : f32 to vector<8x128xf32>
    %725 = arith.subf %723, %724 : vector<8x128xf32>
    %cst_109 = arith.constant 0.000000e+00 : f32
    %726 = vector.broadcast %cst_109 : f32 to vector<8x128xf32>
    %727 = arith.subf %726, %725 : vector<8x128xf32>
    %cst_110 = arith.constant 0.707106769 : f32
    %728 = vector.broadcast %cst_110 : f32 to vector<8x128xf32>
    %729 = arith.mulf %727, %728 : vector<8x128xf32>
    %cst_111 = arith.constant 5.000000e-01 : f32
    %730 = vector.broadcast %cst_111 : f32 to vector<8x128xf32>
    %731 = arith.mulf %730, %725 : vector<8x128xf32>
    %cst_112 = arith.constant 0.327591091 : f32
    %732 = vector.broadcast %cst_112 : f32 to vector<8x128xf32>
    %733 = arith.mulf %732, %729 : vector<8x128xf32>
    %cst_113 = arith.constant 1.000000e+00 : f32
    %734 = vector.broadcast %cst_113 : f32 to vector<8x128xf32>
    %735 = arith.addf %734, %733 : vector<8x128xf32>
    %736 = tpu.reciprocal %735 {approx = true} : vector<8x128xf32> -> vector<8x128xf32>
    %737 = arith.mulf %735, %736 : vector<8x128xf32>
    %cst_114 = arith.constant 2.000000e+00 : f32
    %738 = vector.broadcast %cst_114 : f32 to vector<8x128xf32>
    %739 = arith.subf %738, %737 : vector<8x128xf32>
    %740 = arith.mulf %736, %739 : vector<8x128xf32>
    %cst_115 = arith.constant 1.06140542 : f32
    %741 = vector.broadcast %cst_115 : f32 to vector<8x128xf32>
    %742 = arith.mulf %741, %740 : vector<8x128xf32>
    %cst_116 = arith.constant -1.45315206 : f32
    %743 = vector.broadcast %cst_116 : f32 to vector<8x128xf32>
    %744 = arith.addf %742, %743 : vector<8x128xf32>
    %745 = arith.mulf %744, %740 : vector<8x128xf32>
    %cst_117 = arith.constant 1.42141378 : f32
    %746 = vector.broadcast %cst_117 : f32 to vector<8x128xf32>
    %747 = arith.addf %745, %746 : vector<8x128xf32>
    %748 = arith.mulf %747, %740 : vector<8x128xf32>
    %cst_118 = arith.constant -0.284496725 : f32
    %749 = vector.broadcast %cst_118 : f32 to vector<8x128xf32>
    %750 = arith.addf %748, %749 : vector<8x128xf32>
    %751 = arith.mulf %750, %740 : vector<8x128xf32>
    %cst_119 = arith.constant 0.254829586 : f32
    %752 = vector.broadcast %cst_119 : f32 to vector<8x128xf32>
    %753 = arith.addf %751, %752 : vector<8x128xf32>
    %754 = arith.mulf %753, %740 : vector<8x128xf32>
    %cst_120 = arith.constant 0.000000e+00 : f32
    %755 = vector.broadcast %cst_120 : f32 to vector<8x128xf32>
    %756 = arith.subf %755, %729 : vector<8x128xf32>
    %757 = arith.mulf %756, %729 : vector<8x128xf32>
    %758 = math.exp %757 : vector<8x128xf32>
    %759 = arith.mulf %754, %758 : vector<8x128xf32>
    %760 = arith.mulf %731, %759 : vector<8x128xf32>
    %cst_121 = arith.constant 1.000000e+00 : f32
    %761 = vector.broadcast %cst_121 : f32 to vector<8x128xf32>
    %762 = arith.subf %554, %761 : vector<8x128xf32>
    %763 = math.exp %762 : vector<8x128xf32>
    %cst_122 = arith.constant 1.000000e+00 : f32
    %764 = vector.broadcast %cst_122 : f32 to vector<8x128xf32>
    %765 = arith.subf %763, %764 : vector<8x128xf32>
    %cst_123 = arith.constant 0.000000e+00 : f32
    %766 = vector.broadcast %cst_123 : f32 to vector<8x128xf32>
    %767 = arith.subf %766, %765 : vector<8x128xf32>
    %cst_124 = arith.constant 0.707106769 : f32
    %768 = vector.broadcast %cst_124 : f32 to vector<8x128xf32>
    %769 = arith.mulf %767, %768 : vector<8x128xf32>
    %cst_125 = arith.constant 5.000000e-01 : f32
    %770 = vector.broadcast %cst_125 : f32 to vector<8x128xf32>
    %771 = arith.mulf %770, %765 : vector<8x128xf32>
    %cst_126 = arith.constant 0.327591091 : f32
    %772 = vector.broadcast %cst_126 : f32 to vector<8x128xf32>
    %773 = arith.mulf %772, %769 : vector<8x128xf32>
    %cst_127 = arith.constant 1.000000e+00 : f32
    %774 = vector.broadcast %cst_127 : f32 to vector<8x128xf32>
    %775 = arith.addf %774, %773 : vector<8x128xf32>
    %776 = tpu.reciprocal %775 {approx = true} : vector<8x128xf32> -> vector<8x128xf32>
    %777 = arith.mulf %775, %776 : vector<8x128xf32>
    %cst_128 = arith.constant 2.000000e+00 : f32
    %778 = vector.broadcast %cst_128 : f32 to vector<8x128xf32>
    %779 = arith.subf %778, %777 : vector<8x128xf32>
    %780 = arith.mulf %776, %779 : vector<8x128xf32>
    %cst_129 = arith.constant 1.06140542 : f32
    %781 = vector.broadcast %cst_129 : f32 to vector<8x128xf32>
    %782 = arith.mulf %781, %780 : vector<8x128xf32>
    %cst_130 = arith.constant -1.45315206 : f32
    %783 = vector.broadcast %cst_130 : f32 to vector<8x128xf32>
    %784 = arith.addf %782, %783 : vector<8x128xf32>
    %785 = arith.mulf %784, %780 : vector<8x128xf32>
    %cst_131 = arith.constant 1.42141378 : f32
    %786 = vector.broadcast %cst_131 : f32 to vector<8x128xf32>
    %787 = arith.addf %785, %786 : vector<8x128xf32>
    %788 = arith.mulf %787, %780 : vector<8x128xf32>
    %cst_132 = arith.constant -0.284496725 : f32
    %789 = vector.broadcast %cst_132 : f32 to vector<8x128xf32>
    %790 = arith.addf %788, %789 : vector<8x128xf32>
    %791 = arith.mulf %790, %780 : vector<8x128xf32>
    %cst_133 = arith.constant 0.254829586 : f32
    %792 = vector.broadcast %cst_133 : f32 to vector<8x128xf32>
    %793 = arith.addf %791, %792 : vector<8x128xf32>
    %794 = arith.mulf %793, %780 : vector<8x128xf32>
    %cst_134 = arith.constant 0.000000e+00 : f32
    %795 = vector.broadcast %cst_134 : f32 to vector<8x128xf32>
    %796 = arith.subf %795, %769 : vector<8x128xf32>
    %797 = arith.mulf %796, %769 : vector<8x128xf32>
    %798 = math.exp %797 : vector<8x128xf32>
    %799 = arith.mulf %794, %798 : vector<8x128xf32>
    %800 = arith.mulf %771, %799 : vector<8x128xf32>
    %cst_135 = arith.constant 1.000000e+00 : f32
    %801 = vector.broadcast %cst_135 : f32 to vector<8x128xf32>
    %802 = arith.subf %555, %801 : vector<8x128xf32>
    %803 = math.exp %802 : vector<8x128xf32>
    %cst_136 = arith.constant 1.000000e+00 : f32
    %804 = vector.broadcast %cst_136 : f32 to vector<8x128xf32>
    %805 = arith.subf %803, %804 : vector<8x128xf32>
    %cst_137 = arith.constant 0.000000e+00 : f32
    %806 = vector.broadcast %cst_137 : f32 to vector<8x128xf32>
    %807 = arith.subf %806, %805 : vector<8x128xf32>
    %cst_138 = arith.constant 0.707106769 : f32
    %808 = vector.broadcast %cst_138 : f32 to vector<8x128xf32>
    %809 = arith.mulf %807, %808 : vector<8x128xf32>
    %cst_139 = arith.constant 5.000000e-01 : f32
    %810 = vector.broadcast %cst_139 : f32 to vector<8x128xf32>
    %811 = arith.mulf %810, %805 : vector<8x128xf32>
    %cst_140 = arith.constant 0.327591091 : f32
    %812 = vector.broadcast %cst_140 : f32 to vector<8x128xf32>
    %813 = arith.mulf %812, %809 : vector<8x128xf32>
    %cst_141 = arith.constant 1.000000e+00 : f32
    %814 = vector.broadcast %cst_141 : f32 to vector<8x128xf32>
    %815 = arith.addf %814, %813 : vector<8x128xf32>
    %816 = tpu.reciprocal %815 {approx = true} : vector<8x128xf32> -> vector<8x128xf32>
    %817 = arith.mulf %815, %816 : vector<8x128xf32>
    %cst_142 = arith.constant 2.000000e+00 : f32
    %818 = vector.broadcast %cst_142 : f32 to vector<8x128xf32>
    %819 = arith.subf %818, %817 : vector<8x128xf32>
    %820 = arith.mulf %816, %819 : vector<8x128xf32>
    %cst_143 = arith.constant 1.06140542 : f32
    %821 = vector.broadcast %cst_143 : f32 to vector<8x128xf32>
    %822 = arith.mulf %821, %820 : vector<8x128xf32>
    %cst_144 = arith.constant -1.45315206 : f32
    %823 = vector.broadcast %cst_144 : f32 to vector<8x128xf32>
    %824 = arith.addf %822, %823 : vector<8x128xf32>
    %825 = arith.mulf %824, %820 : vector<8x128xf32>
    %cst_145 = arith.constant 1.42141378 : f32
    %826 = vector.broadcast %cst_145 : f32 to vector<8x128xf32>
    %827 = arith.addf %825, %826 : vector<8x128xf32>
    %828 = arith.mulf %827, %820 : vector<8x128xf32>
    %cst_146 = arith.constant -0.284496725 : f32
    %829 = vector.broadcast %cst_146 : f32 to vector<8x128xf32>
    %830 = arith.addf %828, %829 : vector<8x128xf32>
    %831 = arith.mulf %830, %820 : vector<8x128xf32>
    %cst_147 = arith.constant 0.254829586 : f32
    %832 = vector.broadcast %cst_147 : f32 to vector<8x128xf32>
    %833 = arith.addf %831, %832 : vector<8x128xf32>
    %834 = arith.mulf %833, %820 : vector<8x128xf32>
    %cst_148 = arith.constant 0.000000e+00 : f32
    %835 = vector.broadcast %cst_148 : f32 to vector<8x128xf32>
    %836 = arith.subf %835, %809 : vector<8x128xf32>
    %837 = arith.mulf %836, %809 : vector<8x128xf32>
    %838 = math.exp %837 : vector<8x128xf32>
    %839 = arith.mulf %834, %838 : vector<8x128xf32>
    %840 = arith.mulf %811, %839 : vector<8x128xf32>
    %cst_149 = arith.constant 1.000000e+00 : f32
    %841 = vector.broadcast %cst_149 : f32 to vector<8x128xf32>
    %842 = arith.subf %556, %841 : vector<8x128xf32>
    %843 = math.exp %842 : vector<8x128xf32>
    %cst_150 = arith.constant 1.000000e+00 : f32
    %844 = vector.broadcast %cst_150 : f32 to vector<8x128xf32>
    %845 = arith.subf %843, %844 : vector<8x128xf32>
    %cst_151 = arith.constant 0.000000e+00 : f32
    %846 = vector.broadcast %cst_151 : f32 to vector<8x128xf32>
    %847 = arith.subf %846, %845 : vector<8x128xf32>
    %cst_152 = arith.constant 0.707106769 : f32
    %848 = vector.broadcast %cst_152 : f32 to vector<8x128xf32>
    %849 = arith.mulf %847, %848 : vector<8x128xf32>
    %cst_153 = arith.constant 5.000000e-01 : f32
    %850 = vector.broadcast %cst_153 : f32 to vector<8x128xf32>
    %851 = arith.mulf %850, %845 : vector<8x128xf32>
    %cst_154 = arith.constant 0.327591091 : f32
    %852 = vector.broadcast %cst_154 : f32 to vector<8x128xf32>
    %853 = arith.mulf %852, %849 : vector<8x128xf32>
    %cst_155 = arith.constant 1.000000e+00 : f32
    %854 = vector.broadcast %cst_155 : f32 to vector<8x128xf32>
    %855 = arith.addf %854, %853 : vector<8x128xf32>
    %856 = tpu.reciprocal %855 {approx = true} : vector<8x128xf32> -> vector<8x128xf32>
    %857 = arith.mulf %855, %856 : vector<8x128xf32>
    %cst_156 = arith.constant 2.000000e+00 : f32
    %858 = vector.broadcast %cst_156 : f32 to vector<8x128xf32>
    %859 = arith.subf %858, %857 : vector<8x128xf32>
    %860 = arith.mulf %856, %859 : vector<8x128xf32>
    %cst_157 = arith.constant 1.06140542 : f32
    %861 = vector.broadcast %cst_157 : f32 to vector<8x128xf32>
    %862 = arith.mulf %861, %860 : vector<8x128xf32>
    %cst_158 = arith.constant -1.45315206 : f32
    %863 = vector.broadcast %cst_158 : f32 to vector<8x128xf32>
    %864 = arith.addf %862, %863 : vector<8x128xf32>
    %865 = arith.mulf %864, %860 : vector<8x128xf32>
    %cst_159 = arith.constant 1.42141378 : f32
    %866 = vector.broadcast %cst_159 : f32 to vector<8x128xf32>
    %867 = arith.addf %865, %866 : vector<8x128xf32>
    %868 = arith.mulf %867, %860 : vector<8x128xf32>
    %cst_160 = arith.constant -0.284496725 : f32
    %869 = vector.broadcast %cst_160 : f32 to vector<8x128xf32>
    %870 = arith.addf %868, %869 : vector<8x128xf32>
    %871 = arith.mulf %870, %860 : vector<8x128xf32>
    %cst_161 = arith.constant 0.254829586 : f32
    %872 = vector.broadcast %cst_161 : f32 to vector<8x128xf32>
    %873 = arith.addf %871, %872 : vector<8x128xf32>
    %874 = arith.mulf %873, %860 : vector<8x128xf32>
    %cst_162 = arith.constant 0.000000e+00 : f32
    %875 = vector.broadcast %cst_162 : f32 to vector<8x128xf32>
    %876 = arith.subf %875, %849 : vector<8x128xf32>
    %877 = arith.mulf %876, %849 : vector<8x128xf32>
    %878 = math.exp %877 : vector<8x128xf32>
    %879 = arith.mulf %874, %878 : vector<8x128xf32>
    %880 = arith.mulf %851, %879 : vector<8x128xf32>
    %cst_163 = arith.constant 1.000000e+00 : f32
    %881 = vector.broadcast %cst_163 : f32 to vector<8x128xf32>
    %882 = arith.subf %557, %881 : vector<8x128xf32>
    %883 = math.exp %882 : vector<8x128xf32>
    %cst_164 = arith.constant 1.000000e+00 : f32
    %884 = vector.broadcast %cst_164 : f32 to vector<8x128xf32>
    %885 = arith.subf %883, %884 : vector<8x128xf32>
    %cst_165 = arith.constant 0.000000e+00 : f32
    %886 = vector.broadcast %cst_165 : f32 to vector<8x128xf32>
    %887 = arith.subf %886, %885 : vector<8x128xf32>
    %cst_166 = arith.constant 0.707106769 : f32
    %888 = vector.broadcast %cst_166 : f32 to vector<8x128xf32>
    %889 = arith.mulf %887, %888 : vector<8x128xf32>
    %cst_167 = arith.constant 5.000000e-01 : f32
    %890 = vector.broadcast %cst_167 : f32 to vector<8x128xf32>
    %891 = arith.mulf %890, %885 : vector<8x128xf32>
    %cst_168 = arith.constant 0.327591091 : f32
    %892 = vector.broadcast %cst_168 : f32 to vector<8x128xf32>
    %893 = arith.mulf %892, %889 : vector<8x128xf32>
    %cst_169 = arith.constant 1.000000e+00 : f32
    %894 = vector.broadcast %cst_169 : f32 to vector<8x128xf32>
    %895 = arith.addf %894, %893 : vector<8x128xf32>
    %896 = tpu.reciprocal %895 {approx = true} : vector<8x128xf32> -> vector<8x128xf32>
    %897 = arith.mulf %895, %896 : vector<8x128xf32>
    %cst_170 = arith.constant 2.000000e+00 : f32
    %898 = vector.broadcast %cst_170 : f32 to vector<8x128xf32>
    %899 = arith.subf %898, %897 : vector<8x128xf32>
    %900 = arith.mulf %896, %899 : vector<8x128xf32>
    %cst_171 = arith.constant 1.06140542 : f32
    %901 = vector.broadcast %cst_171 : f32 to vector<8x128xf32>
    %902 = arith.mulf %901, %900 : vector<8x128xf32>
    %cst_172 = arith.constant -1.45315206 : f32
    %903 = vector.broadcast %cst_172 : f32 to vector<8x128xf32>
    %904 = arith.addf %902, %903 : vector<8x128xf32>
    %905 = arith.mulf %904, %900 : vector<8x128xf32>
    %cst_173 = arith.constant 1.42141378 : f32
    %906 = vector.broadcast %cst_173 : f32 to vector<8x128xf32>
    %907 = arith.addf %905, %906 : vector<8x128xf32>
    %908 = arith.mulf %907, %900 : vector<8x128xf32>
    %cst_174 = arith.constant -0.284496725 : f32
    %909 = vector.broadcast %cst_174 : f32 to vector<8x128xf32>
    %910 = arith.addf %908, %909 : vector<8x128xf32>
    %911 = arith.mulf %910, %900 : vector<8x128xf32>
    %cst_175 = arith.constant 0.254829586 : f32
    %912 = vector.broadcast %cst_175 : f32 to vector<8x128xf32>
    %913 = arith.addf %911, %912 : vector<8x128xf32>
    %914 = arith.mulf %913, %900 : vector<8x128xf32>
    %cst_176 = arith.constant 0.000000e+00 : f32
    %915 = vector.broadcast %cst_176 : f32 to vector<8x128xf32>
    %916 = arith.subf %915, %889 : vector<8x128xf32>
    %917 = arith.mulf %916, %889 : vector<8x128xf32>
    %918 = math.exp %917 : vector<8x128xf32>
    %919 = arith.mulf %914, %918 : vector<8x128xf32>
    %920 = arith.mulf %891, %919 : vector<8x128xf32>
    %cst_177 = arith.constant 1.000000e+00 : f32
    %921 = vector.broadcast %cst_177 : f32 to vector<8x128xf32>
    %922 = arith.subf %558, %921 : vector<8x128xf32>
    %923 = math.exp %922 : vector<8x128xf32>
    %cst_178 = arith.constant 1.000000e+00 : f32
    %924 = vector.broadcast %cst_178 : f32 to vector<8x128xf32>
    %925 = arith.subf %923, %924 : vector<8x128xf32>
    %cst_179 = arith.constant 0.000000e+00 : f32
    %926 = vector.broadcast %cst_179 : f32 to vector<8x128xf32>
    %927 = arith.subf %926, %925 : vector<8x128xf32>
    %cst_180 = arith.constant 0.707106769 : f32
    %928 = vector.broadcast %cst_180 : f32 to vector<8x128xf32>
    %929 = arith.mulf %927, %928 : vector<8x128xf32>
    %cst_181 = arith.constant 5.000000e-01 : f32
    %930 = vector.broadcast %cst_181 : f32 to vector<8x128xf32>
    %931 = arith.mulf %930, %925 : vector<8x128xf32>
    %cst_182 = arith.constant 0.327591091 : f32
    %932 = vector.broadcast %cst_182 : f32 to vector<8x128xf32>
    %933 = arith.mulf %932, %929 : vector<8x128xf32>
    %cst_183 = arith.constant 1.000000e+00 : f32
    %934 = vector.broadcast %cst_183 : f32 to vector<8x128xf32>
    %935 = arith.addf %934, %933 : vector<8x128xf32>
    %936 = tpu.reciprocal %935 {approx = true} : vector<8x128xf32> -> vector<8x128xf32>
    %937 = arith.mulf %935, %936 : vector<8x128xf32>
    %cst_184 = arith.constant 2.000000e+00 : f32
    %938 = vector.broadcast %cst_184 : f32 to vector<8x128xf32>
    %939 = arith.subf %938, %937 : vector<8x128xf32>
    %940 = arith.mulf %936, %939 : vector<8x128xf32>
    %cst_185 = arith.constant 1.06140542 : f32
    %941 = vector.broadcast %cst_185 : f32 to vector<8x128xf32>
    %942 = arith.mulf %941, %940 : vector<8x128xf32>
    %cst_186 = arith.constant -1.45315206 : f32
    %943 = vector.broadcast %cst_186 : f32 to vector<8x128xf32>
    %944 = arith.addf %942, %943 : vector<8x128xf32>
    %945 = arith.mulf %944, %940 : vector<8x128xf32>
    %cst_187 = arith.constant 1.42141378 : f32
    %946 = vector.broadcast %cst_187 : f32 to vector<8x128xf32>
    %947 = arith.addf %945, %946 : vector<8x128xf32>
    %948 = arith.mulf %947, %940 : vector<8x128xf32>
    %cst_188 = arith.constant -0.284496725 : f32
    %949 = vector.broadcast %cst_188 : f32 to vector<8x128xf32>
    %950 = arith.addf %948, %949 : vector<8x128xf32>
    %951 = arith.mulf %950, %940 : vector<8x128xf32>
    %cst_189 = arith.constant 0.254829586 : f32
    %952 = vector.broadcast %cst_189 : f32 to vector<8x128xf32>
    %953 = arith.addf %951, %952 : vector<8x128xf32>
    %954 = arith.mulf %953, %940 : vector<8x128xf32>
    %cst_190 = arith.constant 0.000000e+00 : f32
    %955 = vector.broadcast %cst_190 : f32 to vector<8x128xf32>
    %956 = arith.subf %955, %929 : vector<8x128xf32>
    %957 = arith.mulf %956, %929 : vector<8x128xf32>
    %958 = math.exp %957 : vector<8x128xf32>
    %959 = arith.mulf %954, %958 : vector<8x128xf32>
    %960 = arith.mulf %931, %959 : vector<8x128xf32>
    %cst_191 = arith.constant 1.000000e+00 : f32
    %961 = vector.broadcast %cst_191 : f32 to vector<8x128xf32>
    %962 = arith.subf %559, %961 : vector<8x128xf32>
    %963 = math.exp %962 : vector<8x128xf32>
    %cst_192 = arith.constant 1.000000e+00 : f32
    %964 = vector.broadcast %cst_192 : f32 to vector<8x128xf32>
    %965 = arith.subf %963, %964 : vector<8x128xf32>
    %cst_193 = arith.constant 0.000000e+00 : f32
    %966 = vector.broadcast %cst_193 : f32 to vector<8x128xf32>
    %967 = arith.subf %966, %965 : vector<8x128xf32>
    %cst_194 = arith.constant 0.707106769 : f32
    %968 = vector.broadcast %cst_194 : f32 to vector<8x128xf32>
    %969 = arith.mulf %967, %968 : vector<8x128xf32>
    %cst_195 = arith.constant 5.000000e-01 : f32
    %970 = vector.broadcast %cst_195 : f32 to vector<8x128xf32>
    %971 = arith.mulf %970, %965 : vector<8x128xf32>
    %cst_196 = arith.constant 0.327591091 : f32
    %972 = vector.broadcast %cst_196 : f32 to vector<8x128xf32>
    %973 = arith.mulf %972, %969 : vector<8x128xf32>
    %cst_197 = arith.constant 1.000000e+00 : f32
    %974 = vector.broadcast %cst_197 : f32 to vector<8x128xf32>
    %975 = arith.addf %974, %973 : vector<8x128xf32>
    %976 = tpu.reciprocal %975 {approx = true} : vector<8x128xf32> -> vector<8x128xf32>
    %977 = arith.mulf %975, %976 : vector<8x128xf32>
    %cst_198 = arith.constant 2.000000e+00 : f32
    %978 = vector.broadcast %cst_198 : f32 to vector<8x128xf32>
    %979 = arith.subf %978, %977 : vector<8x128xf32>
    %980 = arith.mulf %976, %979 : vector<8x128xf32>
    %cst_199 = arith.constant 1.06140542 : f32
    %981 = vector.broadcast %cst_199 : f32 to vector<8x128xf32>
    %982 = arith.mulf %981, %980 : vector<8x128xf32>
    %cst_200 = arith.constant -1.45315206 : f32
    %983 = vector.broadcast %cst_200 : f32 to vector<8x128xf32>
    %984 = arith.addf %982, %983 : vector<8x128xf32>
    %985 = arith.mulf %984, %980 : vector<8x128xf32>
    %cst_201 = arith.constant 1.42141378 : f32
    %986 = vector.broadcast %cst_201 : f32 to vector<8x128xf32>
    %987 = arith.addf %985, %986 : vector<8x128xf32>
    %988 = arith.mulf %987, %980 : vector<8x128xf32>
    %cst_202 = arith.constant -0.284496725 : f32
    %989 = vector.broadcast %cst_202 : f32 to vector<8x128xf32>
    %990 = arith.addf %988, %989 : vector<8x128xf32>
    %991 = arith.mulf %990, %980 : vector<8x128xf32>
    %cst_203 = arith.constant 0.254829586 : f32
    %992 = vector.broadcast %cst_203 : f32 to vector<8x128xf32>
    %993 = arith.addf %991, %992 : vector<8x128xf32>
    %994 = arith.mulf %993, %980 : vector<8x128xf32>
    %cst_204 = arith.constant 0.000000e+00 : f32
    %995 = vector.broadcast %cst_204 : f32 to vector<8x128xf32>
    %996 = arith.subf %995, %969 : vector<8x128xf32>
    %997 = arith.mulf %996, %969 : vector<8x128xf32>
    %998 = math.exp %997 : vector<8x128xf32>
    %999 = arith.mulf %994, %998 : vector<8x128xf32>
    %1000 = arith.mulf %971, %999 : vector<8x128xf32>
    %cst_205 = arith.constant 1.000000e+00 : f32
    %1001 = vector.broadcast %cst_205 : f32 to vector<8x128xf32>
    %1002 = arith.subf %560, %1001 : vector<8x128xf32>
    %1003 = math.exp %1002 : vector<8x128xf32>
    %cst_206 = arith.constant 1.000000e+00 : f32
    %1004 = vector.broadcast %cst_206 : f32 to vector<8x128xf32>
    %1005 = arith.subf %1003, %1004 : vector<8x128xf32>
    %cst_207 = arith.constant 0.000000e+00 : f32
    %1006 = vector.broadcast %cst_207 : f32 to vector<8x128xf32>
    %1007 = arith.subf %1006, %1005 : vector<8x128xf32>
    %cst_208 = arith.constant 0.707106769 : f32
    %1008 = vector.broadcast %cst_208 : f32 to vector<8x128xf32>
    %1009 = arith.mulf %1007, %1008 : vector<8x128xf32>
    %cst_209 = arith.constant 5.000000e-01 : f32
    %1010 = vector.broadcast %cst_209 : f32 to vector<8x128xf32>
    %1011 = arith.mulf %1010, %1005 : vector<8x128xf32>
    %cst_210 = arith.constant 0.327591091 : f32
    %1012 = vector.broadcast %cst_210 : f32 to vector<8x128xf32>
    %1013 = arith.mulf %1012, %1009 : vector<8x128xf32>
    %cst_211 = arith.constant 1.000000e+00 : f32
    %1014 = vector.broadcast %cst_211 : f32 to vector<8x128xf32>
    %1015 = arith.addf %1014, %1013 : vector<8x128xf32>
    %1016 = tpu.reciprocal %1015 {approx = true} : vector<8x128xf32> -> vector<8x128xf32>
    %1017 = arith.mulf %1015, %1016 : vector<8x128xf32>
    %cst_212 = arith.constant 2.000000e+00 : f32
    %1018 = vector.broadcast %cst_212 : f32 to vector<8x128xf32>
    %1019 = arith.subf %1018, %1017 : vector<8x128xf32>
    %1020 = arith.mulf %1016, %1019 : vector<8x128xf32>
    %cst_213 = arith.constant 1.06140542 : f32
    %1021 = vector.broadcast %cst_213 : f32 to vector<8x128xf32>
    %1022 = arith.mulf %1021, %1020 : vector<8x128xf32>
    %cst_214 = arith.constant -1.45315206 : f32
    %1023 = vector.broadcast %cst_214 : f32 to vector<8x128xf32>
    %1024 = arith.addf %1022, %1023 : vector<8x128xf32>
    %1025 = arith.mulf %1024, %1020 : vector<8x128xf32>
    %cst_215 = arith.constant 1.42141378 : f32
    %1026 = vector.broadcast %cst_215 : f32 to vector<8x128xf32>
    %1027 = arith.addf %1025, %1026 : vector<8x128xf32>
    %1028 = arith.mulf %1027, %1020 : vector<8x128xf32>
    %cst_216 = arith.constant -0.284496725 : f32
    %1029 = vector.broadcast %cst_216 : f32 to vector<8x128xf32>
    %1030 = arith.addf %1028, %1029 : vector<8x128xf32>
    %1031 = arith.mulf %1030, %1020 : vector<8x128xf32>
    %cst_217 = arith.constant 0.254829586 : f32
    %1032 = vector.broadcast %cst_217 : f32 to vector<8x128xf32>
    %1033 = arith.addf %1031, %1032 : vector<8x128xf32>
    %1034 = arith.mulf %1033, %1020 : vector<8x128xf32>
    %cst_218 = arith.constant 0.000000e+00 : f32
    %1035 = vector.broadcast %cst_218 : f32 to vector<8x128xf32>
    %1036 = arith.subf %1035, %1009 : vector<8x128xf32>
    %1037 = arith.mulf %1036, %1009 : vector<8x128xf32>
    %1038 = math.exp %1037 : vector<8x128xf32>
    %1039 = arith.mulf %1034, %1038 : vector<8x128xf32>
    %1040 = arith.mulf %1011, %1039 : vector<8x128xf32>
    %c0_219 = arith.constant 0 : index
    %1041 = memref.load %arg4[%c0_219] : memref<72xf32, #tpu.memory_space<smem>>
    %1042 = vector.broadcast %1041 : f32 to vector<8x128xf32>
    %1043 = arith.mulf %600, %1042 : vector<8x128xf32>
    %c1_220 = arith.constant 1 : index
    %1044 = memref.load %arg4[%c1_220] : memref<72xf32, #tpu.memory_space<smem>>
    %1045 = vector.broadcast %1044 : f32 to vector<8x128xf32>
    %1046 = arith.mulf %640, %1045 : vector<8x128xf32>
    %1047 = arith.addf %1043, %1046 : vector<8x128xf32>
    %c2_221 = arith.constant 2 : index
    %1048 = memref.load %arg4[%c2_221] : memref<72xf32, #tpu.memory_space<smem>>
    %1049 = vector.broadcast %1048 : f32 to vector<8x128xf32>
    %1050 = arith.mulf %680, %1049 : vector<8x128xf32>
    %1051 = arith.addf %1047, %1050 : vector<8x128xf32>
    %c3_222 = arith.constant 3 : index
    %1052 = memref.load %arg4[%c3_222] : memref<72xf32, #tpu.memory_space<smem>>
    %1053 = vector.broadcast %1052 : f32 to vector<8x128xf32>
    %1054 = arith.mulf %720, %1053 : vector<8x128xf32>
    %1055 = arith.addf %1051, %1054 : vector<8x128xf32>
    %c4_223 = arith.constant 4 : index
    %1056 = memref.load %arg4[%c4_223] : memref<72xf32, #tpu.memory_space<smem>>
    %1057 = vector.broadcast %1056 : f32 to vector<8x128xf32>
    %1058 = arith.mulf %760, %1057 : vector<8x128xf32>
    %1059 = arith.addf %1055, %1058 : vector<8x128xf32>
    %c5_224 = arith.constant 5 : index
    %1060 = memref.load %arg4[%c5_224] : memref<72xf32, #tpu.memory_space<smem>>
    %1061 = vector.broadcast %1060 : f32 to vector<8x128xf32>
    %1062 = arith.mulf %800, %1061 : vector<8x128xf32>
    %1063 = arith.addf %1059, %1062 : vector<8x128xf32>
    %c6_225 = arith.constant 6 : index
    %1064 = memref.load %arg4[%c6_225] : memref<72xf32, #tpu.memory_space<smem>>
    %1065 = vector.broadcast %1064 : f32 to vector<8x128xf32>
    %1066 = arith.mulf %840, %1065 : vector<8x128xf32>
    %1067 = arith.addf %1063, %1066 : vector<8x128xf32>
    %c7_226 = arith.constant 7 : index
    %1068 = memref.load %arg4[%c7_226] : memref<72xf32, #tpu.memory_space<smem>>
    %1069 = vector.broadcast %1068 : f32 to vector<8x128xf32>
    %1070 = arith.mulf %880, %1069 : vector<8x128xf32>
    %1071 = arith.addf %1067, %1070 : vector<8x128xf32>
    %c8_227 = arith.constant 8 : index
    %1072 = memref.load %arg4[%c8_227] : memref<72xf32, #tpu.memory_space<smem>>
    %1073 = vector.broadcast %1072 : f32 to vector<8x128xf32>
    %1074 = arith.mulf %920, %1073 : vector<8x128xf32>
    %1075 = arith.addf %1071, %1074 : vector<8x128xf32>
    %c9_228 = arith.constant 9 : index
    %1076 = memref.load %arg4[%c9_228] : memref<72xf32, #tpu.memory_space<smem>>
    %1077 = vector.broadcast %1076 : f32 to vector<8x128xf32>
    %1078 = arith.mulf %960, %1077 : vector<8x128xf32>
    %1079 = arith.addf %1075, %1078 : vector<8x128xf32>
    %c10_229 = arith.constant 10 : index
    %1080 = memref.load %arg4[%c10_229] : memref<72xf32, #tpu.memory_space<smem>>
    %1081 = vector.broadcast %1080 : f32 to vector<8x128xf32>
    %1082 = arith.mulf %1000, %1081 : vector<8x128xf32>
    %1083 = arith.addf %1079, %1082 : vector<8x128xf32>
    %c11_230 = arith.constant 11 : index
    %1084 = memref.load %arg4[%c11_230] : memref<72xf32, #tpu.memory_space<smem>>
    %1085 = vector.broadcast %1084 : f32 to vector<8x128xf32>
    %1086 = arith.mulf %1040, %1085 : vector<8x128xf32>
    %1087 = arith.addf %1083, %1086 : vector<8x128xf32>
    %c0_231 = arith.constant 0 : index
    %1088 = memref.load %arg5[%c0_231] : memref<6xf32, #tpu.memory_space<smem>>
    %1089 = vector.broadcast %1088 : f32 to vector<8x128xf32>
    %1090 = arith.addf %1087, %1089 : vector<8x128xf32>
    %cst_232 = arith.constant 0.707106769 : f32
    %1091 = vector.broadcast %cst_232 : f32 to vector<8x128xf32>
    %1092 = arith.mulf %1090, %1091 : vector<8x128xf32>
    %1093 = math.absf %1092 : vector<8x128xf32>
    %cst_233 = arith.constant 0.327591091 : f32
    %1094 = vector.broadcast %cst_233 : f32 to vector<8x128xf32>
    %1095 = arith.mulf %1094, %1093 : vector<8x128xf32>
    %cst_234 = arith.constant 1.000000e+00 : f32
    %1096 = vector.broadcast %cst_234 : f32 to vector<8x128xf32>
    %1097 = arith.addf %1096, %1095 : vector<8x128xf32>
    %1098 = tpu.reciprocal %1097 {approx = true} : vector<8x128xf32> -> vector<8x128xf32>
    %1099 = arith.mulf %1097, %1098 : vector<8x128xf32>
    %cst_235 = arith.constant 2.000000e+00 : f32
    %1100 = vector.broadcast %cst_235 : f32 to vector<8x128xf32>
    %1101 = arith.subf %1100, %1099 : vector<8x128xf32>
    %1102 = arith.mulf %1098, %1101 : vector<8x128xf32>
    %cst_236 = arith.constant 1.06140542 : f32
    %1103 = vector.broadcast %cst_236 : f32 to vector<8x128xf32>
    %1104 = arith.mulf %1103, %1102 : vector<8x128xf32>
    %cst_237 = arith.constant -1.45315206 : f32
    %1105 = vector.broadcast %cst_237 : f32 to vector<8x128xf32>
    %1106 = arith.addf %1104, %1105 : vector<8x128xf32>
    %1107 = arith.mulf %1106, %1102 : vector<8x128xf32>
    %cst_238 = arith.constant 1.42141378 : f32
    %1108 = vector.broadcast %cst_238 : f32 to vector<8x128xf32>
    %1109 = arith.addf %1107, %1108 : vector<8x128xf32>
    %1110 = arith.mulf %1109, %1102 : vector<8x128xf32>
    %cst_239 = arith.constant -0.284496725 : f32
    %1111 = vector.broadcast %cst_239 : f32 to vector<8x128xf32>
    %1112 = arith.addf %1110, %1111 : vector<8x128xf32>
    %1113 = arith.mulf %1112, %1102 : vector<8x128xf32>
    %cst_240 = arith.constant 0.254829586 : f32
    %1114 = vector.broadcast %cst_240 : f32 to vector<8x128xf32>
    %1115 = arith.addf %1113, %1114 : vector<8x128xf32>
    %1116 = arith.mulf %1115, %1102 : vector<8x128xf32>
    %cst_241 = arith.constant 0.000000e+00 : f32
    %1117 = vector.broadcast %cst_241 : f32 to vector<8x128xf32>
    %1118 = arith.subf %1117, %1093 : vector<8x128xf32>
    %1119 = arith.mulf %1118, %1093 : vector<8x128xf32>
    %1120 = math.exp %1119 : vector<8x128xf32>
    %1121 = arith.mulf %1116, %1120 : vector<8x128xf32>
    %cst_242 = arith.constant 0.000000e+00 : f32
    %1122 = vector.broadcast %cst_242 : f32 to vector<8x128xf32>
    %1123 = arith.cmpf oge, %1092, %1122 : vector<8x128xf32>
    %cst_243 = arith.constant 1.000000e+00 : f32
    %1124 = vector.broadcast %cst_243 : f32 to vector<8x128xf32>
    %1125 = arith.subf %1124, %1121 : vector<8x128xf32>
    %cst_244 = arith.constant 1.000000e+00 : f32
    %1126 = vector.broadcast %cst_244 : f32 to vector<8x128xf32>
    %1127 = arith.subf %1121, %1126 : vector<8x128xf32>
    %1128 = arith.select %1123, %1125, %1127 : vector<8x128xi1>, vector<8x128xf32>
    %cst_245 = arith.constant 5.000000e-01 : f32
    %1129 = vector.broadcast %cst_245 : f32 to vector<8x128xf32>
    %1130 = arith.mulf %1129, %1090 : vector<8x128xf32>
    %cst_246 = arith.constant 1.000000e+00 : f32
    %1131 = vector.broadcast %cst_246 : f32 to vector<8x128xf32>
    %1132 = arith.addf %1131, %1128 : vector<8x128xf32>
    %1133 = arith.mulf %1130, %1132 : vector<8x128xf32>
    %c12_247 = arith.constant 12 : index
    %1134 = memref.load %arg4[%c12_247] : memref<72xf32, #tpu.memory_space<smem>>
    %1135 = vector.broadcast %1134 : f32 to vector<8x128xf32>
    %1136 = arith.mulf %600, %1135 : vector<8x128xf32>
    %c13_248 = arith.constant 13 : index
    %1137 = memref.load %arg4[%c13_248] : memref<72xf32, #tpu.memory_space<smem>>
    %1138 = vector.broadcast %1137 : f32 to vector<8x128xf32>
    %1139 = arith.mulf %640, %1138 : vector<8x128xf32>
    %1140 = arith.addf %1136, %1139 : vector<8x128xf32>
    %c14_249 = arith.constant 14 : index
    %1141 = memref.load %arg4[%c14_249] : memref<72xf32, #tpu.memory_space<smem>>
    %1142 = vector.broadcast %1141 : f32 to vector<8x128xf32>
    %1143 = arith.mulf %680, %1142 : vector<8x128xf32>
    %1144 = arith.addf %1140, %1143 : vector<8x128xf32>
    %c15_250 = arith.constant 15 : index
    %1145 = memref.load %arg4[%c15_250] : memref<72xf32, #tpu.memory_space<smem>>
    %1146 = vector.broadcast %1145 : f32 to vector<8x128xf32>
    %1147 = arith.mulf %720, %1146 : vector<8x128xf32>
    %1148 = arith.addf %1144, %1147 : vector<8x128xf32>
    %c16_251 = arith.constant 16 : index
    %1149 = memref.load %arg4[%c16_251] : memref<72xf32, #tpu.memory_space<smem>>
    %1150 = vector.broadcast %1149 : f32 to vector<8x128xf32>
    %1151 = arith.mulf %760, %1150 : vector<8x128xf32>
    %1152 = arith.addf %1148, %1151 : vector<8x128xf32>
    %c17_252 = arith.constant 17 : index
    %1153 = memref.load %arg4[%c17_252] : memref<72xf32, #tpu.memory_space<smem>>
    %1154 = vector.broadcast %1153 : f32 to vector<8x128xf32>
    %1155 = arith.mulf %800, %1154 : vector<8x128xf32>
    %1156 = arith.addf %1152, %1155 : vector<8x128xf32>
    %c18_253 = arith.constant 18 : index
    %1157 = memref.load %arg4[%c18_253] : memref<72xf32, #tpu.memory_space<smem>>
    %1158 = vector.broadcast %1157 : f32 to vector<8x128xf32>
    %1159 = arith.mulf %840, %1158 : vector<8x128xf32>
    %1160 = arith.addf %1156, %1159 : vector<8x128xf32>
    %c19_254 = arith.constant 19 : index
    %1161 = memref.load %arg4[%c19_254] : memref<72xf32, #tpu.memory_space<smem>>
    %1162 = vector.broadcast %1161 : f32 to vector<8x128xf32>
    %1163 = arith.mulf %880, %1162 : vector<8x128xf32>
    %1164 = arith.addf %1160, %1163 : vector<8x128xf32>
    %c20_255 = arith.constant 20 : index
    %1165 = memref.load %arg4[%c20_255] : memref<72xf32, #tpu.memory_space<smem>>
    %1166 = vector.broadcast %1165 : f32 to vector<8x128xf32>
    %1167 = arith.mulf %920, %1166 : vector<8x128xf32>
    %1168 = arith.addf %1164, %1167 : vector<8x128xf32>
    %c21_256 = arith.constant 21 : index
    %1169 = memref.load %arg4[%c21_256] : memref<72xf32, #tpu.memory_space<smem>>
    %1170 = vector.broadcast %1169 : f32 to vector<8x128xf32>
    %1171 = arith.mulf %960, %1170 : vector<8x128xf32>
    %1172 = arith.addf %1168, %1171 : vector<8x128xf32>
    %c22_257 = arith.constant 22 : index
    %1173 = memref.load %arg4[%c22_257] : memref<72xf32, #tpu.memory_space<smem>>
    %1174 = vector.broadcast %1173 : f32 to vector<8x128xf32>
    %1175 = arith.mulf %1000, %1174 : vector<8x128xf32>
    %1176 = arith.addf %1172, %1175 : vector<8x128xf32>
    %c23_258 = arith.constant 23 : index
    %1177 = memref.load %arg4[%c23_258] : memref<72xf32, #tpu.memory_space<smem>>
    %1178 = vector.broadcast %1177 : f32 to vector<8x128xf32>
    %1179 = arith.mulf %1040, %1178 : vector<8x128xf32>
    %1180 = arith.addf %1176, %1179 : vector<8x128xf32>
    %c1_259 = arith.constant 1 : index
    %1181 = memref.load %arg5[%c1_259] : memref<6xf32, #tpu.memory_space<smem>>
    %1182 = vector.broadcast %1181 : f32 to vector<8x128xf32>
    %1183 = arith.addf %1180, %1182 : vector<8x128xf32>
    %cst_260 = arith.constant 0.707106769 : f32
    %1184 = vector.broadcast %cst_260 : f32 to vector<8x128xf32>
    %1185 = arith.mulf %1183, %1184 : vector<8x128xf32>
    %1186 = math.absf %1185 : vector<8x128xf32>
    %cst_261 = arith.constant 0.327591091 : f32
    %1187 = vector.broadcast %cst_261 : f32 to vector<8x128xf32>
    %1188 = arith.mulf %1187, %1186 : vector<8x128xf32>
    %cst_262 = arith.constant 1.000000e+00 : f32
    %1189 = vector.broadcast %cst_262 : f32 to vector<8x128xf32>
    %1190 = arith.addf %1189, %1188 : vector<8x128xf32>
    %1191 = tpu.reciprocal %1190 {approx = true} : vector<8x128xf32> -> vector<8x128xf32>
    %1192 = arith.mulf %1190, %1191 : vector<8x128xf32>
    %cst_263 = arith.constant 2.000000e+00 : f32
    %1193 = vector.broadcast %cst_263 : f32 to vector<8x128xf32>
    %1194 = arith.subf %1193, %1192 : vector<8x128xf32>
    %1195 = arith.mulf %1191, %1194 : vector<8x128xf32>
    %cst_264 = arith.constant 1.06140542 : f32
    %1196 = vector.broadcast %cst_264 : f32 to vector<8x128xf32>
    %1197 = arith.mulf %1196, %1195 : vector<8x128xf32>
    %cst_265 = arith.constant -1.45315206 : f32
    %1198 = vector.broadcast %cst_265 : f32 to vector<8x128xf32>
    %1199 = arith.addf %1197, %1198 : vector<8x128xf32>
    %1200 = arith.mulf %1199, %1195 : vector<8x128xf32>
    %cst_266 = arith.constant 1.42141378 : f32
    %1201 = vector.broadcast %cst_266 : f32 to vector<8x128xf32>
    %1202 = arith.addf %1200, %1201 : vector<8x128xf32>
    %1203 = arith.mulf %1202, %1195 : vector<8x128xf32>
    %cst_267 = arith.constant -0.284496725 : f32
    %1204 = vector.broadcast %cst_267 : f32 to vector<8x128xf32>
    %1205 = arith.addf %1203, %1204 : vector<8x128xf32>
    %1206 = arith.mulf %1205, %1195 : vector<8x128xf32>
    %cst_268 = arith.constant 0.254829586 : f32
    %1207 = vector.broadcast %cst_268 : f32 to vector<8x128xf32>
    %1208 = arith.addf %1206, %1207 : vector<8x128xf32>
    %1209 = arith.mulf %1208, %1195 : vector<8x128xf32>
    %cst_269 = arith.constant 0.000000e+00 : f32
    %1210 = vector.broadcast %cst_269 : f32 to vector<8x128xf32>
    %1211 = arith.subf %1210, %1186 : vector<8x128xf32>
    %1212 = arith.mulf %1211, %1186 : vector<8x128xf32>
    %1213 = math.exp %1212 : vector<8x128xf32>
    %1214 = arith.mulf %1209, %1213 : vector<8x128xf32>
    %cst_270 = arith.constant 0.000000e+00 : f32
    %1215 = vector.broadcast %cst_270 : f32 to vector<8x128xf32>
    %1216 = arith.cmpf oge, %1185, %1215 : vector<8x128xf32>
    %cst_271 = arith.constant 1.000000e+00 : f32
    %1217 = vector.broadcast %cst_271 : f32 to vector<8x128xf32>
    %1218 = arith.subf %1217, %1214 : vector<8x128xf32>
    %cst_272 = arith.constant 1.000000e+00 : f32
    %1219 = vector.broadcast %cst_272 : f32 to vector<8x128xf32>
    %1220 = arith.subf %1214, %1219 : vector<8x128xf32>
    %1221 = arith.select %1216, %1218, %1220 : vector<8x128xi1>, vector<8x128xf32>
    %cst_273 = arith.constant 5.000000e-01 : f32
    %1222 = vector.broadcast %cst_273 : f32 to vector<8x128xf32>
    %1223 = arith.mulf %1222, %1183 : vector<8x128xf32>
    %cst_274 = arith.constant 1.000000e+00 : f32
    %1224 = vector.broadcast %cst_274 : f32 to vector<8x128xf32>
    %1225 = arith.addf %1224, %1221 : vector<8x128xf32>
    %1226 = arith.mulf %1223, %1225 : vector<8x128xf32>
    %c24_275 = arith.constant 24 : index
    %1227 = memref.load %arg4[%c24_275] : memref<72xf32, #tpu.memory_space<smem>>
    %1228 = vector.broadcast %1227 : f32 to vector<8x128xf32>
    %1229 = arith.mulf %600, %1228 : vector<8x128xf32>
    %c25_276 = arith.constant 25 : index
    %1230 = memref.load %arg4[%c25_276] : memref<72xf32, #tpu.memory_space<smem>>
    %1231 = vector.broadcast %1230 : f32 to vector<8x128xf32>
    %1232 = arith.mulf %640, %1231 : vector<8x128xf32>
    %1233 = arith.addf %1229, %1232 : vector<8x128xf32>
    %c26_277 = arith.constant 26 : index
    %1234 = memref.load %arg4[%c26_277] : memref<72xf32, #tpu.memory_space<smem>>
    %1235 = vector.broadcast %1234 : f32 to vector<8x128xf32>
    %1236 = arith.mulf %680, %1235 : vector<8x128xf32>
    %1237 = arith.addf %1233, %1236 : vector<8x128xf32>
    %c27_278 = arith.constant 27 : index
    %1238 = memref.load %arg4[%c27_278] : memref<72xf32, #tpu.memory_space<smem>>
    %1239 = vector.broadcast %1238 : f32 to vector<8x128xf32>
    %1240 = arith.mulf %720, %1239 : vector<8x128xf32>
    %1241 = arith.addf %1237, %1240 : vector<8x128xf32>
    %c28_279 = arith.constant 28 : index
    %1242 = memref.load %arg4[%c28_279] : memref<72xf32, #tpu.memory_space<smem>>
    %1243 = vector.broadcast %1242 : f32 to vector<8x128xf32>
    %1244 = arith.mulf %760, %1243 : vector<8x128xf32>
    %1245 = arith.addf %1241, %1244 : vector<8x128xf32>
    %c29_280 = arith.constant 29 : index
    %1246 = memref.load %arg4[%c29_280] : memref<72xf32, #tpu.memory_space<smem>>
    %1247 = vector.broadcast %1246 : f32 to vector<8x128xf32>
    %1248 = arith.mulf %800, %1247 : vector<8x128xf32>
    %1249 = arith.addf %1245, %1248 : vector<8x128xf32>
    %c30_281 = arith.constant 30 : index
    %1250 = memref.load %arg4[%c30_281] : memref<72xf32, #tpu.memory_space<smem>>
    %1251 = vector.broadcast %1250 : f32 to vector<8x128xf32>
    %1252 = arith.mulf %840, %1251 : vector<8x128xf32>
    %1253 = arith.addf %1249, %1252 : vector<8x128xf32>
    %c31_282 = arith.constant 31 : index
    %1254 = memref.load %arg4[%c31_282] : memref<72xf32, #tpu.memory_space<smem>>
    %1255 = vector.broadcast %1254 : f32 to vector<8x128xf32>
    %1256 = arith.mulf %880, %1255 : vector<8x128xf32>
    %1257 = arith.addf %1253, %1256 : vector<8x128xf32>
    %c32_283 = arith.constant 32 : index
    %1258 = memref.load %arg4[%c32_283] : memref<72xf32, #tpu.memory_space<smem>>
    %1259 = vector.broadcast %1258 : f32 to vector<8x128xf32>
    %1260 = arith.mulf %920, %1259 : vector<8x128xf32>
    %1261 = arith.addf %1257, %1260 : vector<8x128xf32>
    %c33_284 = arith.constant 33 : index
    %1262 = memref.load %arg4[%c33_284] : memref<72xf32, #tpu.memory_space<smem>>
    %1263 = vector.broadcast %1262 : f32 to vector<8x128xf32>
    %1264 = arith.mulf %960, %1263 : vector<8x128xf32>
    %1265 = arith.addf %1261, %1264 : vector<8x128xf32>
    %c34_285 = arith.constant 34 : index
    %1266 = memref.load %arg4[%c34_285] : memref<72xf32, #tpu.memory_space<smem>>
    %1267 = vector.broadcast %1266 : f32 to vector<8x128xf32>
    %1268 = arith.mulf %1000, %1267 : vector<8x128xf32>
    %1269 = arith.addf %1265, %1268 : vector<8x128xf32>
    %c35_286 = arith.constant 35 : index
    %1270 = memref.load %arg4[%c35_286] : memref<72xf32, #tpu.memory_space<smem>>
    %1271 = vector.broadcast %1270 : f32 to vector<8x128xf32>
    %1272 = arith.mulf %1040, %1271 : vector<8x128xf32>
    %1273 = arith.addf %1269, %1272 : vector<8x128xf32>
    %c2_287 = arith.constant 2 : index
    %1274 = memref.load %arg5[%c2_287] : memref<6xf32, #tpu.memory_space<smem>>
    %1275 = vector.broadcast %1274 : f32 to vector<8x128xf32>
    %1276 = arith.addf %1273, %1275 : vector<8x128xf32>
    %cst_288 = arith.constant 0.707106769 : f32
    %1277 = vector.broadcast %cst_288 : f32 to vector<8x128xf32>
    %1278 = arith.mulf %1276, %1277 : vector<8x128xf32>
    %1279 = math.absf %1278 : vector<8x128xf32>
    %cst_289 = arith.constant 0.327591091 : f32
    %1280 = vector.broadcast %cst_289 : f32 to vector<8x128xf32>
    %1281 = arith.mulf %1280, %1279 : vector<8x128xf32>
    %cst_290 = arith.constant 1.000000e+00 : f32
    %1282 = vector.broadcast %cst_290 : f32 to vector<8x128xf32>
    %1283 = arith.addf %1282, %1281 : vector<8x128xf32>
    %1284 = tpu.reciprocal %1283 {approx = true} : vector<8x128xf32> -> vector<8x128xf32>
    %1285 = arith.mulf %1283, %1284 : vector<8x128xf32>
    %cst_291 = arith.constant 2.000000e+00 : f32
    %1286 = vector.broadcast %cst_291 : f32 to vector<8x128xf32>
    %1287 = arith.subf %1286, %1285 : vector<8x128xf32>
    %1288 = arith.mulf %1284, %1287 : vector<8x128xf32>
    %cst_292 = arith.constant 1.06140542 : f32
    %1289 = vector.broadcast %cst_292 : f32 to vector<8x128xf32>
    %1290 = arith.mulf %1289, %1288 : vector<8x128xf32>
    %cst_293 = arith.constant -1.45315206 : f32
    %1291 = vector.broadcast %cst_293 : f32 to vector<8x128xf32>
    %1292 = arith.addf %1290, %1291 : vector<8x128xf32>
    %1293 = arith.mulf %1292, %1288 : vector<8x128xf32>
    %cst_294 = arith.constant 1.42141378 : f32
    %1294 = vector.broadcast %cst_294 : f32 to vector<8x128xf32>
    %1295 = arith.addf %1293, %1294 : vector<8x128xf32>
    %1296 = arith.mulf %1295, %1288 : vector<8x128xf32>
    %cst_295 = arith.constant -0.284496725 : f32
    %1297 = vector.broadcast %cst_295 : f32 to vector<8x128xf32>
    %1298 = arith.addf %1296, %1297 : vector<8x128xf32>
    %1299 = arith.mulf %1298, %1288 : vector<8x128xf32>
    %cst_296 = arith.constant 0.254829586 : f32
    %1300 = vector.broadcast %cst_296 : f32 to vector<8x128xf32>
    %1301 = arith.addf %1299, %1300 : vector<8x128xf32>
    %1302 = arith.mulf %1301, %1288 : vector<8x128xf32>
    %cst_297 = arith.constant 0.000000e+00 : f32
    %1303 = vector.broadcast %cst_297 : f32 to vector<8x128xf32>
    %1304 = arith.subf %1303, %1279 : vector<8x128xf32>
    %1305 = arith.mulf %1304, %1279 : vector<8x128xf32>
    %1306 = math.exp %1305 : vector<8x128xf32>
    %1307 = arith.mulf %1302, %1306 : vector<8x128xf32>
    %cst_298 = arith.constant 0.000000e+00 : f32
    %1308 = vector.broadcast %cst_298 : f32 to vector<8x128xf32>
    %1309 = arith.cmpf oge, %1278, %1308 : vector<8x128xf32>
    %cst_299 = arith.constant 1.000000e+00 : f32
    %1310 = vector.broadcast %cst_299 : f32 to vector<8x128xf32>
    %1311 = arith.subf %1310, %1307 : vector<8x128xf32>
    %cst_300 = arith.constant 1.000000e+00 : f32
    %1312 = vector.broadcast %cst_300 : f32 to vector<8x128xf32>
    %1313 = arith.subf %1307, %1312 : vector<8x128xf32>
    %1314 = arith.select %1309, %1311, %1313 : vector<8x128xi1>, vector<8x128xf32>
    %cst_301 = arith.constant 5.000000e-01 : f32
    %1315 = vector.broadcast %cst_301 : f32 to vector<8x128xf32>
    %1316 = arith.mulf %1315, %1276 : vector<8x128xf32>
    %cst_302 = arith.constant 1.000000e+00 : f32
    %1317 = vector.broadcast %cst_302 : f32 to vector<8x128xf32>
    %1318 = arith.addf %1317, %1314 : vector<8x128xf32>
    %1319 = arith.mulf %1316, %1318 : vector<8x128xf32>
    %c36_303 = arith.constant 36 : index
    %1320 = memref.load %arg4[%c36_303] : memref<72xf32, #tpu.memory_space<smem>>
    %1321 = vector.broadcast %1320 : f32 to vector<8x128xf32>
    %1322 = arith.mulf %600, %1321 : vector<8x128xf32>
    %c37_304 = arith.constant 37 : index
    %1323 = memref.load %arg4[%c37_304] : memref<72xf32, #tpu.memory_space<smem>>
    %1324 = vector.broadcast %1323 : f32 to vector<8x128xf32>
    %1325 = arith.mulf %640, %1324 : vector<8x128xf32>
    %1326 = arith.addf %1322, %1325 : vector<8x128xf32>
    %c38_305 = arith.constant 38 : index
    %1327 = memref.load %arg4[%c38_305] : memref<72xf32, #tpu.memory_space<smem>>
    %1328 = vector.broadcast %1327 : f32 to vector<8x128xf32>
    %1329 = arith.mulf %680, %1328 : vector<8x128xf32>
    %1330 = arith.addf %1326, %1329 : vector<8x128xf32>
    %c39_306 = arith.constant 39 : index
    %1331 = memref.load %arg4[%c39_306] : memref<72xf32, #tpu.memory_space<smem>>
    %1332 = vector.broadcast %1331 : f32 to vector<8x128xf32>
    %1333 = arith.mulf %720, %1332 : vector<8x128xf32>
    %1334 = arith.addf %1330, %1333 : vector<8x128xf32>
    %c40_307 = arith.constant 40 : index
    %1335 = memref.load %arg4[%c40_307] : memref<72xf32, #tpu.memory_space<smem>>
    %1336 = vector.broadcast %1335 : f32 to vector<8x128xf32>
    %1337 = arith.mulf %760, %1336 : vector<8x128xf32>
    %1338 = arith.addf %1334, %1337 : vector<8x128xf32>
    %c41_308 = arith.constant 41 : index
    %1339 = memref.load %arg4[%c41_308] : memref<72xf32, #tpu.memory_space<smem>>
    %1340 = vector.broadcast %1339 : f32 to vector<8x128xf32>
    %1341 = arith.mulf %800, %1340 : vector<8x128xf32>
    %1342 = arith.addf %1338, %1341 : vector<8x128xf32>
    %c42_309 = arith.constant 42 : index
    %1343 = memref.load %arg4[%c42_309] : memref<72xf32, #tpu.memory_space<smem>>
    %1344 = vector.broadcast %1343 : f32 to vector<8x128xf32>
    %1345 = arith.mulf %840, %1344 : vector<8x128xf32>
    %1346 = arith.addf %1342, %1345 : vector<8x128xf32>
    %c43_310 = arith.constant 43 : index
    %1347 = memref.load %arg4[%c43_310] : memref<72xf32, #tpu.memory_space<smem>>
    %1348 = vector.broadcast %1347 : f32 to vector<8x128xf32>
    %1349 = arith.mulf %880, %1348 : vector<8x128xf32>
    %1350 = arith.addf %1346, %1349 : vector<8x128xf32>
    %c44_311 = arith.constant 44 : index
    %1351 = memref.load %arg4[%c44_311] : memref<72xf32, #tpu.memory_space<smem>>
    %1352 = vector.broadcast %1351 : f32 to vector<8x128xf32>
    %1353 = arith.mulf %920, %1352 : vector<8x128xf32>
    %1354 = arith.addf %1350, %1353 : vector<8x128xf32>
    %c45_312 = arith.constant 45 : index
    %1355 = memref.load %arg4[%c45_312] : memref<72xf32, #tpu.memory_space<smem>>
    %1356 = vector.broadcast %1355 : f32 to vector<8x128xf32>
    %1357 = arith.mulf %960, %1356 : vector<8x128xf32>
    %1358 = arith.addf %1354, %1357 : vector<8x128xf32>
    %c46_313 = arith.constant 46 : index
    %1359 = memref.load %arg4[%c46_313] : memref<72xf32, #tpu.memory_space<smem>>
    %1360 = vector.broadcast %1359 : f32 to vector<8x128xf32>
    %1361 = arith.mulf %1000, %1360 : vector<8x128xf32>
    %1362 = arith.addf %1358, %1361 : vector<8x128xf32>
    %c47_314 = arith.constant 47 : index
    %1363 = memref.load %arg4[%c47_314] : memref<72xf32, #tpu.memory_space<smem>>
    %1364 = vector.broadcast %1363 : f32 to vector<8x128xf32>
    %1365 = arith.mulf %1040, %1364 : vector<8x128xf32>
    %1366 = arith.addf %1362, %1365 : vector<8x128xf32>
    %c3_315 = arith.constant 3 : index
    %1367 = memref.load %arg5[%c3_315] : memref<6xf32, #tpu.memory_space<smem>>
    %1368 = vector.broadcast %1367 : f32 to vector<8x128xf32>
    %1369 = arith.addf %1366, %1368 : vector<8x128xf32>
    %cst_316 = arith.constant 0.707106769 : f32
    %1370 = vector.broadcast %cst_316 : f32 to vector<8x128xf32>
    %1371 = arith.mulf %1369, %1370 : vector<8x128xf32>
    %1372 = math.absf %1371 : vector<8x128xf32>
    %cst_317 = arith.constant 0.327591091 : f32
    %1373 = vector.broadcast %cst_317 : f32 to vector<8x128xf32>
    %1374 = arith.mulf %1373, %1372 : vector<8x128xf32>
    %cst_318 = arith.constant 1.000000e+00 : f32
    %1375 = vector.broadcast %cst_318 : f32 to vector<8x128xf32>
    %1376 = arith.addf %1375, %1374 : vector<8x128xf32>
    %1377 = tpu.reciprocal %1376 {approx = true} : vector<8x128xf32> -> vector<8x128xf32>
    %1378 = arith.mulf %1376, %1377 : vector<8x128xf32>
    %cst_319 = arith.constant 2.000000e+00 : f32
    %1379 = vector.broadcast %cst_319 : f32 to vector<8x128xf32>
    %1380 = arith.subf %1379, %1378 : vector<8x128xf32>
    %1381 = arith.mulf %1377, %1380 : vector<8x128xf32>
    %cst_320 = arith.constant 1.06140542 : f32
    %1382 = vector.broadcast %cst_320 : f32 to vector<8x128xf32>
    %1383 = arith.mulf %1382, %1381 : vector<8x128xf32>
    %cst_321 = arith.constant -1.45315206 : f32
    %1384 = vector.broadcast %cst_321 : f32 to vector<8x128xf32>
    %1385 = arith.addf %1383, %1384 : vector<8x128xf32>
    %1386 = arith.mulf %1385, %1381 : vector<8x128xf32>
    %cst_322 = arith.constant 1.42141378 : f32
    %1387 = vector.broadcast %cst_322 : f32 to vector<8x128xf32>
    %1388 = arith.addf %1386, %1387 : vector<8x128xf32>
    %1389 = arith.mulf %1388, %1381 : vector<8x128xf32>
    %cst_323 = arith.constant -0.284496725 : f32
    %1390 = vector.broadcast %cst_323 : f32 to vector<8x128xf32>
    %1391 = arith.addf %1389, %1390 : vector<8x128xf32>
    %1392 = arith.mulf %1391, %1381 : vector<8x128xf32>
    %cst_324 = arith.constant 0.254829586 : f32
    %1393 = vector.broadcast %cst_324 : f32 to vector<8x128xf32>
    %1394 = arith.addf %1392, %1393 : vector<8x128xf32>
    %1395 = arith.mulf %1394, %1381 : vector<8x128xf32>
    %cst_325 = arith.constant 0.000000e+00 : f32
    %1396 = vector.broadcast %cst_325 : f32 to vector<8x128xf32>
    %1397 = arith.subf %1396, %1372 : vector<8x128xf32>
    %1398 = arith.mulf %1397, %1372 : vector<8x128xf32>
    %1399 = math.exp %1398 : vector<8x128xf32>
    %1400 = arith.mulf %1395, %1399 : vector<8x128xf32>
    %cst_326 = arith.constant 0.000000e+00 : f32
    %1401 = vector.broadcast %cst_326 : f32 to vector<8x128xf32>
    %1402 = arith.cmpf oge, %1371, %1401 : vector<8x128xf32>
    %cst_327 = arith.constant 1.000000e+00 : f32
    %1403 = vector.broadcast %cst_327 : f32 to vector<8x128xf32>
    %1404 = arith.subf %1403, %1400 : vector<8x128xf32>
    %cst_328 = arith.constant 1.000000e+00 : f32
    %1405 = vector.broadcast %cst_328 : f32 to vector<8x128xf32>
    %1406 = arith.subf %1400, %1405 : vector<8x128xf32>
    %1407 = arith.select %1402, %1404, %1406 : vector<8x128xi1>, vector<8x128xf32>
    %cst_329 = arith.constant 5.000000e-01 : f32
    %1408 = vector.broadcast %cst_329 : f32 to vector<8x128xf32>
    %1409 = arith.mulf %1408, %1369 : vector<8x128xf32>
    %cst_330 = arith.constant 1.000000e+00 : f32
    %1410 = vector.broadcast %cst_330 : f32 to vector<8x128xf32>
    %1411 = arith.addf %1410, %1407 : vector<8x128xf32>
    %1412 = arith.mulf %1409, %1411 : vector<8x128xf32>
    %c48_331 = arith.constant 48 : index
    %1413 = memref.load %arg4[%c48_331] : memref<72xf32, #tpu.memory_space<smem>>
    %1414 = vector.broadcast %1413 : f32 to vector<8x128xf32>
    %1415 = arith.mulf %600, %1414 : vector<8x128xf32>
    %c49_332 = arith.constant 49 : index
    %1416 = memref.load %arg4[%c49_332] : memref<72xf32, #tpu.memory_space<smem>>
    %1417 = vector.broadcast %1416 : f32 to vector<8x128xf32>
    %1418 = arith.mulf %640, %1417 : vector<8x128xf32>
    %1419 = arith.addf %1415, %1418 : vector<8x128xf32>
    %c50_333 = arith.constant 50 : index
    %1420 = memref.load %arg4[%c50_333] : memref<72xf32, #tpu.memory_space<smem>>
    %1421 = vector.broadcast %1420 : f32 to vector<8x128xf32>
    %1422 = arith.mulf %680, %1421 : vector<8x128xf32>
    %1423 = arith.addf %1419, %1422 : vector<8x128xf32>
    %c51_334 = arith.constant 51 : index
    %1424 = memref.load %arg4[%c51_334] : memref<72xf32, #tpu.memory_space<smem>>
    %1425 = vector.broadcast %1424 : f32 to vector<8x128xf32>
    %1426 = arith.mulf %720, %1425 : vector<8x128xf32>
    %1427 = arith.addf %1423, %1426 : vector<8x128xf32>
    %c52_335 = arith.constant 52 : index
    %1428 = memref.load %arg4[%c52_335] : memref<72xf32, #tpu.memory_space<smem>>
    %1429 = vector.broadcast %1428 : f32 to vector<8x128xf32>
    %1430 = arith.mulf %760, %1429 : vector<8x128xf32>
    %1431 = arith.addf %1427, %1430 : vector<8x128xf32>
    %c53_336 = arith.constant 53 : index
    %1432 = memref.load %arg4[%c53_336] : memref<72xf32, #tpu.memory_space<smem>>
    %1433 = vector.broadcast %1432 : f32 to vector<8x128xf32>
    %1434 = arith.mulf %800, %1433 : vector<8x128xf32>
    %1435 = arith.addf %1431, %1434 : vector<8x128xf32>
    %c54_337 = arith.constant 54 : index
    %1436 = memref.load %arg4[%c54_337] : memref<72xf32, #tpu.memory_space<smem>>
    %1437 = vector.broadcast %1436 : f32 to vector<8x128xf32>
    %1438 = arith.mulf %840, %1437 : vector<8x128xf32>
    %1439 = arith.addf %1435, %1438 : vector<8x128xf32>
    %c55_338 = arith.constant 55 : index
    %1440 = memref.load %arg4[%c55_338] : memref<72xf32, #tpu.memory_space<smem>>
    %1441 = vector.broadcast %1440 : f32 to vector<8x128xf32>
    %1442 = arith.mulf %880, %1441 : vector<8x128xf32>
    %1443 = arith.addf %1439, %1442 : vector<8x128xf32>
    %c56_339 = arith.constant 56 : index
    %1444 = memref.load %arg4[%c56_339] : memref<72xf32, #tpu.memory_space<smem>>
    %1445 = vector.broadcast %1444 : f32 to vector<8x128xf32>
    %1446 = arith.mulf %920, %1445 : vector<8x128xf32>
    %1447 = arith.addf %1443, %1446 : vector<8x128xf32>
    %c57_340 = arith.constant 57 : index
    %1448 = memref.load %arg4[%c57_340] : memref<72xf32, #tpu.memory_space<smem>>
    %1449 = vector.broadcast %1448 : f32 to vector<8x128xf32>
    %1450 = arith.mulf %960, %1449 : vector<8x128xf32>
    %1451 = arith.addf %1447, %1450 : vector<8x128xf32>
    %c58_341 = arith.constant 58 : index
    %1452 = memref.load %arg4[%c58_341] : memref<72xf32, #tpu.memory_space<smem>>
    %1453 = vector.broadcast %1452 : f32 to vector<8x128xf32>
    %1454 = arith.mulf %1000, %1453 : vector<8x128xf32>
    %1455 = arith.addf %1451, %1454 : vector<8x128xf32>
    %c59_342 = arith.constant 59 : index
    %1456 = memref.load %arg4[%c59_342] : memref<72xf32, #tpu.memory_space<smem>>
    %1457 = vector.broadcast %1456 : f32 to vector<8x128xf32>
    %1458 = arith.mulf %1040, %1457 : vector<8x128xf32>
    %1459 = arith.addf %1455, %1458 : vector<8x128xf32>
    %c4_343 = arith.constant 4 : index
    %1460 = memref.load %arg5[%c4_343] : memref<6xf32, #tpu.memory_space<smem>>
    %1461 = vector.broadcast %1460 : f32 to vector<8x128xf32>
    %1462 = arith.addf %1459, %1461 : vector<8x128xf32>
    %cst_344 = arith.constant 0.707106769 : f32
    %1463 = vector.broadcast %cst_344 : f32 to vector<8x128xf32>
    %1464 = arith.mulf %1462, %1463 : vector<8x128xf32>
    %1465 = math.absf %1464 : vector<8x128xf32>
    %cst_345 = arith.constant 0.327591091 : f32
    %1466 = vector.broadcast %cst_345 : f32 to vector<8x128xf32>
    %1467 = arith.mulf %1466, %1465 : vector<8x128xf32>
    %cst_346 = arith.constant 1.000000e+00 : f32
    %1468 = vector.broadcast %cst_346 : f32 to vector<8x128xf32>
    %1469 = arith.addf %1468, %1467 : vector<8x128xf32>
    %1470 = tpu.reciprocal %1469 {approx = true} : vector<8x128xf32> -> vector<8x128xf32>
    %1471 = arith.mulf %1469, %1470 : vector<8x128xf32>
    %cst_347 = arith.constant 2.000000e+00 : f32
    %1472 = vector.broadcast %cst_347 : f32 to vector<8x128xf32>
    %1473 = arith.subf %1472, %1471 : vector<8x128xf32>
    %1474 = arith.mulf %1470, %1473 : vector<8x128xf32>
    %cst_348 = arith.constant 1.06140542 : f32
    %1475 = vector.broadcast %cst_348 : f32 to vector<8x128xf32>
    %1476 = arith.mulf %1475, %1474 : vector<8x128xf32>
    %cst_349 = arith.constant -1.45315206 : f32
    %1477 = vector.broadcast %cst_349 : f32 to vector<8x128xf32>
    %1478 = arith.addf %1476, %1477 : vector<8x128xf32>
    %1479 = arith.mulf %1478, %1474 : vector<8x128xf32>
    %cst_350 = arith.constant 1.42141378 : f32
    %1480 = vector.broadcast %cst_350 : f32 to vector<8x128xf32>
    %1481 = arith.addf %1479, %1480 : vector<8x128xf32>
    %1482 = arith.mulf %1481, %1474 : vector<8x128xf32>
    %cst_351 = arith.constant -0.284496725 : f32
    %1483 = vector.broadcast %cst_351 : f32 to vector<8x128xf32>
    %1484 = arith.addf %1482, %1483 : vector<8x128xf32>
    %1485 = arith.mulf %1484, %1474 : vector<8x128xf32>
    %cst_352 = arith.constant 0.254829586 : f32
    %1486 = vector.broadcast %cst_352 : f32 to vector<8x128xf32>
    %1487 = arith.addf %1485, %1486 : vector<8x128xf32>
    %1488 = arith.mulf %1487, %1474 : vector<8x128xf32>
    %cst_353 = arith.constant 0.000000e+00 : f32
    %1489 = vector.broadcast %cst_353 : f32 to vector<8x128xf32>
    %1490 = arith.subf %1489, %1465 : vector<8x128xf32>
    %1491 = arith.mulf %1490, %1465 : vector<8x128xf32>
    %1492 = math.exp %1491 : vector<8x128xf32>
    %1493 = arith.mulf %1488, %1492 : vector<8x128xf32>
    %cst_354 = arith.constant 0.000000e+00 : f32
    %1494 = vector.broadcast %cst_354 : f32 to vector<8x128xf32>
    %1495 = arith.cmpf oge, %1464, %1494 : vector<8x128xf32>
    %cst_355 = arith.constant 1.000000e+00 : f32
    %1496 = vector.broadcast %cst_355 : f32 to vector<8x128xf32>
    %1497 = arith.subf %1496, %1493 : vector<8x128xf32>
    %cst_356 = arith.constant 1.000000e+00 : f32
    %1498 = vector.broadcast %cst_356 : f32 to vector<8x128xf32>
    %1499 = arith.subf %1493, %1498 : vector<8x128xf32>
    %1500 = arith.select %1495, %1497, %1499 : vector<8x128xi1>, vector<8x128xf32>
    %cst_357 = arith.constant 5.000000e-01 : f32
    %1501 = vector.broadcast %cst_357 : f32 to vector<8x128xf32>
    %1502 = arith.mulf %1501, %1462 : vector<8x128xf32>
    %cst_358 = arith.constant 1.000000e+00 : f32
    %1503 = vector.broadcast %cst_358 : f32 to vector<8x128xf32>
    %1504 = arith.addf %1503, %1500 : vector<8x128xf32>
    %1505 = arith.mulf %1502, %1504 : vector<8x128xf32>
    %c60_359 = arith.constant 60 : index
    %1506 = memref.load %arg4[%c60_359] : memref<72xf32, #tpu.memory_space<smem>>
    %1507 = vector.broadcast %1506 : f32 to vector<8x128xf32>
    %1508 = arith.mulf %600, %1507 : vector<8x128xf32>
    %c61_360 = arith.constant 61 : index
    %1509 = memref.load %arg4[%c61_360] : memref<72xf32, #tpu.memory_space<smem>>
    %1510 = vector.broadcast %1509 : f32 to vector<8x128xf32>
    %1511 = arith.mulf %640, %1510 : vector<8x128xf32>
    %1512 = arith.addf %1508, %1511 : vector<8x128xf32>
    %c62_361 = arith.constant 62 : index
    %1513 = memref.load %arg4[%c62_361] : memref<72xf32, #tpu.memory_space<smem>>
    %1514 = vector.broadcast %1513 : f32 to vector<8x128xf32>
    %1515 = arith.mulf %680, %1514 : vector<8x128xf32>
    %1516 = arith.addf %1512, %1515 : vector<8x128xf32>
    %c63_362 = arith.constant 63 : index
    %1517 = memref.load %arg4[%c63_362] : memref<72xf32, #tpu.memory_space<smem>>
    %1518 = vector.broadcast %1517 : f32 to vector<8x128xf32>
    %1519 = arith.mulf %720, %1518 : vector<8x128xf32>
    %1520 = arith.addf %1516, %1519 : vector<8x128xf32>
    %c64_363 = arith.constant 64 : index
    %1521 = memref.load %arg4[%c64_363] : memref<72xf32, #tpu.memory_space<smem>>
    %1522 = vector.broadcast %1521 : f32 to vector<8x128xf32>
    %1523 = arith.mulf %760, %1522 : vector<8x128xf32>
    %1524 = arith.addf %1520, %1523 : vector<8x128xf32>
    %c65_364 = arith.constant 65 : index
    %1525 = memref.load %arg4[%c65_364] : memref<72xf32, #tpu.memory_space<smem>>
    %1526 = vector.broadcast %1525 : f32 to vector<8x128xf32>
    %1527 = arith.mulf %800, %1526 : vector<8x128xf32>
    %1528 = arith.addf %1524, %1527 : vector<8x128xf32>
    %c66_365 = arith.constant 66 : index
    %1529 = memref.load %arg4[%c66_365] : memref<72xf32, #tpu.memory_space<smem>>
    %1530 = vector.broadcast %1529 : f32 to vector<8x128xf32>
    %1531 = arith.mulf %840, %1530 : vector<8x128xf32>
    %1532 = arith.addf %1528, %1531 : vector<8x128xf32>
    %c67_366 = arith.constant 67 : index
    %1533 = memref.load %arg4[%c67_366] : memref<72xf32, #tpu.memory_space<smem>>
    %1534 = vector.broadcast %1533 : f32 to vector<8x128xf32>
    %1535 = arith.mulf %880, %1534 : vector<8x128xf32>
    %1536 = arith.addf %1532, %1535 : vector<8x128xf32>
    %c68_367 = arith.constant 68 : index
    %1537 = memref.load %arg4[%c68_367] : memref<72xf32, #tpu.memory_space<smem>>
    %1538 = vector.broadcast %1537 : f32 to vector<8x128xf32>
    %1539 = arith.mulf %920, %1538 : vector<8x128xf32>
    %1540 = arith.addf %1536, %1539 : vector<8x128xf32>
    %c69_368 = arith.constant 69 : index
    %1541 = memref.load %arg4[%c69_368] : memref<72xf32, #tpu.memory_space<smem>>
    %1542 = vector.broadcast %1541 : f32 to vector<8x128xf32>
    %1543 = arith.mulf %960, %1542 : vector<8x128xf32>
    %1544 = arith.addf %1540, %1543 : vector<8x128xf32>
    %c70_369 = arith.constant 70 : index
    %1545 = memref.load %arg4[%c70_369] : memref<72xf32, #tpu.memory_space<smem>>
    %1546 = vector.broadcast %1545 : f32 to vector<8x128xf32>
    %1547 = arith.mulf %1000, %1546 : vector<8x128xf32>
    %1548 = arith.addf %1544, %1547 : vector<8x128xf32>
    %c71_370 = arith.constant 71 : index
    %1549 = memref.load %arg4[%c71_370] : memref<72xf32, #tpu.memory_space<smem>>
    %1550 = vector.broadcast %1549 : f32 to vector<8x128xf32>
    %1551 = arith.mulf %1040, %1550 : vector<8x128xf32>
    %1552 = arith.addf %1548, %1551 : vector<8x128xf32>
    %c5_371 = arith.constant 5 : index
    %1553 = memref.load %arg5[%c5_371] : memref<6xf32, #tpu.memory_space<smem>>
    %1554 = vector.broadcast %1553 : f32 to vector<8x128xf32>
    %1555 = arith.addf %1552, %1554 : vector<8x128xf32>
    %cst_372 = arith.constant 0.707106769 : f32
    %1556 = vector.broadcast %cst_372 : f32 to vector<8x128xf32>
    %1557 = arith.mulf %1555, %1556 : vector<8x128xf32>
    %1558 = math.absf %1557 : vector<8x128xf32>
    %cst_373 = arith.constant 0.327591091 : f32
    %1559 = vector.broadcast %cst_373 : f32 to vector<8x128xf32>
    %1560 = arith.mulf %1559, %1558 : vector<8x128xf32>
    %cst_374 = arith.constant 1.000000e+00 : f32
    %1561 = vector.broadcast %cst_374 : f32 to vector<8x128xf32>
    %1562 = arith.addf %1561, %1560 : vector<8x128xf32>
    %1563 = tpu.reciprocal %1562 {approx = true} : vector<8x128xf32> -> vector<8x128xf32>
    %1564 = arith.mulf %1562, %1563 : vector<8x128xf32>
    %cst_375 = arith.constant 2.000000e+00 : f32
    %1565 = vector.broadcast %cst_375 : f32 to vector<8x128xf32>
    %1566 = arith.subf %1565, %1564 : vector<8x128xf32>
    %1567 = arith.mulf %1563, %1566 : vector<8x128xf32>
    %cst_376 = arith.constant 1.06140542 : f32
    %1568 = vector.broadcast %cst_376 : f32 to vector<8x128xf32>
    %1569 = arith.mulf %1568, %1567 : vector<8x128xf32>
    %cst_377 = arith.constant -1.45315206 : f32
    %1570 = vector.broadcast %cst_377 : f32 to vector<8x128xf32>
    %1571 = arith.addf %1569, %1570 : vector<8x128xf32>
    %1572 = arith.mulf %1571, %1567 : vector<8x128xf32>
    %cst_378 = arith.constant 1.42141378 : f32
    %1573 = vector.broadcast %cst_378 : f32 to vector<8x128xf32>
    %1574 = arith.addf %1572, %1573 : vector<8x128xf32>
    %1575 = arith.mulf %1574, %1567 : vector<8x128xf32>
    %cst_379 = arith.constant -0.284496725 : f32
    %1576 = vector.broadcast %cst_379 : f32 to vector<8x128xf32>
    %1577 = arith.addf %1575, %1576 : vector<8x128xf32>
    %1578 = arith.mulf %1577, %1567 : vector<8x128xf32>
    %cst_380 = arith.constant 0.254829586 : f32
    %1579 = vector.broadcast %cst_380 : f32 to vector<8x128xf32>
    %1580 = arith.addf %1578, %1579 : vector<8x128xf32>
    %1581 = arith.mulf %1580, %1567 : vector<8x128xf32>
    %cst_381 = arith.constant 0.000000e+00 : f32
    %1582 = vector.broadcast %cst_381 : f32 to vector<8x128xf32>
    %1583 = arith.subf %1582, %1558 : vector<8x128xf32>
    %1584 = arith.mulf %1583, %1558 : vector<8x128xf32>
    %1585 = math.exp %1584 : vector<8x128xf32>
    %1586 = arith.mulf %1581, %1585 : vector<8x128xf32>
    %cst_382 = arith.constant 0.000000e+00 : f32
    %1587 = vector.broadcast %cst_382 : f32 to vector<8x128xf32>
    %1588 = arith.cmpf oge, %1557, %1587 : vector<8x128xf32>
    %cst_383 = arith.constant 1.000000e+00 : f32
    %1589 = vector.broadcast %cst_383 : f32 to vector<8x128xf32>
    %1590 = arith.subf %1589, %1586 : vector<8x128xf32>
    %cst_384 = arith.constant 1.000000e+00 : f32
    %1591 = vector.broadcast %cst_384 : f32 to vector<8x128xf32>
    %1592 = arith.subf %1586, %1591 : vector<8x128xf32>
    %1593 = arith.select %1588, %1590, %1592 : vector<8x128xi1>, vector<8x128xf32>
    %cst_385 = arith.constant 5.000000e-01 : f32
    %1594 = vector.broadcast %cst_385 : f32 to vector<8x128xf32>
    %1595 = arith.mulf %1594, %1555 : vector<8x128xf32>
    %cst_386 = arith.constant 1.000000e+00 : f32
    %1596 = vector.broadcast %cst_386 : f32 to vector<8x128xf32>
    %1597 = arith.addf %1596, %1593 : vector<8x128xf32>
    %1598 = arith.mulf %1595, %1597 : vector<8x128xf32>
    %c0_387 = arith.constant 0 : index
    %1599 = memref.load %arg6[%c0_387] : memref<18xf32, #tpu.memory_space<smem>>
    %1600 = vector.broadcast %1599 : f32 to vector<8x128xf32>
    %1601 = arith.mulf %1133, %1600 : vector<8x128xf32>
    %c1_388 = arith.constant 1 : index
    %1602 = memref.load %arg6[%c1_388] : memref<18xf32, #tpu.memory_space<smem>>
    %1603 = vector.broadcast %1602 : f32 to vector<8x128xf32>
    %1604 = arith.mulf %1226, %1603 : vector<8x128xf32>
    %1605 = arith.addf %1601, %1604 : vector<8x128xf32>
    %c2_389 = arith.constant 2 : index
    %1606 = memref.load %arg6[%c2_389] : memref<18xf32, #tpu.memory_space<smem>>
    %1607 = vector.broadcast %1606 : f32 to vector<8x128xf32>
    %1608 = arith.mulf %1319, %1607 : vector<8x128xf32>
    %1609 = arith.addf %1605, %1608 : vector<8x128xf32>
    %c3_390 = arith.constant 3 : index
    %1610 = memref.load %arg6[%c3_390] : memref<18xf32, #tpu.memory_space<smem>>
    %1611 = vector.broadcast %1610 : f32 to vector<8x128xf32>
    %1612 = arith.mulf %1412, %1611 : vector<8x128xf32>
    %1613 = arith.addf %1609, %1612 : vector<8x128xf32>
    %c4_391 = arith.constant 4 : index
    %1614 = memref.load %arg6[%c4_391] : memref<18xf32, #tpu.memory_space<smem>>
    %1615 = vector.broadcast %1614 : f32 to vector<8x128xf32>
    %1616 = arith.mulf %1505, %1615 : vector<8x128xf32>
    %1617 = arith.addf %1613, %1616 : vector<8x128xf32>
    %c5_392 = arith.constant 5 : index
    %1618 = memref.load %arg6[%c5_392] : memref<18xf32, #tpu.memory_space<smem>>
    %1619 = vector.broadcast %1618 : f32 to vector<8x128xf32>
    %1620 = arith.mulf %1598, %1619 : vector<8x128xf32>
    %1621 = arith.addf %1617, %1620 : vector<8x128xf32>
    %c0_393 = arith.constant 0 : index
    %1622 = memref.load %arg7[%c0_393] : memref<3xf32, #tpu.memory_space<smem>>
    %1623 = vector.broadcast %1622 : f32 to vector<8x128xf32>
    %1624 = arith.addf %1621, %1623 : vector<8x128xf32>
    %cst_394 = arith.constant 0.000000e+00 : f32
    %cst_395 = arith.constant 6.000000e+00 : f32
    %1625 = vector.broadcast %cst_394 : f32 to vector<8x128xf32>
    %1626 = arith.maximumf %1625, %1624 : vector<8x128xf32>
    %1627 = vector.broadcast %cst_395 : f32 to vector<8x128xf32>
    %1628 = arith.minimumf %1627, %1626 : vector<8x128xf32>
    %c0_396 = arith.constant 0 : index
    %c0_397 = arith.constant 0 : index
    %c0_398 = arith.constant 0 : index
    %1629 = vector.load %arg8[%c0_396, %c0_397, %c0_398] : memref<3x8x128xf32, #tpu.memory_space<vmem>>, vector<1x8x128xf32>
    %1630 = vector.shape_cast %1629 : vector<1x8x128xf32> to vector<8x128xf32>
    %1631 = vector.shape_cast %1628 : vector<8x128xf32> to vector<1x8x128xf32>
    tpu.vector_store %arg8[%c0_396, %c0_397, %c0_398], %1631 {strides = array<i32>} : memref<3x8x128xf32, #tpu.memory_space<vmem>>, vector<1x8x128xf32>,
    %c6_399 = arith.constant 6 : index
    %1632 = memref.load %arg6[%c6_399] : memref<18xf32, #tpu.memory_space<smem>>
    %1633 = vector.broadcast %1632 : f32 to vector<8x128xf32>
    %1634 = arith.mulf %1133, %1633 : vector<8x128xf32>
    %c7_400 = arith.constant 7 : index
    %1635 = memref.load %arg6[%c7_400] : memref<18xf32, #tpu.memory_space<smem>>
    %1636 = vector.broadcast %1635 : f32 to vector<8x128xf32>
    %1637 = arith.mulf %1226, %1636 : vector<8x128xf32>
    %1638 = arith.addf %1634, %1637 : vector<8x128xf32>
    %c8_401 = arith.constant 8 : index
    %1639 = memref.load %arg6[%c8_401] : memref<18xf32, #tpu.memory_space<smem>>
    %1640 = vector.broadcast %1639 : f32 to vector<8x128xf32>
    %1641 = arith.mulf %1319, %1640 : vector<8x128xf32>
    %1642 = arith.addf %1638, %1641 : vector<8x128xf32>
    %c9_402 = arith.constant 9 : index
    %1643 = memref.load %arg6[%c9_402] : memref<18xf32, #tpu.memory_space<smem>>
    %1644 = vector.broadcast %1643 : f32 to vector<8x128xf32>
    %1645 = arith.mulf %1412, %1644 : vector<8x128xf32>
    %1646 = arith.addf %1642, %1645 : vector<8x128xf32>
    %c10_403 = arith.constant 10 : index
    %1647 = memref.load %arg6[%c10_403] : memref<18xf32, #tpu.memory_space<smem>>
    %1648 = vector.broadcast %1647 : f32 to vector<8x128xf32>
    %1649 = arith.mulf %1505, %1648 : vector<8x128xf32>
    %1650 = arith.addf %1646, %1649 : vector<8x128xf32>
    %c11_404 = arith.constant 11 : index
    %1651 = memref.load %arg6[%c11_404] : memref<18xf32, #tpu.memory_space<smem>>
    %1652 = vector.broadcast %1651 : f32 to vector<8x128xf32>
    %1653 = arith.mulf %1598, %1652 : vector<8x128xf32>
    %1654 = arith.addf %1650, %1653 : vector<8x128xf32>
    %c1_405 = arith.constant 1 : index
    %1655 = memref.load %arg7[%c1_405] : memref<3xf32, #tpu.memory_space<smem>>
    %1656 = vector.broadcast %1655 : f32 to vector<8x128xf32>
    %1657 = arith.addf %1654, %1656 : vector<8x128xf32>
    %cst_406 = arith.constant 0.000000e+00 : f32
    %cst_407 = arith.constant 6.000000e+00 : f32
    %1658 = vector.broadcast %cst_406 : f32 to vector<8x128xf32>
    %1659 = arith.maximumf %1658, %1657 : vector<8x128xf32>
    %1660 = vector.broadcast %cst_407 : f32 to vector<8x128xf32>
    %1661 = arith.minimumf %1660, %1659 : vector<8x128xf32>
    %c1_408 = arith.constant 1 : index
    %c0_409 = arith.constant 0 : index
    %c0_410 = arith.constant 0 : index
    %1662 = vector.load %arg8[%c1_408, %c0_409, %c0_410] : memref<3x8x128xf32, #tpu.memory_space<vmem>>, vector<1x8x128xf32>
    %1663 = vector.shape_cast %1662 : vector<1x8x128xf32> to vector<8x128xf32>
    %1664 = vector.shape_cast %1661 : vector<8x128xf32> to vector<1x8x128xf32>
    tpu.vector_store %arg8[%c1_408, %c0_409, %c0_410], %1664 {strides = array<i32>} : memref<3x8x128xf32, #tpu.memory_space<vmem>>, vector<1x8x128xf32>,
    %c12_411 = arith.constant 12 : index
    %1665 = memref.load %arg6[%c12_411] : memref<18xf32, #tpu.memory_space<smem>>
    %1666 = vector.broadcast %1665 : f32 to vector<8x128xf32>
    %1667 = arith.mulf %1133, %1666 : vector<8x128xf32>
    %c13_412 = arith.constant 13 : index
    %1668 = memref.load %arg6[%c13_412] : memref<18xf32, #tpu.memory_space<smem>>
    %1669 = vector.broadcast %1668 : f32 to vector<8x128xf32>
    %1670 = arith.mulf %1226, %1669 : vector<8x128xf32>
    %1671 = arith.addf %1667, %1670 : vector<8x128xf32>
    %c14_413 = arith.constant 14 : index
    %1672 = memref.load %arg6[%c14_413] : memref<18xf32, #tpu.memory_space<smem>>
    %1673 = vector.broadcast %1672 : f32 to vector<8x128xf32>
    %1674 = arith.mulf %1319, %1673 : vector<8x128xf32>
    %1675 = arith.addf %1671, %1674 : vector<8x128xf32>
    %c15_414 = arith.constant 15 : index
    %1676 = memref.load %arg6[%c15_414] : memref<18xf32, #tpu.memory_space<smem>>
    %1677 = vector.broadcast %1676 : f32 to vector<8x128xf32>
    %1678 = arith.mulf %1412, %1677 : vector<8x128xf32>
    %1679 = arith.addf %1675, %1678 : vector<8x128xf32>
    %c16_415 = arith.constant 16 : index
    %1680 = memref.load %arg6[%c16_415] : memref<18xf32, #tpu.memory_space<smem>>
    %1681 = vector.broadcast %1680 : f32 to vector<8x128xf32>
    %1682 = arith.mulf %1505, %1681 : vector<8x128xf32>
    %1683 = arith.addf %1679, %1682 : vector<8x128xf32>
    %c17_416 = arith.constant 17 : index
    %1684 = memref.load %arg6[%c17_416] : memref<18xf32, #tpu.memory_space<smem>>
    %1685 = vector.broadcast %1684 : f32 to vector<8x128xf32>
    %1686 = arith.mulf %1598, %1685 : vector<8x128xf32>
    %1687 = arith.addf %1683, %1686 : vector<8x128xf32>
    %c2_417 = arith.constant 2 : index
    %1688 = memref.load %arg7[%c2_417] : memref<3xf32, #tpu.memory_space<smem>>
    %1689 = vector.broadcast %1688 : f32 to vector<8x128xf32>
    %1690 = arith.addf %1687, %1689 : vector<8x128xf32>
    %cst_418 = arith.constant 0.000000e+00 : f32
    %cst_419 = arith.constant 6.000000e+00 : f32
    %1691 = vector.broadcast %cst_418 : f32 to vector<8x128xf32>
    %1692 = arith.maximumf %1691, %1690 : vector<8x128xf32>
    %1693 = vector.broadcast %cst_419 : f32 to vector<8x128xf32>
    %1694 = arith.minimumf %1693, %1692 : vector<8x128xf32>
    %c2_420 = arith.constant 2 : index
    %c0_421 = arith.constant 0 : index
    %c0_422 = arith.constant 0 : index
    %1695 = vector.load %arg8[%c2_420, %c0_421, %c0_422] : memref<3x8x128xf32, #tpu.memory_space<vmem>>, vector<1x8x128xf32>
    %1696 = vector.shape_cast %1695 : vector<1x8x128xf32> to vector<8x128xf32>
    %1697 = vector.shape_cast %1694 : vector<8x128xf32> to vector<1x8x128xf32>
    tpu.vector_store %arg8[%c2_420, %c0_421, %c0_422], %1697 {strides = array<i32>} : memref<3x8x128xf32, #tpu.memory_space<vmem>>, vector<1x8x128xf32>,
    return
  }
  func.func @transform_0(%arg0: i32) -> (i32, i32, i32) {
    %c0_i32 = arith.constant 0 : i32
    %c0_i32_0 = arith.constant 0 : i32
    %c0_i32_1 = arith.constant 0 : i32
    return %c0_i32, %arg0, %c0_i32_0 : i32, i32, i32
  }
  func.func @transform_1(%arg0: i32) -> i32 {
    %c0_i32 = arith.constant 0 : i32
    %c0_i32_0 = arith.constant 0 : i32
    return %c0_i32 : i32
  }
  func.func @transform_2(%arg0: i32) -> i32 {
    %c0_i32 = arith.constant 0 : i32
    %c0_i32_0 = arith.constant 0 : i32
    return %c0_i32 : i32
  }
  func.func @transform_3(%arg0: i32) -> i32 {
    %c0_i32 = arith.constant 0 : i32
    %c0_i32_0 = arith.constant 0 : i32
    return %c0_i32 : i32
  }
  func.func @transform_4(%arg0: i32) -> i32 {
    %c0_i32 = arith.constant 0 : i32
    %c0_i32_0 = arith.constant 0 : i32
    return %c0_i32 : i32
  }
  func.func @transform_5(%arg0: i32) -> i32 {
    %c0_i32 = arith.constant 0 : i32
    %c0_i32_0 = arith.constant 0 : i32
    return %c0_i32 : i32
  }
  func.func @transform_6(%arg0: i32) -> i32 {
    %c0_i32 = arith.constant 0 : i32
    %c0_i32_0 = arith.constant 0 : i32
    return %c0_i32 : i32
  }
  func.func @transform_7(%arg0: i32) -> (i32, i32, i32) {
    %c0_i32 = arith.constant 0 : i32
    %c0_i32_0 = arith.constant 0 : i32
    %c0_i32_1 = arith.constant 0 : i32
    return %c0_i32, %arg0, %c0_i32_0 : i32, i32, i32
  }
}

</mosaic_0001>

<bundles_post_ra>
// kernel: model_forward.1
= control target key start
LH: loop header
LB: loop body
LE: loop exit
PB: predicated region body
PF: predicated region fallthrough
CT: control target
= control target key end

     0   :  { %s4263_s0 = inlined_call_operand.vmem [shape: f32[9,16,128], index: 0, kind: input, shape index: {}]   ;;  %s4264_s1 = inlined_call_operand.vmem [shape: f32[108], index: 1, kind: input, shape index: {}]   ;;  %s4265_s2 = inlined_call_operand.vmem [shape: f32[12], index: 2, kind: input, shape index: {}]   ;;  %s4266_s3 = inlined_call_operand.vmem [shape: f32[72], index: 3, kind: input, shape index: {}]   ;;  %s4267_s4 = inlined_call_operand.vmem [shape: f32[6], index: 4, kind: input, shape index: {}]   ;;  %s4268_s5 = inlined_call_operand.vmem [shape: f32[18], index: 5, kind: input, shape index: {}]   ;;  %s4269_s6 = inlined_call_operand.vmem [shape: f32[3], index: 6, kind: input, shape index: {}]   ;;  %s4270_s7 = inlined_call_operand.vmem [shape: f32[3,16,128], index: 7, kind: output, shape index: {}]  }
   0x1   :  { %4313 = sst [smem:[#allocation57_spill]] %s4263_s0 }
   0x2   :  { %4314 = sst [smem:[#allocation58_spill]] %s4264_s1 }
   0x3   :  { %4315 = sst [smem:[#allocation59_spill]] %s4265_s2 }
   0x4   :  { %4316 = sst [smem:[#allocation60_spill]] %s4266_s3 }
   0x5   :  { %4317 = sst [smem:[#allocation61_spill]] %s4267_s4 }
   0x6   :  { %4318 = sst [smem:[#allocation62_spill]] %s4268_s5 }
   0x7   :  { %4319 = sst [smem:[#allocation63_spill]] %s4269_s6 }
   0x8   :  { %4320 = sst [smem:[#allocation64_spill]] %s4270_s7 }
   0x9   :  { %12 = vsyncpa [#allocation4], 0 }
   0xa   :  { %13 = vsyncpa [#allocation6], 0 }
   0xb   :  { %14 = vsyncpa [#allocation9], 0 }
   0xc   :  { %15 = vsyncpa [#allocation12], 0  ;;  %s2699_s24 = smov 0   ;;  %s2701_s25 = smov 0  }
   0xd   :  { %s2703_s26 = smov 0  }
   0xe LB: > { %4321 = sst [smem:[#allocation18_spill]] %s2643_s24  ;;  %s2715_s27 = sadd.s32 4294967295, %s2651_s26   ;;  %s2651_s26 = sphi %s2703_s26, %s4472_s26   ;;  %s2647_s25 = sphi %s2701_s25, %s4474_s25   ;;  %s2643_s24 = sphi %s2699_s24, %s4473_s24  }
   0xf   : > { %4322 = sst [smem:[#allocation19_spill]] %s2647_s25  ;;  %s2718_s28 = sadd.s32 1, %s2651_s26  }
  0x10   : > { %4323 = sst [smem:[#allocation20_spill]] %s2715_s27  ;;  %s25_s29 = ssub.s32 %s2651_s26, %s2718_s28 }
  0x11   : > { %4324 = sst [smem:[#allocation21_spill]] %s2718_s28  ;;  %s28_s30 = sadd.s32 1, %s2647_s25 }
  0x12   : > { %p26_p0 = scmp.eq.s32.totalorder %s25_s29, 0  ;;  %p35_p1 = scmp.ne.s32.totalorder %s2647_s25, %s2643_s24 }
  0x13   : > { %p36_p2 = scmp.eq.s32.totalorder %s2651_s26, 0  ;;  %p191_p3 = scmp.eq.s32.totalorder %s2715_s27, 1 }
  0x14   : > { %s2728_s8 = scalar_select %p26_p0, %s2647_s25, %s28_s30  }
  0x15   : > { %p2730_p4 = por %p36_p2, %p35_p1  ;;  %p2734_p5 = por %p191_p3, %p35_p1 }
  0x16   : > { %4325 = sst [smem:[#allocation22_spill]] %s2728_s8  ;;  %p2041_p6 = scmp.ge.s32.totalorder %s2651_s26, 1 }
  0x17   : > { %s4326_s9 = scalar_select %p2730_p4, 1, 0 }
  0x18   : > { %s4327_s10 = scalar_select %p2734_p5, 1, 0 }
  0x19   : > { %p204_p7 = scmp.lt.s32.totalorder %s2651_s26, 3  ;;  %p4271_p8 = scmp.eq.s32.totalorder %s2715_s27, 0 }
  0x1a   : > { %4328 = sst [smem:[#allocation23_spill]] %s4327_s10  ;;  %s4330_s2 = sld [smem:[#allocation59_spill]] }
  0x1b   : > { %p2741_p9 = pnand %p2041_p6, %p204_p7  ;;  %s4331_s4 = sld [smem:[#allocation61_spill]] }
  0x1c   : > { %s4333_s1 = sld [smem:[#allocation58_spill]]  ;;  %s4334_s3 = sld [smem:[#allocation60_spill]] }
  0x1d   : > { %s4329_s11 = scalar_select %p2741_p9, 1, 0 }
  0x1e   : > { %p2340_p10 = pneg %p2741_p9 }
  0x20   : > { %s228_s14 = sshll.u32 %s4330_s2, 4  ;;  %p2755_p11 = pnand %p4271_p8, %p2340_p10  ;;  %s229_s14 = int_to_ptr.vmem [resolvable:$true] %s228_s14 }
  0x21   : > { %s250_s17 = sshll.u32 %s4331_s4, 4  ;;  %s2523_s30 = scalar_lea.vmem %s229_s14, 16  ;;  %s251_s17 = int_to_ptr.vmem [resolvable:$true] %s250_s17 }
  0x22   : > { %s217_s21 = sshll.u32 %s4333_s1, 4  ;;  %s239_s29 = sshll.u32 %s4334_s3, 4  ;;  %s2762_s21 = int_to_ptr.vmem [resolvable:$true] %s217_s21  ;;  %s240_s29 = int_to_ptr.vmem [resolvable:$true] %s239_s29 }
  0x23   : > { %p2524_p12 = scmp.ne.s32.totalorder %s229_s14, %s2523_s30  ;;  %p2769_p13 = pneg %p2755_p11 }
  0x24   : > { %p2531_p2 = scmp.lt.s32.totalorder %s229_s14, %s229_s14  ;;  %p2532_p3 = scmp.lt.s32.totalorder %s2523_s30, %s2523_s30 }
  0x25   : > { %p2526_p0 = pnand %p2769_p13, %p2524_p12 }
  0x26   : > { %p2533_p6 = por %p2532_p3, %p2531_p2 }
  0x27   : > { %p2527_p1 = pneg %p2526_p0 }
  0x29   : > { %p2534_p7 = pnand %p2533_p6, %p2527_p1 }
  0x2b   : > { %2537 = shalt.err (!%p2534_p7)
}
  0x2c   : > { %s2653_s13 = smov [#allocation5]   ;;  %s2538_s15 = scalar_lea.vmem %s251_s17, 16 }
  0x2d   : > { %2346 = dma.vmem_to_smem (!%p2755_p11), %s229_s14, 16, %s2653_s13, [#allocation6]  }
  0x2e   : > { %p2539_p10 = scmp.ne.s32.totalorder %s251_s17, %s2538_s15  ;;  %p2546_p9 = scmp.lt.s32.totalorder %s251_s17, %s251_s17 }
  0x2f   : > { %p2547_p4 = scmp.lt.s32.totalorder %s2538_s15, %s2538_s15 }
  0x30   : > { %p2541_p8 = pnand %p2539_p10, %p2769_p13 }
  0x31   : > { %p2548_p12 = por %p2547_p4, %p2546_p9 }
  0x32   : > { %p2542_p5 = pneg %p2541_p8 }
  0x34   : > { %p2549_p0 = pnand %p2548_p12, %p2542_p5 }
  0x36   : > { %2552 = shalt.err (!%p2549_p0)
}
  0x37   : > { %s2654_s16 = smov [#allocation8]   ;;  %s2553_s19 = scalar_lea.vmem %s2762_s21, 16 }
  0x38   : > { %2352 = dma.vmem_to_smem (!%p2755_p11), %s251_s17, 16, %s2654_s16, [#allocation9]  }
  0x39   : > { %p2554_p1 = scmp.ne.s32.totalorder %s2762_s21, %s2553_s19  ;;  %p2561_p8 = scmp.lt.s32.totalorder %s2762_s21, %s2762_s21 }
  0x3a   : > { %p2562_p6 = scmp.lt.s32.totalorder %s2553_s19, %s2553_s19 }
  0x3b   : > { %p2556_p2 = pnand %p2554_p1, %p2769_p13 }
  0x3c   : > { %p2563_p7 = por %p2562_p6, %p2561_p8 }
  0x3d   : > { %p2557_p3 = pneg %p2556_p2 }
  0x3f   : > { %p2564_p4 = pnand %p2563_p7, %p2557_p3 }
  0x41   : > { %2567 = shalt.err (!%p2564_p4)
}
  0x42   : > { %s2655_s14 = smov [#allocation3]   ;;  %s2568_s17 = scalar_lea.vmem %s240_s29, 16 }
  0x43   : > { %2343 = dma.vmem_to_smem (!%p2755_p11), %s2762_s21, 16, %s2655_s14, [#allocation4]  }
  0x44   : > { %p2569_p5 = scmp.ne.s32.totalorder %s240_s29, %s2568_s17  ;;  %p2576_p12 = scmp.lt.s32.totalorder %s240_s29, %s240_s29 }
  0x45   : > { %p2577_p0 = scmp.lt.s32.totalorder %s2568_s17, %s2568_s17 }
  0x46   : > { %p2571_p9 = pnand %p2569_p5, %p2769_p13 }
  0x47   : > { %p2578_p1 = por %p2577_p0, %p2576_p12 }
  0x48   : > { %p2572_p10 = pneg %p2571_p9 }
  0x4a   : > { %p2579_p2 = pnand %p2578_p1, %p2572_p10 }
  0x4c   : > { %2582 = shalt.err (!%p2579_p2)
}
  0x4d   : > { %s2656_s23 = smov [#allocation7]   ;;  %s4336_s5 = sld [smem:[#allocation62_spill]] }
  0x4e   : > { %2349 = dma.vmem_to_smem (!%p2755_p11), %s240_s29, 16, %s2656_s23, [#allocation6]  }
  0x4f   : > { %s4337_s6 = sld [smem:[#allocation63_spill]] }
  0x53   : > { %s261_s13 = sshll.u32 %s4336_s5, 4  ;;  %s262_s13 = int_to_ptr.vmem [resolvable:$true] %s261_s13 }
  0x54   : > { %s2583_s14 = scalar_lea.vmem %s262_s13, 16  ;;  %p2591_p7 = scmp.lt.s32.totalorder %s262_s13, %s262_s13 }
  0x55   : > { %s272_s19 = sshll.u32 %s4337_s6, 4  ;;  %p2584_p3 = scmp.ne.s32.totalorder %s262_s13, %s2583_s14  ;;  %s273_s19 = int_to_ptr.vmem [resolvable:$true] %s272_s19 }
  0x56   : > { %p2592_p4 = scmp.lt.s32.totalorder %s2583_s14, %s2583_s14 }
  0x57   : > { %p2586_p8 = pnand %p2584_p3, %p2769_p13 }
  0x58   : > { %p2593_p5 = por %p2592_p4, %p2591_p7 }
  0x59   : > { %p2587_p6 = pneg %p2586_p8 }
  0x5b   : > { %p2594_p9 = pnand %p2593_p5, %p2587_p6 }
  0x5d   : > { %2597 = shalt.err (!%p2594_p9)
}
  0x5e   : > { %s2657_s29 = smov [#allocation10]   ;;  %s2598_s20 = scalar_lea.vmem %s273_s19, 16 }
  0x5f   : > { %2355 = dma.vmem_to_smem (!%p2755_p11), %s262_s13, 16, %s2657_s29, [#allocation9]  }
  0x60   : > { %p2599_p10 = scmp.ne.s32.totalorder %s273_s19, %s2598_s20  ;;  %p2606_p1 = scmp.lt.s32.totalorder %s273_s19, %s273_s19 }
  0x61   : > { %p2607_p2 = scmp.lt.s32.totalorder %s2598_s20, %s2598_s20 }
  0x62   : > { %p2601_p12 = pnand %p2599_p10, %p2769_p13 }
  0x63   : > { %p2608_p3 = por %p2607_p2, %p2606_p1 }
  0x64   : > { %p2602_p0 = pneg %p2601_p12 }
  0x66   : > { %p2609_p8 = pnand %p2608_p3, %p2602_p0 }
  0x68   : > { %2612 = shalt.err (!%p2609_p8)
}
  0x69   : > { %s2658_s22 = smov [#allocation11]   ;;  %p2048_p6 = scmp.ge.s32.totalorder %s2651_s26, 2 }
  0x6a   : > { %2358 = dma.vmem_to_smem (!%p2755_p11), %s273_s19, 16, %s2658_s22, [#allocation12]  }
  0x6b   : > { %279 = sbr.rel (%p2048_p6) target bundleno = 129 (0x81), region = 40  ;;  %p4338_p7 = scmp.ne.s32.totalorder (!%p2048_p6), %s4326_s9, 0 }
  0x72   : > { %282 = sbr.rel (!%p4338_p7) target bundleno = 129 (0x81), region = 44  ;;  %s284_s12 = sand.u32 (%p4338_p7), 1, %s2647_s25  }
  0x73   : > { %s2049_s17 = sshll.u32 (%p4338_p7), %s2651_s26, 3  ;;  %s2313_s23 = smul.u32 (%p4338_p7), 72, %s284_s12 }
  0x74   : > { %s4339_s0 = sld [smem:[#allocation57_spill]] (%p4338_p7) }
  0x75   : > { %s286_s18 = scalar_lea.vmem (%p4338_p7), [#allocation2], %s2313_s23 }
  0x7a   : > { %s288_s13 = scalar_lea.vmem %s4339_s0, %s2049_s17 }
  0x7b   : > { %v332_v0 = vld [vmem:[%s288_s13] sm:$0xff]  ;;  %v334_v1 = vld [vmem:[%s288_s13 + $0x10] sm:$0xff] }
  0x7c   : > { %v336_v2 = vld [vmem:[%s288_s13 + $0x20] sm:$0xff]  ;;  %v338_v3 = vld [vmem:[%s288_s13 + $0x30] sm:$0xff]  ;;  %333 = vst [vmem:[%s286_s18] sm:$0xff] %v332_v0  ;;  %335 = vst [vmem:[%s286_s18 + $0x8] sm:$0xff] %v334_v1 }
  0x7d   : > { %v340_v4 = vld [vmem:[%s288_s13 + $0x40] sm:$0xff]  ;;  %v342_v5 = vld [vmem:[%s288_s13 + $0x50] sm:$0xff]  ;;  %337 = vst [vmem:[%s286_s18 + $0x10] sm:$0xff] %v336_v2  ;;  %339 = vst [vmem:[%s286_s18 + $0x18] sm:$0xff] %v338_v3 }
  0x7e   : > { %341 = vst [vmem:[%s286_s18 + $0x20] sm:$0xff] %v340_v4  ;;  %343 = vst [vmem:[%s286_s18 + $0x28] sm:$0xff] %v342_v5  ;;  %v344_v6 = vld [vmem:[%s288_s13 + $0x60] sm:$0xff]  ;;  %v346_v7 = vld [vmem:[%s288_s13 + $0x70] sm:$0xff] }
  0x7f   : > { %v348_v8 = vld [vmem:[%s288_s13 + $0x80] sm:$0xff]  ;;  %345 = vst [vmem:[%s286_s18 + $0x30] sm:$0xff] %v344_v6  ;;  %347 = vst [vmem:[%s286_s18 + $0x38] sm:$0xff] %v346_v7 }
  0x80   : > { %349 = vst [vmem:[%s286_s18 + $0x40] sm:$0xff] %v348_v8 }
  0x81 PF: > { %p4340_p11 = scmp.ne.s32.totalorder %s4329_s11, 0 }
  0x83   : > { %358 = sbr.rel (%p4340_p11) target bundleno = 554 (0x22a), region = 82 }
  0x8a   : > { %s4273_s26 = sand.u32 1, %s2643_s24   ;;  %p4341_p13 = scmp.eq.s32.totalorder %s2715_s27, 0 }
  0x8b   : > { %s2314_s9 = smul.u32 72, %s4273_s26 }
  0x8d   : > { %s2825_s15 = scalar_lea.vmem [#allocation2], %s2314_s9 }
  0x8e   : > { %2626 = dma.done.wait (%p4341_p13), [#allocation4], 16   ;;  %p4342_p4 = pmov %p4341_p13 }
  0x90   : > { %2628 = vsyncadd (%p4342_p4), [#allocation4], 4294967280  ;;  %p4343_p5 = pmov %p4342_p4 }
  0x91   : > { %p4344_p9 = pmov %p4342_p4 }
  0x92   : > { %2630 = dma.done.wait (%p4343_p5), [#allocation6], 32  }
  0x93   : > { %2632 = vsyncadd (%p4344_p9), [#allocation6], 4294967264  ;;  %p4345_p10 = pmov %p4342_p4 }
  0x94   : > { %p4346_p12 = pmov %p4342_p4 }
  0x95   : > { %2634 = dma.done.wait (%p4345_p10), [#allocation9], 32  }
  0x96   : > { %2636 = vsyncadd (%p4346_p12), [#allocation9], 4294967264  ;;  %p4347_p0 = pmov %p4342_p4 }
  0x98   : > { %2638 = dma.done.wait (%p4347_p0), [#allocation12], 16   ;;  %p4348_p1 = pmov %p4347_p0 }
  0x9a   : > { %2640 = vsyncadd (%p4348_p1), [#allocation12], 4294967280 }
  0x9b   : > { %391 = sfence }
  0x9c   : > { %s433_s11 = sld [smem:[#allocation3]]  ;;  %s2065_s16 = sld [smem:[#allocation3 + $0x1]]  ;;  %v2844_v9 = vld [vmem:[%s2825_s15] sm:$0xff]  ;;  %v2847_v10 = vld [vmem:[%s2825_s15 + $0x8] sm:$0xff]  ;;  %v2850_v11 = vld [vmem:[%s2825_s15 + $0x10] sm:$0xff] }
  0x9d   : > { %s2066_s19 = sld [smem:[#allocation3 + $0x2]]  ;;  %s2067_s14 = sld [smem:[#allocation3 + $0x3]]  ;;  %v2855_v13 = vld [vmem:[%s2825_s15 + $0x18] sm:$0xff]  ;;  %v2863_v20 = vld [vmem:[%s2825_s15 + $0x20] sm:$0xff]  ;;  %v2887_v32 = vld [vmem:[%s2825_s15 + $0x28] sm:$0xff] }
  0x9e   : > { %s2068_s29 = sld [smem:[#allocation3 + $0x4]]  ;;  %s2852_s20 = sld [smem:[#allocation3 + $0x5]]  ;;  %v2904_v36 = vld [vmem:[%s2825_s15 + $0x30] sm:$0xff]  ;;  %v2924_v47 = vld [vmem:[%s2825_s15 + $0x38] sm:$0xff]  ;;  %v2953_v1 = vld [vmem:[%s2825_s15 + $0x40] sm:$0xff] }
  0x9f   : > { %s2073_s22 = sld [smem:[#allocation3 + $0x9]]  ;;  %s2074_s12 = sld [smem:[#allocation3 + $0xa]] }
  0xa0   : > { %s2858_s17 = sld [smem:[#allocation3 + $0xb]]  ;;  %s2866_s23 = sld [smem:[#allocation3 + $0x6]] }
  0xa1   : > { %s2868_s21 = sld [smem:[#allocation3 + $0xc]]  ;;  %s2870_s30 = sld [smem:[#allocation3 + $0x7]] }
  0xa2   : > { %v434_v12 = vstv %s433_s11  ;;  %v437_v15 = vstv %s2065_s16  ;;  %s2872_s13 = sld [smem:[#allocation3 + $0x12]]  ;;  %s2874_s18 = sld [smem:[#allocation3 + $0x13]] }
  0xa3   : > { %v435_v14 = vmul.f32 %v434_v12, %v2844_v9  ;;  %v438_v16 = vmul.f32 %v2847_v10, %v437_v15  ;;  %v441_v17 = vstv %s2066_s19  ;;  %v445_v19 = vstv %s2067_s14  ;;  %s2876_s9 = sld [smem:[#allocation3 + $0x14]]  ;;  %s2879_s11 = sld [smem:[#allocation3 + $0x15]] }
  0xa4   : > { %v442_v18 = vmul.f32 %v2850_v11, %v441_v17  ;;  %v446_v22 = vmul.f32 %v2855_v13, %v445_v19  ;;  %v449_v23 = vstv %s2068_s29  ;;  %s2884_s16 = sld [smem:[#allocation3 + $0xd]]  ;;  %v453_v33 = vstv %s2852_s20  ;;  %s2890_s19 = sld [smem:[#allocation3 + $0x8]] }
  0xa5   : > { %v439_v21 = vadd.f32 %v438_v16, %v435_v14  ;;  %v450_v25 = vmul.f32 %v2863_v20, %v449_v23  ;;  %v472_v26 = vstv %s2073_s22  ;;  %v475_v27 = vstv %s2074_s12  ;;  %s2892_s14 = sld [smem:[#allocation3 + $0xe]]  ;;  %s2894_s29 = sld [smem:[#allocation3 + $0xf]] }
  0xa6   : > { %v473_v29 = vmul.f32 %v472_v26, %v2844_v9  ;;  %v476_v30 = vmul.f32 %v2847_v10, %v475_v27  ;;  %v479_v31 = vstv %s2858_s17  ;;  %s2896_s22 = sld [smem:[#allocation3 + $0x10]]  ;;  %s2899_s12 = sld [smem:[#allocation3 + $0x16]]  ;;  %v454_v38 = vmul.f32 %v2887_v32, %v453_v33 }
  0xa7   : > { %v443_v24 = vadd.f32 %v442_v18, %v439_v21  ;;  %v480_v35 = vmul.f32 %v2850_v11, %v479_v31  ;;  %s2901_s17 = sld [smem:[#allocation3 + $0x1b]]  ;;  %v483_v39 = vstv %s2868_s21  ;;  %s2908_s20 = sld [smem:[#allocation3 + $0x11]]  ;;  %v457_v40 = vstv %s2866_s23 }
  0xa8   : > { %v477_v34 = vadd.f32 %v476_v30, %v473_v29  ;;  %s2910_s26 = sld [smem:[#allocation3 + $0x1c]]  ;;  %v510_v41 = vstv %s2872_s13  ;;  %v513_v42 = vstv %s2874_s18  ;;  %s2916_s0 = sld [smem:[#allocation3 + $0x1d]]  ;;  %v461_v44 = vstv %s2870_s30 }
  0xa9   : > { %v447_v28 = vadd.f32 %v446_v22, %v443_v24  ;;  %v517_v43 = vstv %s2876_s9  ;;  %s2918_s1 = sld [smem:[#allocation3 + $0x1e]]  ;;  %v511_v45 = vmul.f32 %v510_v41, %v2844_v9  ;;  %v514_v46 = vmul.f32 %v2847_v10, %v513_v42  ;;  %s2929_s23 = sld [smem:[#allocation3 + $0x17]] }
  0xaa   : > { %v481_v48 = vadd.f32 %v480_v35, %v477_v34  ;;  %v484_v49 = vmul.f32 %v2855_v13, %v483_v39  ;;  %v518_v50 = vmul.f32 %v2850_v11, %v517_v43  ;;  %v521_v51 = vstv %s2879_s11  ;;  %s2932_s21 = sld [smem:[#allocation5]]  ;;  %s2936_s30 = sld [smem:[#allocation3 + $0x1f]] }
  0xab   : > { %v451_v37 = vadd.f32 %v450_v25, %v447_v28  ;;  %v458_v53 = vmul.f32 %v2904_v36, %v457_v40  ;;  %v487_v54 = vstv %s2884_s16  ;;  %v515_v55 = vadd.f32 %v514_v46, %v511_v45  ;;  %s2941_s13 = sld [smem:[#allocation3 + $0x18]]  ;;  %s2943_s18 = sld [smem:[#allocation3 + $0x19]] }
  0xac   : > { %v465_v56 = vstv %s2890_s19  ;;  %v462_v57 = vmul.f32 %v2924_v47, %v461_v44  ;;  %v491_v58 = vstv %s2892_s14  ;;  %v522_v60 = vmul.f32 %v2855_v13, %v521_v51  ;;  %s2948_s9 = sld [smem:[#allocation3 + $0x24]]  ;;  %s2950_s11 = sld [smem:[#allocation3 + $0x25]] }
  0xad   : > { %v455_v52 = vadd.f32 %v454_v38, %v451_v37  ;;  %v519_v59 = vadd.f32 %v518_v50, %v515_v55  ;;  %v485_v61 = vadd.f32 %v484_v49, %v481_v48  ;;  %v488_v62 = vmul.f32 %v2863_v20, %v487_v54  ;;  %s2958_s16 = sld [smem:[#allocation3 + $0x20]]  ;;  %s2964_s19 = sld [smem:[#allocation3 + $0x26]] }
  0xae   : > { %v525_v63 = vstv %s2899_s12  ;;  %v548_v0 = vstv %s2901_s17  ;;  %v495_v3 = vstv %s2894_s29  ;;  %v499_v4 = vstv %s2896_s22  ;;  %s2966_s14 = sld [smem:[#allocation3 + $0x27]]  ;;  %s2971_s15 = sld [smem:[#allocation3 + $0x21]] }
  0xaf   : > { %v459_v2 = vadd.f32 %v458_v53, %v455_v52  ;;  %v503_v5 = vstv %s2908_s20  ;;  %v549_v6 = vmul.f32 %v548_v0, %v2844_v9  ;;  %v551_v7 = vstv %s2910_s26  ;;  %s2989_s26 = sld [smem:[#allocation3 + $0x1a]]  ;;  %s2992_s29 = sld [smem:[#allocation3 + $0x2d]] }
  0xb0   : > { %v555_v8 = vstv %s2916_s0  ;;  %v559_v12 = vstv %s2918_s1  ;;  %v523_v14 = vadd.f32 %v522_v60, %v519_v59  ;;  %v526_v15 = vmul.f32 %v2863_v20, %v525_v63  ;;  %s2975_s0 = sld [smem:[#allocation5 + $0x1]]  ;;  %s2978_s1 = sld [smem:[#allocation3 + $0x28]] }
  0xb1   : > { %v552_v16 = vmul.f32 %v2847_v10, %v551_v7  ;;  %v556_v17 = vmul.f32 %v2850_v11, %v555_v8  ;;  %v466_v18 = vmul.f32 %v2953_v1, %v465_v56  ;;  %v489_v19 = vadd.f32 %v488_v62, %v485_v61  ;;  %s2996_s22 = sld [smem:[#allocation3 + $0x22]]  ;;  %s2998_s12 = sld [smem:[#allocation3 + $0x2e]] }
  0xb2   : > { %v492_v21 = vmul.f32 %v2887_v32, %v491_v58  ;;  %v529_v22 = vstv %s2929_s23  ;;  %v469_v23 = vstv %s2932_s21  ;;  %v496_v24 = vmul.f32 %v2904_v36, %v495_v3  ;;  %s3003_s17 = sld [smem:[#allocation3 + $0x2f]]  ;;  %s3005_s20 = sld [smem:[#allocation3 + $0x30]] }
  0xb3   : > { %v553_v25 = vadd.f32 %v552_v16, %v549_v6  ;;  %v560_v26 = vmul.f32 %v2855_v13, %v559_v12  ;;  %v463_v27 = vadd.f32 %v462_v57, %v459_v2  ;;  %v2984_v28 = vmul.f32 %v2924_v47, %v499_v4  ;;  %s3010_s23 = sld [smem:[#allocation3 + $0x29]]  ;;  %s3072_s21 = sld [smem:[#allocation3 + $0x3b]] }
  0xb4   : > { %v2987_v29 = vmul.f32 %v2953_v1, %v503_v5  ;;  %v563_v30 = vstv %s2936_s30  ;;  %v527_v31 = vadd.f32 %v526_v15, %v523_v14  ;;  %v530_v33 = vmul.f32 %v2887_v32, %v529_v22  ;;  %s3013_s30 = sld [smem:[#allocation5 + $0x2]]  ;;  %s3431_s2 = sld [smem:[#allocation7 + $0x6]] }
  0xb5   : > { %v533_v34 = vstv %s2941_s13  ;;  %v557_v35 = vadd.f32 %v556_v17, %v553_v25  ;;  %v493_v37 = vadd.f32 %v492_v21, %v489_v19  ;;  %v537_v38 = vstv %s2943_s18  ;;  %s3016_s13 = sld [smem:[#allocation3 + $0x23]]  ;;  %s3022_s18 = sld [smem:[#allocation3 + $0x2a]] }
  0xb6   : > { %v586_v39 = vstv %s2948_s9  ;;  %v589_v40 = vstv %s2950_s11  ;;  %v564_v42 = vmul.f32 %v2863_v20, %v563_v30  ;;  %v534_v45 = vmul.f32 %v2904_v36, %v533_v34  ;;  %s3024_s9 = sld [smem:[#allocation3 + $0x31]]  ;;  %s3034_s11 = sld [smem:[#allocation3 + $0x36]] }
  0xb7   : > { %v561_v41 = vadd.f32 %v560_v26, %v557_v35  ;;  %v587_v43 = vmul.f32 %v586_v39, %v2844_v9  ;;  %v590_v44 = vmul.f32 %v2847_v10, %v589_v40  ;;  %v567_v46 = vstv %s2958_s16  ;;  %s3036_s16 = sld [smem:[#allocation3 + $0x37]]  ;;  %s3433_s3 = sld [smem:[#allocation7 + $0x12]] }
  0xb8   : > { %v593_v48 = vstv %s2964_s19  ;;  %v597_v49 = vstv %s2966_s14  ;;  %v531_v50 = vadd.f32 %v530_v33, %v527_v31  ;;  %v571_v51 = vstv %s2971_s15  ;;  %s3040_s19 = sld [smem:[#allocation3 + $0x32]]  ;;  %s3042_s14 = sld [smem:[#allocation3 + $0x38]] }
  0xb9   : > { %v591_v52 = vadd.f32 %v590_v44, %v587_v43  ;;  %v594_v53 = vmul.f32 %v2850_v11, %v593_v48  ;;  %v467_v54 = vadd.f32 %v466_v18, %v463_v27  ;;  %v507_v55 = vstv %s2975_s0  ;;  %s3048_s15 = sld [smem:[#allocation3 + $0x39]]  ;;  %s3435_s4 = sld [smem:[#allocation7 + $0x1d]] }
  0xba   : > { %v598_v56 = vmul.f32 %v2855_v13, %v597_v49  ;;  %v601_v57 = vstv %s2978_s1  ;;  %v538_v58 = vmul.f32 %v2924_v47, %v537_v38  ;;  %v565_v59 = vadd.f32 %v564_v42, %v561_v41  ;;  %s3050_s1 = sld [smem:[#allocation3 + $0x3a]]  ;;  %s3160_s0 = sld [smem:[#allocation3 + $0x51]] }
  0xbb   : > { %v568_v60 = vmul.f32 %v2887_v32, %v567_v46  ;;  %v595_v61 = vadd.f32 %v594_v53, %v591_v52  ;;  %v497_v62 = vadd.f32 %v496_v24, %v493_v37  ;;  %v541_v63 = vstv %s2989_s26  ;;  %s3053_s26 = sld [smem:[#allocation3 + $0x2b]]  ;;  %s3437_s5 = sld [smem:[#allocation7 + $0x26]] }
  0xbc   : > { %v572_v0 = vmul.f32 %v2904_v36, %v571_v51  ;;  %v624_v2 = vstv %s2992_s29  ;;  %v535_v3 = vadd.f32 %v534_v45, %v531_v50  ;;  %v575_v4 = vstv %s2996_s22  ;;  %s3064_s29 = sld [smem:[#allocation3 + $0x33]]  ;;  %s3074_s22 = sld [smem:[#allocation3 + $0x3f]] }
  0xbd   : > { %v599_v5 = vadd.f32 %v598_v56, %v595_v61  ;;  %v602_v6 = vmul.f32 %v2863_v20, %v601_v57  ;;  %v625_v7 = vmul.f32 %v624_v2, %v2844_v9  ;;  %v627_v8 = vstv %s2998_s12  ;;  %s3077_s12 = sld [smem:[#allocation3 + $0x2c]]  ;;  %4362 = sst [smem:[#allocation37_spill]] %s3433_s3 }
  0xbe   : > { %v631_v12 = vstv %s3003_s17  ;;  %v635_v14 = vstv %s3005_s20  ;;  %v569_v15 = vadd.f32 %v568_v60, %v565_v59  ;;  %v605_v16 = vstv %s3010_s23  ;;  %s3081_s17 = sld [smem:[#allocation3 + $0x34]]  ;;  %s3085_s20 = sld [smem:[#allocation3 + $0x40]] }
  0xbf   : > { %v628_v17 = vmul.f32 %v2847_v10, %v627_v8  ;;  %v632_v18 = vmul.f32 %v2850_v11, %v631_v12  ;;  %v3059_v19 = vadd.f32 %v469_v23, %v467_v54  ;;  %v542_v21 = vmul.f32 %v2953_v1, %v541_v63  ;;  %s3090_s23 = sld [smem:[#allocation3 + $0x41]]  ;;  %4363 = sst [smem:[#allocation38_spill]] %s3435_s4 }
  0xc0   : > { %v545_v22 = vstv %s3013_s30  ;;  %v579_v24 = vstv %s3016_s13  ;;  %v609_v25 = vstv %s3022_s18  ;;  %v636_v27 = vmul.f32 %v2855_v13, %v635_v14  ;;  %s3092_s13 = sld [smem:[#allocation5 + $0x3]]  ;;  %s3097_s18 = sld [smem:[#allocation3 + $0x3c]] }
  0xc1   : > { %v629_v26 = vadd.f32 %v628_v17, %v625_v7  ;;  %v639_v30 = vstv %s3024_s9  ;;  %v501_v31 = vadd.f32 %v2984_v28, %v497_v62  ;;  %v576_v33 = vmul.f32 %v2924_v47, %v575_v4  ;;  %s3100_s9 = sld [smem:[#allocation5 + $0x4]]  ;;  %s3166_s30 = sld [smem:[#allocation3 + $0x46]] }
  0xc2   : > { %v603_v34 = vadd.f32 %v602_v6, %v599_v5  ;;  %v606_v23 = vmul.f32 %v2887_v32, %v605_v16  ;;  %v539_v35 = vadd.f32 %v538_v58, %v535_v3  ;;  %v573_v37 = vadd.f32 %v572_v0, %v569_v15  ;;  %4364 = sst [smem:[#allocation39_spill]] %s3437_s5  ;;  %s3439_s6 = sld [smem:[#allocation7 + $0x7]] }
  0xc3   : > { %v580_v38 = vmul.f32 %v2953_v1, %v579_v24  ;;  %v633_v39 = vadd.f32 %v632_v18, %v629_v26  ;;  %v610_v28 = vmul.f32 %v2904_v36, %v609_v25  ;;  %v640_v40 = vmul.f32 %v2863_v20, %v639_v30  ;;  %s3441_s8 = sld [smem:[#allocation7 + $0x13]]  ;;  %s3443_s25 = sld [smem:[#allocation7 + $0x1e]] }
  0xc4   : > { %v662_v41 = vstv %s3034_s11  ;;  %v665_v42 = vstv %s3036_s16  ;;  %v643_v44 = vstv %s3040_s19  ;;  %v607_v48 = vadd.f32 %v606_v23, %v603_v34  ;;  %s3102_s11 = sld [smem:[#allocation3 + $0x35]]  ;;  %s3112_s19 = sld [smem:[#allocation3 + $0x42]] }
  0xc5   : > { %v637_v43 = vadd.f32 %v636_v27, %v633_v39  ;;  %v663_v45 = vmul.f32 %v662_v41, %v2844_v9  ;;  %v666_v46 = vmul.f32 %v2847_v10, %v665_v42  ;;  %v669_v49 = vstv %s3042_s14  ;;  %s3110_s16 = sld [smem:[#allocation3 + $0x3d]]  ;;  %s3117_s14 = sld [smem:[#allocation3 + $0x48]] }
  0xc6   : > { %v673_v50 = vstv %s3048_s15  ;;  %v677_v51 = vstv %s3050_s1  ;;  %v577_v52 = vadd.f32 %v576_v33, %v573_v37  ;;  %v613_v53 = vstv %s3053_s26  ;;  %s3119_s15 = sld [smem:[#allocation3 + $0x49]]  ;;  %s3123_s1 = sld [smem:[#allocation3 + $0x3e]] }
  0xc7   : > { %v667_v54 = vadd.f32 %v666_v46, %v663_v45  ;;  %v670_v56 = vmul.f32 %v2850_v11, %v669_v49  ;;  %v641_v57 = vadd.f32 %v640_v40, %v637_v43  ;;  %v644_v58 = vmul.f32 %v2887_v32, %v643_v44  ;;  %s3128_s26 = sld [smem:[#allocation3 + $0x4a]]  ;;  %s3445_s28 = sld [smem:[#allocation7 + $0x27]] }
  0xc8   : > { %v647_v59 = vstv %s3064_s29  ;;  %v674_v60 = vmul.f32 %v2855_v13, %v673_v50  ;;  %v505_v61 = vadd.f32 %v2987_v29, %v501_v31  ;;  %v543_v62 = vadd.f32 %v542_v21, %v539_v35  ;;  %s3130_s29 = sld [smem:[#allocation5 + $0x5]]  ;;  %s3449_s7 = sld [smem:[#allocation7 + $0x8]] }
  0xc9   : > { %v671_v63 = vadd.f32 %v670_v56, %v667_v54  ;;  %v678_v0 = vmul.f32 %v2863_v20, %v677_v51  ;;  %v611_v2 = vadd.f32 %v610_v28, %v607_v48  ;;  %v614_v3 = vmul.f32 %v2924_v47, %v613_v53  ;;  %4365 = sst [smem:[#allocation40_spill]] %s3441_s8  ;;  %s3451_s27 = sld [smem:[#allocation7 + $0x14]] }
  0xca   : > { %v681_v4 = vstv %s3072_s21  ;;  %v700_v5 = vstv %s3074_s22  ;;  %v581_v29 = vadd.f32 %v580_v38, %v577_v52  ;;  %v617_v6 = vstv %s3077_s12  ;;  %s3135_s21 = sld [smem:[#allocation3 + $0x43]]  ;;  %s3140_s22 = sld [smem:[#allocation5 + $0x6]] }
  0xcb   : > { %v648_v7 = vmul.f32 %v2904_v36, %v647_v59  ;;  %v675_v8 = vadd.f32 %v674_v60, %v671_v63  ;;  %v645_v12 = vadd.f32 %v644_v58, %v641_v57  ;;  %v651_v14 = vstv %s3081_s17  ;;  %s3142_s12 = sld [smem:[#allocation3 + $0x44]]  ;;  %s3154_s17 = sld [smem:[#allocation3 + $0x45]] }
  0xcc   : > { %v701_v15 = vmul.f32 %v700_v5, %v2844_v9  ;;  %v703_v16 = vstv %s3085_s20  ;;  %v682_v18 = vmul.f32 %v2887_v32, %v681_v4  ;;  %v707_v24 = vstv %s3090_s23  ;;  %s3156_s20 = sld [smem:[#allocation3 + $0x4b]]  ;;  %s3168_s23 = sld [smem:[#allocation3 + $0x47]] }
  0xcd   : > { %v679_v17 = vadd.f32 %v678_v0, %v675_v8  ;;  %v704_v21 = vmul.f32 %v2847_v10, %v703_v16  ;;  %v583_v25 = vstv %s3092_s13  ;;  %v615_v26 = vadd.f32 %v614_v3, %v611_v2  ;;  %s3173_s13 = sld [smem:[#allocation3 + $0x52]]  ;;  %4366 = sst [smem:[#allocation41_spill]] %s3443_s25 }
  0xce   : > { %v618_v27 = vmul.f32 %v2953_v1, %v617_v6  ;;  %v685_v30 = vstv %s3097_s18  ;;  %v3146_v31 = vadd.f32 %v507_v55, %v505_v61  ;;  %v3150_v33 = vadd.f32 %v545_v22, %v543_v62  ;;  %s3175_s18 = sld [smem:[#allocation3 + $0x53]]  ;;  %4367 = sst [smem:[#allocation42_spill]] %s3445_s28 }
  0xcf   : > { %v621_v34 = vstv %s3100_s9  ;;  %v655_v23 = vstv %s3102_s11  ;;  %v649_v35 = vadd.f32 %v648_v7, %v645_v12  ;;  %v652_v37 = vmul.f32 %v2924_v47, %v651_v14  ;;  %s3181_s9 = sld [smem:[#allocation3 + $0x54]]  ;;  %4368 = sst [smem:[#allocation43_spill]] %s3449_s7 }
  0xd0   : > { %v705_v38 = vadd.f32 %v704_v21, %v701_v15  ;;  %v708_v55 = vmul.f32 %v2850_v11, %v707_v24  ;;  %v3162_v22 = vadd.f32 %v583_v25, %v581_v29  ;;  %v683_v39 = vadd.f32 %v682_v18, %v679_v17  ;;  %s3185_s11 = sld [smem:[#allocation3 + $0x4c]]  ;;  %4369 = sst [smem:[#allocation44_spill]] %s3451_s27 }
  0xd1   : > { %v686_v28 = vmul.f32 %v2904_v36, %v685_v30  ;;  %v711_v40 = vstv %s3112_s19  ;;  %v619_v41 = vadd.f32 %v618_v27, %v615_v26  ;;  %v689_v42 = vstv %s3110_s16  ;;  %s3187_s16 = sld [smem:[#allocation3 + $0x4d]]  ;;  %s3197_s19 = sld [smem:[#allocation5 + $0x7]] }
  0xd2   : > { %v738_v43 = vstv %s3117_s14  ;;  %v741_v44 = vstv %s3119_s15  ;;  %v656_v45 = vmul.f32 %v2953_v1, %v655_v23  ;;  %v693_v46 = vstv %s3123_s1  ;;  %s3199_s14 = sld [smem:[#allocation3 + $0x55]]  ;;  %s3204_s15 = sld [smem:[#allocation3 + $0x4e]] }
  0xd3   : > { %v739_v48 = vmul.f32 %v738_v43, %v2844_v9  ;;  %v742_v49 = vmul.f32 %v2847_v10, %v741_v44  ;;  %v653_v50 = vadd.f32 %v652_v37, %v649_v35  ;;  %v709_v51 = vadd.f32 %v708_v55, %v705_v38  ;;  %s3208_s1 = sld [smem:[#allocation3 + $0x5a]]  ;;  %s3457_s10 = sld [smem:[#allocation7 + $0x1f]] }
  0xd4   : > { %v712_v52 = vmul.f32 %v2855_v13, %v711_v40  ;;  %v745_v53 = vstv %s3128_s26  ;;  %v659_v54 = vstv %s3130_s29  ;;  %v687_v56 = vadd.f32 %v686_v28, %v683_v39  ;;  %s3210_s26 = sld [smem:[#allocation3 + $0x5b]]  ;;  %s3215_s29 = sld [smem:[#allocation3 + $0x4f]] }
  0xd5   : > { %v690_v57 = vmul.f32 %v2924_v47, %v689_v42  ;;  %v715_v58 = vstv %s3135_s21  ;;  %v3192_v59 = vadd.f32 %v621_v34, %v619_v41  ;;  %v694_v60 = vmul.f32 %v2953_v1, %v693_v46  ;;  %s3217_s21 = sld [smem:[#allocation3 + $0x5c]]  ;;  %s3459_s24 = sld [smem:[#allocation7 + $0x28]] }
  0xd6   : > { %v697_v61 = vstv %s3140_s22  ;;  %v719_v62 = vstv %s3142_s12  ;;  %v723_v63 = vstv %s3154_s17  ;;  %v743_v0 = vadd.f32 %v742_v49, %v739_v48  ;;  %s3223_s12 = sld [smem:[#allocation3 + $0x5d]]  ;;  %s3225_s17 = sld [smem:[#allocation3 + $0x5e]] }
  0xd7   : > { %v746_v2 = vmul.f32 %v2850_v11, %v745_v53  ;;  %v749_v3 = vstv %s3156_s20  ;;  %v657_v4 = vadd.f32 %v656_v45, %v653_v50  ;;  %v713_v5 = vadd.f32 %v712_v52, %v709_v51  ;;  %s3230_s20 = sld [smem:[#allocation3 + $0x56]]  ;;  %s3296_s22 = sld [smem:[#allocation3 + $0x69]] }
  0xd8   : > { %v716_v29 = vmul.f32 %v2863_v20, %v715_v58  ;;  %v776_v6 = vstv %s3160_s0  ;;  %v691_v7 = vadd.f32 %v690_v57, %v687_v56  ;;  %v720_v8 = vmul.f32 %v2887_v32, %v719_v62  ;;  %s3235_s0 = sld [smem:[#allocation3 + $0x5f]]  ;;  %s3506_s4 = sld [smem:[#allocation7 + $0x22]] }
  0xd9   : > { %v727_v12 = vstv %s3166_s30  ;;  %v731_v14 = vstv %s3168_s23  ;;  %v750_v15 = vmul.f32 %v2855_v13, %v749_v3  ;;  %v777_v16 = vmul.f32 %v776_v6, %v2844_v9  ;;  %s3245_s30 = sld [smem:[#allocation3 + $0x50]]  ;;  %s3250_s23 = sld [smem:[#allocation3 + $0x63]] }
  0xda   : > { %v779_v17 = vstv %s3173_s13  ;;  %v783_v18 = vstv %s3175_s18  ;;  %v747_v21 = vadd.f32 %v746_v2, %v743_v0  ;;  %v787_v26 = vstv %s3181_s9  ;;  %s3254_s13 = sld [smem:[#allocation3 + $0x57]]  ;;  %s3256_s18 = sld [smem:[#allocation3 + $0x64]] }
  0xdb   : > { %v780_v24 = vmul.f32 %v2847_v10, %v779_v17  ;;  %v784_v25 = vmul.f32 %v2850_v11, %v783_v18  ;;  %v717_v27 = vadd.f32 %v716_v29, %v713_v5  ;;  %v724_v30 = vmul.f32 %v2904_v36, %v723_v63  ;;  %s3261_s9 = sld [smem:[#allocation3 + $0x65]]  ;;  %4370 = sst [smem:[#allocation45_spill]] %s3457_s10 }
  0xdc   : > { %v753_v34 = vstv %s3185_s11  ;;  %v757_v23 = vstv %s3187_s16  ;;  %v3237_v35 = vadd.f32 %v659_v54, %v657_v4  ;;  %v3240_v37 = vmul.f32 %v2924_v47, %v727_v12  ;;  %s3263_s11 = sld [smem:[#allocation3 + $0x66]]  ;;  %s3269_s16 = sld [smem:[#allocation3 + $0x60]] }
  0xdd   : > { %v3243_v38 = vmul.f32 %v2953_v1, %v731_v14  ;;  %v781_v55 = vadd.f32 %v780_v24, %v777_v16  ;;  %v695_v39 = vadd.f32 %v694_v60, %v691_v7  ;;  %v735_v28 = vstv %s3197_s19  ;;  %s3391_s19 = sld [smem:[#allocation7]]  ;;  %4371 = sst [smem:[#allocation46_spill]] %s3459_s24 }
  0xde   : > { %v788_v40 = vmul.f32 %v2855_v13, %v787_v26  ;;  %v791_v41 = vstv %s3199_s14  ;;  %v751_v42 = vadd.f32 %v750_v15, %v747_v21  ;;  %v754_v43 = vmul.f32 %v2863_v20, %v753_v34  ;;  %s3271_s14 = sld [smem:[#allocation3 + $0x58]]  ;;  %s3504_s5 = sld [smem:[#allocation7 + $0x17]] }
  0xdf   : > { %v758_v44 = vmul.f32 %v2887_v32, %v757_v23  ;;  %v785_v45 = vadd.f32 %v784_v25, %v781_v55  ;;  %v721_v46 = vadd.f32 %v720_v8, %v717_v27  ;;  %v761_v48 = vstv %s3204_s15  ;;  %s3276_s15 = sld [smem:[#allocation3 + $0x67]]  ;;  %s3512_s28 = sld [smem:[#allocation7 + $0x2b]] }
  0xe0   : > { %v814_v49 = vstv %s3208_s1  ;;  %v817_v50 = vstv %s3210_s26  ;;  %v765_v51 = vstv %s3215_s29  ;;  %v792_v52 = vmul.f32 %v2863_v20, %v791_v41  ;;  %s3287_s1 = sld [smem:[#allocation3 + $0x68]]  ;;  %s3291_s26 = sld [smem:[#allocation3 + $0x61]] }
  0xe1   : > { %v815_v53 = vmul.f32 %v814_v49, %v2844_v9  ;;  %v818_v54 = vmul.f32 %v2847_v10, %v817_v50  ;;  %v789_v56 = vadd.f32 %v788_v40, %v785_v45  ;;  %v821_v57 = vstv %s3217_s21  ;;  %s3299_s29 = sld [smem:[#allocation3 + $0x59]]  ;;  %s3306_s21 = sld [smem:[#allocation3 + $0x6a]] }
  0xe2   : > { %v825_v58 = vstv %s3223_s12  ;;  %v829_v60 = vstv %s3225_s17  ;;  %v755_v62 = vadd.f32 %v754_v43, %v751_v42  ;;  %v795_v63 = vstv %s3230_s20  ;;  %s3309_s12 = sld [smem:[#allocation3 + $0x62]]  ;;  %s3318_s17 = sld [smem:[#allocation3 + $0x6b]] }
  0xe3   : > { %v819_v0 = vadd.f32 %v818_v54, %v815_v53  ;;  %v822_v2 = vmul.f32 %v2850_v11, %v821_v57  ;;  %v3282_v3 = vadd.f32 %v697_v61, %v695_v39  ;;  %v762_v4 = vmul.f32 %v2904_v36, %v761_v48  ;;  %s3323_s20 = sld [smem:[#allocation5 + $0x8]]  ;;  %4349 = sst [smem:[#allocation24_spill]] %s3391_s19 }
  0xe4   : > { %v826_v5 = vmul.f32 %v2855_v13, %v825_v58  ;;  %v833_v29 = vstv %s3235_s0  ;;  %v725_v6 = vadd.f32 %v724_v30, %v721_v46  ;;  %v769_v7 = vstv %s3245_s30  ;;  %s3332_s0 = sld [smem:[#allocation5 + $0x9]]  ;;  %s3340_s30 = sld [smem:[#allocation5 + $0xa]] }
  0xe5   : > { %v823_v8 = vadd.f32 %v822_v2, %v819_v0  ;;  %v830_v12 = vmul.f32 %v2863_v20, %v829_v60  ;;  %v766_v61 = vmul.f32 %v2924_v47, %v765_v51  ;;  %v793_v14 = vadd.f32 %v792_v52, %v789_v56  ;;  %4380 = sst [smem:[#allocation55_spill]] %s3504_s5  ;;  %s3514_s25 = sld [smem:[#allocation7 + $0x2c]] }
  0xe6   : > { %v796_v15 = vmul.f32 %v2887_v32, %v795_v63  ;;  %v852_v16 = vstv %s3250_s23  ;;  %v759_v17 = vadd.f32 %v758_v44, %v755_v62  ;;  %v799_v18 = vstv %s3254_s13  ;;  %s2182_s23 = sld [smem:[#allocation5 + $0xb]]  ;;  %s3394_s13 = sld [smem:[#allocation7 + $0x1]] }
  0xe7   : > { %v827_v21 = vadd.f32 %v826_v5, %v823_v8  ;;  %v834_v24 = vmul.f32 %v2887_v32, %v833_v29  ;;  %v853_v25 = vmul.f32 %v852_v16, %v2844_v9  ;;  %v855_v26 = vstv %s3256_s18  ;;  %s3396_s18 = sld [smem:[#allocation7 + $0xc]]  ;;  %s3522_s8 = sld [smem:[#allocation7 + $0x30]] }
  0xe8   : > { %v859_v27 = vstv %s3261_s9  ;;  %v863_v30 = vstv %s3263_s11  ;;  %v837_v23 = vstv %s3269_s16  ;;  %v856_v55 = vmul.f32 %v2847_v10, %v855_v26  ;;  %s3398_s9 = sld [smem:[#allocation7 + $0x2]]  ;;  %s3400_s11 = sld [smem:[#allocation7 + $0xd]] }
  0xe9   : > { %v831_v34 = vadd.f32 %v830_v12, %v827_v21  ;;  %v860_v39 = vmul.f32 %v2850_v11, %v859_v27  ;;  %v797_v40 = vadd.f32 %v796_v15, %v793_v14  ;;  %v800_v41 = vmul.f32 %v2904_v36, %v799_v18  ;;  %s3403_s16 = sld [smem:[#allocation7 + $0xe]]  ;;  %s3536_s24 = sld [smem:[#allocation7 + $0x33]] }
  0xea   : > { %v803_v42 = vstv %s3271_s14  ;;  %v867_v9 = vstv %s3276_s15  ;;  %v763_v43 = vadd.f32 %v762_v4, %v759_v17  ;;  %v770_v44 = vmul.f32 %v2953_v1, %v769_v7  ;;  %s3405_s14 = sld [smem:[#allocation7 + $0x18]]  ;;  %s3407_s15 = sld [smem:[#allocation7 + $0x3]] }
  0xeb   : > { %v857_v45 = vadd.f32 %v856_v55, %v853_v25  ;;  %v864_v46 = vmul.f32 %v2855_v13, %v863_v30  ;;  %v729_v10 = vadd.f32 %v3240_v37, %v725_v6  ;;  %v835_v48 = vadd.f32 %v834_v24, %v831_v34  ;;  %s3524_s3 = sld [smem:[#allocation7 + $0x2e]]  ;;  %s3538_s10 = sld [smem:[#allocation7 + $0x34]] }
  0xec   : > { %v838_v11 = vmul.f32 %v2904_v36, %v837_v23  ;;  %v871_v49 = vstv %s3287_s1  ;;  %v804_v50 = vmul.f32 %v2924_v47, %v803_v42  ;;  %v841_v51 = vstv %s3291_s26  ;;  %4350 = sst [smem:[#allocation25_spill]] %s3394_s13  ;;  %s3409_s1 = sld [smem:[#allocation7 + $0x19]] }
  0xed   : > { %v861_v52 = vadd.f32 %v860_v39, %v857_v45  ;;  %v868_v53 = vmul.f32 %v2863_v20, %v867_v9  ;;  %v801_v13 = vadd.f32 %v800_v41, %v797_v40  ;;  %v875_v54 = vstv %s3296_s22  ;;  %s3411_s26 = sld [smem:[#allocation7 + $0xf]]  ;;  %s3413_s22 = sld [smem:[#allocation7 + $0x1a]] }
  0xee   : > { %v889_v56 = vmax.f32 %v3059_v19, 0.0  ;;  %v890_v37 = vmax.f32 %v3146_v31, 0.0  ;;  %v767_v57 = vadd.f32 %v766_v61, %v763_v43  ;;  %v807_v58 = vstv %s3299_s29  ;;  %s3415_s29 = sld [smem:[#allocation7 + $0x4]]  ;;  %s3542_s27 = sld [smem:[#allocation7 + $0x35]] }
  0xef   : > { %v865_v60 = vadd.f32 %v864_v46, %v861_v52  ;;  %v872_v62 = vmul.f32 %v2887_v32, %v871_v49  ;;  %v839_v63 = vadd.f32 %v838_v11, %v835_v48  ;;  %v842_v0 = vmul.f32 %v2924_v47, %v841_v51  ;;  %4351 = sst [smem:[#allocation26_spill]] %s3403_s16  ;;  %s3544_s7 = sld [smem:[#allocation7 + $0x36]] }
  0xf0   : > { %v879_v2 = vstv %s3306_s21  ;;  %v891_v20 = vmax.f32 %v3150_v33, 0.0  ;;  %v733_v4 = vadd.f32 %v3243_v38, %v729_v10  ;;  %v845_v5 = vstv %s3309_s12  ;;  %4352 = sst [smem:[#allocation27_spill]] %s3405_s14  ;;  %s3417_s21 = sld [smem:[#allocation7 + $0x10]] }
  0xf1   : > { %v869_v19 = vadd.f32 %v868_v53, %v865_v60  ;;  %v876_v31 = vmul.f32 %v2904_v36, %v875_v54  ;;  %v805_v29 = vadd.f32 %v804_v50, %v801_v13  ;;  %v808_v32 = vmul.f32 %v2953_v1, %v807_v58  ;;  %s3419_s12 = sld [smem:[#allocation7 + $0x1b]]  ;;  %s3478_s14 = sld [smem:[#allocation7 + $0xa]] }
  0xf2   : > { %v892_v6 = vmax.f32 %v3162_v22, 0.0  ;;  %v901_v7 = vmax.f32 %v889_v56, %v890_v37  ;;  %v771_v8 = vadd.f32 %v770_v44, %v767_v57  ;;  %v880_v33 = vmul.f32 %v2924_v47, %v879_v2  ;;  %4353 = sst [smem:[#allocation28_spill]] %s3409_s1  ;;  %s3483_s1 = sld [smem:[#allocation7 + $0x29]] }
  0xf3   : > { %v873_v12 = vadd.f32 %v872_v62, %v869_v19  ;;  %v883_v38 = vstv %s3318_s17  ;;  %v843_v61 = vadd.f32 %v842_v0, %v839_v63  ;;  %v846_v14 = vmul.f32 %v2953_v1, %v845_v5  ;;  %4354 = sst [smem:[#allocation29_spill]] %s3411_s26  ;;  %s3421_s17 = sld [smem:[#allocation7 + $0x24]] }
  0xf4   : > { %v893_v15 = vmax.f32 %v3192_v59, 0.0  ;;  %v902_v36 = vmax.f32 %v901_v7, %v891_v20  ;;  %v736_v16 = vadd.f32 %v735_v28, %v733_v4  ;;  %v773_v17 = vstv %s3323_s20  ;;  %4355 = sst [smem:[#allocation30_spill]] %s3413_s22  ;;  %s3423_s20 = sld [smem:[#allocation7 + $0x5]] }
  0xf5   : > { %v877_v18 = vadd.f32 %v876_v31, %v873_v12  ;;  %v809_v22 = vadd.f32 %v808_v32, %v805_v29  ;;  %v884_v21 = vmul.f32 %v2953_v1, %v883_v38  ;;  %v894_v24 = vmax.f32 %v3237_v35, 0.0  ;;  %s3486_s22 = sld [smem:[#allocation7 + $0x16]] }
  0xf6   : > { %v903_v25 = vmax.f32 %v902_v36, %v892_v6  ;;  %v811_v47 = vstv %s3332_s0  ;;  %v774_v27 = vadd.f32 %v773_v17, %v771_v8  ;;  %v847_v30 = vadd.f32 %v846_v14, %v843_v61  ;;  %4356 = sst [smem:[#allocation31_spill]] %s3417_s21  ;;  %s3425_s0 = sld [smem:[#allocation7 + $0x11]] }
  0xf7   : > { %v881_v26 = vadd.f32 %v880_v33, %v877_v18  ;;  %v895_v34 = vmax.f32 %v3282_v3, 0.0  ;;  %v849_v55 = vstv %s3340_s30  ;;  %v812_v59 = vadd.f32 %v811_v47, %v809_v22  ;;  %4357 = sst [smem:[#allocation32_spill]] %s3419_s12  ;;  %s3427_s30 = sld [smem:[#allocation7 + $0x1c]] }
  0xf8   : > { %v904_v23 = vmax.f32 %v903_v25, %v893_v15  ;;  %v896_v40 = vmax.f32 %v736_v16, 0.0  ;;  %v887_v41 = vstv %s2182_s23  ;;  %v850_v42 = vadd.f32 %v849_v55, %v847_v30  ;;  %s3429_s23 = sld [smem:[#allocation7 + $0x25]]  ;;  %4375 = sst [smem:[#allocation50_spill]] %s3478_s14 }
  0xf9   : > { %v885_v39 = vadd.f32 %v884_v21, %v881_v26  ;;  %v897_v9 = vmax.f32 %v774_v27, 0.0  ;;  %v898_v44 = vmax.f32 %v812_v59, 0.0  ;;  %4358 = sst [smem:[#allocation33_spill]] %s3421_s17  ;;  %v1312_v59 = vstv %s3391_s19  ;;  %s3464_s19 = sld [smem:[#allocation7 + $0x15]] }
  0xfa   : > { %v905_v28 = vmax.f32 %v904_v23, %v894_v24  ;;  %v899_v45 = vmax.f32 %v850_v42, 0.0  ;;  %v1394_v42 = vstv %s3400_s11  ;;  %4376 = sst [smem:[#allocation51_spill]] %s3483_s1  ;;  %s3493_s17 = sld [smem:[#allocation7 + $0xb]] }
  0xfb   : > { %v888_v1 = vadd.f32 %v887_v41, %v885_v39  ;;  %v1315_v39 = vstv %s3394_s13  ;;  %v1391_v41 = vstv %s3396_s18  ;;  %s3462_s13 = sld [smem:[#allocation7 + $0x9]]  ;;  %4377 = sst [smem:[#allocation52_spill]] %s3486_s22 }
  0xfc   : > { %v906_v43 = vmax.f32 %v905_v28, %v895_v34  ;;  %4359 = sst [smem:[#allocation34_spill]] %s3425_s0  ;;  %v1319_v28 = vstv %s3398_s9  ;;  %s3489_s12 = sld [smem:[#allocation7 + $0x21]] }
  0xfd   : > { %v900_v10 = vmax.f32 %v888_v1, 0.0  ;;  %4360 = sst [smem:[#allocation35_spill]] %s3427_s30  ;;  %v1323_v1 = vstv %s3407_s15  ;;  %s3520_s30 = sld [smem:[#allocation7 + $0x2d]] }
  0xfe   : > { %v907_v35 = vmax.f32 %v906_v43, %v896_v40  ;;  %4361 = sst [smem:[#allocation36_spill]] %s3429_s23  ;;  %s3546_s0 = sld [smem:[#allocation7 + $0x37]] }
  0xff   : > { %4373 = sst [smem:[#allocation48_spill]] %s3464_s19  ;;  %s3498_s23 = sld [smem:[#allocation7 + $0x2a]] }
 0x100   : > { %v908_v46 = vmax.f32 %v907_v35, %v897_v9  ;;  %4379 = sst [smem:[#allocation54_spill]] %s3493_s17  ;;  %s3528_s19 = sld [smem:[#allocation7 + $0x31]] }
 0x101   : > { %4372 = sst [smem:[#allocation47_spill]] %s3462_s13  ;;  %s3530_s13 = sld [smem:[#allocation7 + $0x32]] }
 0x102   : > { %v909_v48 = vmax.f32 %v908_v46, %v898_v44  ;;  %4378 = sst [smem:[#allocation53_spill]] %s3489_s12  ;;  %s3550_s21 = sld [smem:[#allocation7 + $0x38]] }
 0x103   : > { %s3552_s1 = sld [smem:[#allocation7 + $0x39]]  ;;  %s3559_s14 = sld [smem:[#allocation7 + $0x3c]] }
 0x104   : > { %v910_v11 = vmax.f32 %v909_v48, %v899_v45  ;;  %s3561_s22 = sld [smem:[#allocation7 + $0x3d]]  ;;  %s3564_s26 = sld [smem:[#allocation7 + $0x3e]] }
 0x105   : > { %s3569_s17 = sld [smem:[#allocation7 + $0x3f]]  ;;  %s3571_s12 = sld [smem:[#allocation7 + $0x40]] }
 0x106   : > { %v911_v49 = vmax.f32 %v910_v11, %v900_v10  ;;  %s4385_s9 = sld [smem:[#allocation29_spill]]  ;;  %s4387_s15 = sld [smem:[#allocation34_spill]] }
 0x107   : > { %s4388_s18 = sld [smem:[#allocation27_spill]]  ;;  %s4393_s11 = sld [smem:[#allocation30_spill]] }
 0x108   : > { %v912_v3 = vsub.f32 %v889_v56, %v911_v49  ;;  %v915_v50 = vsub.f32 %v890_v37, %v911_v49  ;;  %v918_v51 = vsub.f32 %v891_v20, %v911_v49  ;;  %v921_v52 = vsub.f32 %v892_v6, %v911_v49  ;;  %s4399_s5 = sld [smem:[#allocation35_spill]] }
 0x109   : > { %v924_v53 = vsub.f32 %v893_v15, %v911_v49  ;;  %v927_v60 = vsub.f32 %v894_v24, %v911_v49  ;;  %v930_v63 = vsub.f32 %v895_v34, %v911_v49  ;;  %v933_v2 = vsub.f32 %v896_v40, %v911_v49 }
 0x10a   : > { %v913_v13 = vmul.f32 1.442695, %v912_v3  ;;  %v916_v54 = vmul.f32 1.442695, %v915_v50  ;;  %v919_v57 = vmul.f32 1.442695, %v918_v51  ;;  %v936_v56 = vsub.f32 %v897_v9, %v911_v49 }
 0x10b   : > { %v922_v58 = vmul.f32 1.442695, %v921_v52  ;;  %v925_v62 = vmul.f32 1.442695, %v924_v53  ;;  %v928_v0 = vmul.f32 1.442695, %v927_v60  ;;  %v939_v20 = vsub.f32 %v898_v44, %v911_v49 }
 0x10c   : > { %2401 = vpow2.f32 %v913_v13  ;;  %v931_v4 = vmul.f32 1.442695, %v930_v63  ;;  %v934_v37 = vmul.f32 1.442695, %v933_v2  ;;  %v937_v5 = vmul.f32 1.442695, %v936_v56 }
 0x10d   : > { %2403 = vpow2.f32 %v916_v54  ;;  %v942_v19 = vsub.f32 %v899_v45, %v911_v49  ;;  %v940_v32 = vmul.f32 1.442695, %v939_v20  ;;  %v945_v6 = vsub.f32 %v900_v10, %v911_v49 }
 0x10e   : > { %2405 = vpow2.f32 %v919_v57  ;;  %v1398_v9 = vstv %s3403_s16  ;;  %v1327_v45 = vstv %s3415_s29  ;;  %v1331_v49 = vstv %s3423_s20  ;;  %s3474_s16 = sld [smem:[#allocation7 + $0x20]]  ;;  %s4389_s29 = sld [smem:[#allocation28_spill]] }
 0x10f   : > { %2407 = vpow2.f32 %v922_v58  ;;  %v943_v33 = vmul.f32 1.442695, %v942_v19  ;;  %v946_v14 = vmul.f32 1.442695, %v945_v6  ;;  %v1335_v51 = vstv %s3431_s2  ;;  %s4391_s2 = sld [smem:[#allocation37_spill]]  ;;  %s4397_s20 = sld [smem:[#allocation32_spill]] }
 0x110   : > { %2409 = vpow2.f32 %v925_v62  ;;  %v1339_v62 = vstv %s3439_s6  ;;  %s4396_s6 = sld [smem:[#allocation40_spill]] }
 0x111   : > { %2411 = vpow2.f32 %v928_v0 }
 0x112   : > { %2413 = vpow2.f32 %v931_v4 }
 0x113   : > { %2415 = vpow2.f32 %v934_v37 }
 0x114   : > { %2417 = vpow2.f32 %v937_v5  ;;  %4374 = sst [smem:[#allocation49_spill]] %s3474_s16  ;;  %s3554_s16 = sld [smem:[#allocation7 + $0x3a]] }
 0x115   : > { %2419 = vpow2.f32 %v940_v32 }
 0x116   : > { %v3357_v31 = vpop.eup %2401  ;;  %2421 = vpow2.f32 %v943_v33 }
 0x117   : > { %v3359_v29 = vpop.eup %2403  ;;  %2423 = vpow2.f32 %v946_v14 }
 0x118   : > { %v3361_v7 = vpop.eup %2405  ;;  %v948_v8 = vadd.f32 %v3359_v29, %v3357_v31 }
 0x119   : > { %v3365_v12 = vpop.eup %2407 }
 0x11a   : > { %v949_v38 = vadd.f32 %v3361_v7, %v948_v8  ;;  %v3368_v61 = vpop.eup %2409  ;;  %4381 = sst [smem:[#allocation56_spill]] %s3554_s16  ;;  %s4386_s16 = sld [smem:[#allocation31_spill]] }
 0x11b   : > { %v3371_v36 = vpop.eup %2411 }
 0x11c   : > { %v950_v15 = vadd.f32 %v3365_v12, %v949_v38  ;;  %v3374_v17 = vpop.eup %2413 }
 0x11d   : > { %v3377_v22 = vpop.eup %2415 }
 0x11e   : > { %v951_v16 = vadd.f32 %v3368_v61, %v950_v15  ;;  %v3380_v24 = vpop.eup %2417 }
 0x11f   : > { %v3383_v47 = vpop.eup %2419 }
 0x120   : > { %v952_v18 = vadd.f32 %v3371_v36, %v951_v16  ;;  %v3386_v27 = vpop.eup %2421 }
 0x121   : > { %v3389_v34 = vpop.eup %2423 }
 0x122   : > { %v953_v21 = vadd.f32 %v3374_v17, %v952_v18 }
 0x124   : > { %v954_v25 = vadd.f32 %v3377_v22, %v953_v21 }
 0x126   : > { %v955_v26 = vadd.f32 %v3380_v24, %v954_v25 }
 0x128   : > { %v956_v30 = vadd.f32 %v3383_v47, %v955_v26 }
 0x12a   : > { %v957_v23 = vadd.f32 %v3386_v27, %v956_v30 }
 0x12c   : > { %v958_v55 = vadd.f32 %v3389_v34, %v957_v23 }
 0x12e   : > { %2425 = vrcp.f32 %v958_v55 }
 0x138   : > { %v2426_v40 = vpop.eup %2425 }
 0x139   : > { %v960_v43 = vmul.f32 %v2426_v40, %v958_v55 }
 0x13b   : > { %v961_v11 = vsub.f32 2.0, %v960_v43 }
 0x13d   : > { %v962_v54 = vmul.f32 %v2426_v40, %v961_v11 }
 0x13f   : > { %v963_v4 = vmul.f32 %v3357_v31, %v962_v54  ;;  %v964_v56 = vmul.f32 %v3359_v29, %v962_v54  ;;  %v965_v37 = vmul.f32 %v3361_v7, %v962_v54  ;;  %v966_v20 = vmul.f32 %v3365_v12, %v962_v54 }
 0x140   : > { %v967_v5 = vmul.f32 %v3368_v61, %v962_v54  ;;  %v968_v19 = vmul.f32 %v3371_v36, %v962_v54  ;;  %v969_v14 = vmul.f32 %v3374_v17, %v962_v54  ;;  %v970_v15 = vmul.f32 %v3377_v22, %v962_v54 }
 0x141   : > { %v2183_v12 = vadd.f32 -1.0, %v963_v4  ;;  %v2185_v33 = vadd.f32 -1.0, %v964_v56  ;;  %v2187_v38 = vadd.f32 -1.0, %v965_v37  ;;  %v2189_v61 = vadd.f32 -1.0, %v966_v20 }
 0x142   : > { %v2191_v36 = vadd.f32 -1.0, %v967_v5  ;;  %v2193_v16 = vadd.f32 -1.0, %v968_v19  ;;  %v971_v18 = vmul.f32 %v3380_v24, %v962_v54  ;;  %v972_v30 = vmul.f32 %v3383_v47, %v962_v54 }
 0x143   : > { %v976_v21 = vmul.f32 1.442695, %v2183_v12  ;;  %v1004_v25 = vmul.f32 1.442695, %v2185_v33  ;;  %v1032_v26 = vmul.f32 1.442695, %v2187_v38  ;;  %v973_v23 = vmul.f32 %v3386_v27, %v962_v54 }
 0x144   : > { %v974_v17 = vmul.f32 %v3389_v34, %v962_v54  ;;  %v1060_v22 = vmul.f32 1.442695, %v2189_v61  ;;  %v1088_v55 = vmul.f32 1.442695, %v2191_v36  ;;  %v1116_v47 = vmul.f32 1.442695, %v2193_v16 }
 0x145   : > { %2427 = vpow2.f32 %v976_v21  ;;  %v2195_v27 = vadd.f32 -1.0, %v969_v14  ;;  %v2197_v34 = vadd.f32 -1.0, %v970_v15  ;;  %v2199_v43 = vadd.f32 -1.0, %v971_v18 }
 0x146   : > { %2429 = vpow2.f32 %v1004_v25  ;;  %v2201_v4 = vadd.f32 -1.0, %v972_v30  ;;  %v2203_v56 = vadd.f32 -1.0, %v973_v23  ;;  %v2205_v37 = vadd.f32 -1.0, %v974_v17 }
 0x147   : > { %2431 = vpow2.f32 %v1032_v26  ;;  %v1144_v12 = vmul.f32 1.442695, %v2195_v27  ;;  %v1172_v33 = vmul.f32 1.442695, %v2197_v34  ;;  %v1200_v61 = vmul.f32 1.442695, %v2199_v43 }
 0x148   : > { %2433 = vpow2.f32 %v1060_v22  ;;  %v1228_v16 = vmul.f32 1.442695, %v2201_v4  ;;  %v1256_v18 = vmul.f32 1.442695, %v2203_v56  ;;  %v1284_v21 = vmul.f32 1.442695, %v2205_v37 }
 0x149   : > { %2435 = vpow2.f32 %v1088_v55 }
 0x14a   : > { %2437 = vpow2.f32 %v1116_v47 }
 0x14b   : > { %2439 = vpow2.f32 %v1144_v12 }
 0x14c   : > { %2441 = vpow2.f32 %v1172_v33 }
 0x14d   : > { %2443 = vpow2.f32 %v1200_v61 }
 0x14e   : > { %2445 = vpow2.f32 %v1228_v16 }
 0x14f   : > { %v2428_v27 = vpop.eup %2427  ;;  %2447 = vpow2.f32 %v1256_v18 }
 0x150   : > { %v2430_v56 = vpop.eup %2429  ;;  %v2184_v37 = vadd.f32 -1.0, %v2428_v27  ;;  %2449 = vpow2.f32 %v1284_v21 }
 0x151   : > { %v2432_v26 = vpop.eup %2431  ;;  %v2186_v12 = vadd.f32 -1.0, %v2430_v56 }
 0x152   : > { %v2434_v11 = vpop.eup %2433  ;;  %v979_v25 = vsub.f32 0.0, %v2184_v37  ;;  %v2188_v5 = vadd.f32 -1.0, %v2432_v26  ;;  %v3591_v20 = vmul.f32 0.5, %v2184_v37 }
 0x153   : > { %v2436_v43 = vpop.eup %2435  ;;  %v1007_v29 = vsub.f32 0.0, %v2186_v12  ;;  %v2190_v4 = vadd.f32 -1.0, %v2434_v11  ;;  %v3593_v56 = vmul.f32 0.5, %v2186_v12 }
 0x154   : > { %v2438_v61 = vpop.eup %2437  ;;  %v980_v34 = vmul.f32 0.70710677, %v979_v25  ;;  %v1035_v38 = vsub.f32 0.0, %v2188_v5  ;;  %v2192_v47 = vadd.f32 -1.0, %v2436_v43  ;;  %v3597_v24 = vmul.f32 0.5, %v2188_v5 }
 0x155   : > { %v1008_v16 = vmul.f32 0.70710677, %v1007_v29  ;;  %v1063_v54 = vsub.f32 0.0, %v2190_v4  ;;  %v2194_v33 = vadd.f32 -1.0, %v2438_v61  ;;  %v2440_v27 = vpop.eup %2439 }
 0x156   : > { %v982_v14 = vmul.f32 0.3275911, %v980_v34  ;;  %v997_v26 = vsub.f32 0.0, %v980_v34  ;;  %v1036_v18 = vmul.f32 0.70710677, %v1035_v38  ;;  %v1091_v31 = vsub.f32 0.0, %v2192_v47  ;;  %v2442_v21 = vpop.eup %2441 }
 0x157   : > { %v1010_v55 = vmul.f32 0.3275911, %v1008_v16  ;;  %v1025_v22 = vsub.f32 0.0, %v1008_v16  ;;  %v1064_v11 = vmul.f32 0.70710677, %v1063_v54  ;;  %v2444_v23 = vpop.eup %2443  ;;  %v3611_v2 = vmul.f32 0.5, %v2194_v33 }
 0x158   : > { %v983_v36 = vadd.f32 1.0, %v982_v14  ;;  %v998_v25 = vmul.f32 %v997_v26, %v980_v34  ;;  %v1038_v15 = vmul.f32 0.3275911, %v1036_v18  ;;  %v1053_v43 = vsub.f32 0.0, %v1036_v18  ;;  %v2446_v61 = vpop.eup %2445 }
 0x159   : > { %v1011_v37 = vadd.f32 1.0, %v1010_v55  ;;  %v1026_v17 = vmul.f32 %v1025_v22, %v1008_v16  ;;  %v1066_v29 = vmul.f32 0.3275911, %v1064_v11  ;;  %v1081_v12 = vsub.f32 0.0, %v1064_v11  ;;  %v3599_v34 = vpop.eup %2447 }
 0x15a   : > { %2451 = vrcp.f32 %v983_v36  ;;  %v999_v30 = vmul.f32 1.442695, %v998_v25  ;;  %v3595_v19 = vadd.f32 1.0, %v1038_v15  ;;  %v1054_v38 = vmul.f32 %v1053_v43, %v1036_v18  ;;  %v3607_v18 = vpop.eup %2449 }
 0x15b   : > { %2453 = vrcp.f32 %v1011_v37  ;;  %v1027_v54 = vmul.f32 1.442695, %v1026_v17  ;;  %v1082_v14 = vmul.f32 %v1081_v12, %v1064_v11  ;;  %v3601_v26 = vmul.f32 0.5, %v2190_v4 }
 0x15c   : > { %v3603_v55 = vadd.f32 1.0, %v1066_v29  ;;  %v1092_v22 = vmul.f32 0.70710677, %v1091_v31  ;;  %v1119_v16 = vsub.f32 0.0, %v2194_v33  ;;  %2455 = vpow2.f32 %v999_v30 }
 0x15d   : > { %v1055_v7 = vmul.f32 1.442695, %v1054_v38  ;;  %v3605_v25 = vmul.f32 0.5, %v2192_v47  ;;  %v2196_v15 = vadd.f32 -1.0, %v2440_v27  ;;  %2457 = vrcp.f32 %v3595_v19 }
 0x15e   : > { %v1094_v5 = vmul.f32 0.3275911, %v1092_v22  ;;  %v1109_v17 = vsub.f32 0.0, %v1092_v22  ;;  %v1120_v11 = vmul.f32 0.70710677, %v1119_v16  ;;  %2459 = vpow2.f32 %v1027_v54 }
 0x15f   : > { %v1083_v43 = vmul.f32 1.442695, %v1082_v14  ;;  %v1147_v4 = vsub.f32 0.0, %v2196_v15  ;;  %v2198_v12 = vadd.f32 -1.0, %v2442_v21  ;;  %2461 = vrcp.f32 %v3603_v55 }
 0x160   : > { %v1095_v31 = vadd.f32 1.0, %v1094_v5  ;;  %v1110_v29 = vmul.f32 %v1109_v17, %v1092_v22  ;;  %v1122_v30 = vmul.f32 0.3275911, %v1120_v11  ;;  %2463 = vpow2.f32 %v1055_v7 }
 0x161   : > { %v1137_v47 = vsub.f32 0.0, %v1120_v11  ;;  %v1148_v38 = vmul.f32 0.70710677, %v1147_v4  ;;  %v1175_v27 = vsub.f32 0.0, %v2198_v12  ;;  %v3615_v50 = vmul.f32 0.5, %v2196_v15 }
 0x162   : > { %2465 = vrcp.f32 %v1095_v31  ;;  %v1111_v40 = vmul.f32 1.442695, %v1110_v29  ;;  %v3613_v60 = vadd.f32 1.0, %v1122_v30  ;;  %v3617_v22 = vmul.f32 0.5, %v2198_v12 }
 0x163   : > { %v1138_v16 = vmul.f32 %v1137_v47, %v1120_v11  ;;  %v1150_v54 = vmul.f32 0.3275911, %v1148_v38  ;;  %v1165_v14 = vsub.f32 0.0, %v1148_v38  ;;  %v1176_v13 = vmul.f32 0.70710677, %v1175_v27 }
 0x164   : > { %v2452_v21 = vpop.eup %2451  ;;  %2467 = vpow2.f32 %v1083_v43  ;;  %v2200_v7 = vadd.f32 -1.0, %v2444_v23  ;;  %v3624_v43 = vadd.f32 -1.0, %v2446_v61 }
 0x165   : > { %v2454_v5 = vpop.eup %2453  ;;  %v985_v17 = vmul.f32 %v2452_v21, %v983_v36  ;;  %2469 = vrcp.f32 %v3613_v60  ;;  %v1139_v4 = vmul.f32 1.442695, %v1138_v16  ;;  %v3620_v33 = vadd.f32 1.0, %v1150_v54 }
 0x166   : > { %v1013_v29 = vmul.f32 %v2454_v5, %v1011_v37  ;;  %v1166_v30 = vmul.f32 %v1165_v14, %v1148_v38  ;;  %v1178_v11 = vmul.f32 0.3275911, %v1176_v13  ;;  %v1193_v47 = vsub.f32 0.0, %v1176_v13  ;;  %v3622_v8 = vpop.eup %2455 }
 0x167   : > { %v986_v27 = vsub.f32 2.0, %v985_v17  ;;  %2471 = vpow2.f32 %v1111_v40  ;;  %v1203_v15 = vsub.f32 0.0, %v2200_v7  ;;  %v2458_v12 = vpop.eup %2457  ;;  %v3636_v61 = vmul.f32 0.5, %v2200_v7 }
 0x168   : > { %v1014_v23 = vsub.f32 2.0, %v1013_v29  ;;  %2473 = vrcp.f32 %v3620_v33  ;;  %v1167_v36 = vmul.f32 1.442695, %v1166_v30  ;;  %v3627_v0 = vadd.f32 1.0, %v1178_v11  ;;  %v3629_v16 = vpop.eup %2459 }
 0x169   : > { %v3631_v37 = vmul.f32 %v2452_v21, %v986_v27  ;;  %v1041_v38 = vmul.f32 %v2458_v12, %v3595_v19  ;;  %v1194_v54 = vmul.f32 %v1193_v47, %v1176_v13  ;;  %v1204_v14 = vmul.f32 0.70710677, %v1203_v15  ;;  %v2462_v17 = vpop.eup %2461 }
 0x16a   : > { %v3634_v40 = vmul.f32 %v2454_v5, %v1014_v23  ;;  %2475 = vpow2.f32 %v1139_v4  ;;  %v3639_v29 = vadd.f32 -1.0, %v3599_v34  ;;  %v3641_v30 = vpop.eup %2463  ;;  %v1069_v21 = vmul.f32 %v2462_v17, %v3603_v55 }
 0x16b   : > { %v988_v11 = vmul.f32 1.0614054, %v3631_v37  ;;  %v1042_v6 = vsub.f32 2.0, %v1041_v38  ;;  %2477 = vrcp.f32 %v3627_v0  ;;  %v1195_v5 = vmul.f32 1.442695, %v1194_v54 }
 0x16c   : > { %v2466_v13 = vpop.eup %2465  ;;  %v1016_v19 = vmul.f32 1.0614054, %v3634_v40  ;;  %2479 = vpow2.f32 %v1167_v36  ;;  %v1206_v4 = vmul.f32 0.3275911, %v1204_v14  ;;  %v1070_v34 = vsub.f32 2.0, %v1069_v21 }
 0x16d   : > { %v989_v7 = vadd.f32 -1.4531521, %v988_v11  ;;  %v3647_v47 = vmul.f32 %v2458_v12, %v1042_v6  ;;  %v1097_v27 = vmul.f32 %v2466_v13, %v1095_v31  ;;  %v1221_v38 = vsub.f32 0.0, %v1204_v14 }
 0x16e   : > { %v3649_v15 = vpop.eup %2467  ;;  %v1017_v23 = vadd.f32 -1.4531521, %v1016_v19  ;;  %v3651_v32 = vadd.f32 1.0, %v1206_v4  ;;  %v1231_v55 = vsub.f32 0.0, %v3624_v43  ;;  %v3656_v54 = vmul.f32 %v2462_v17, %v1070_v34 }
 0x16f   : > { %v2470_v58 = vpop.eup %2469  ;;  %v990_v53 = vmul.f32 %v989_v7, %v3631_v37  ;;  %v1044_v36 = vmul.f32 1.0614054, %v3647_v47  ;;  %v1098_v11 = vsub.f32 2.0, %v1097_v27  ;;  %2481 = vpow2.f32 %v1195_v5 }
 0x170   : > { %v1018_v6 = vmul.f32 %v1017_v23, %v3634_v40  ;;  %v1125_v31 = vmul.f32 %v2470_v58, %v3613_v60  ;;  %v1222_v12 = vmul.f32 %v1221_v38, %v1204_v14  ;;  %v1072_v3 = vmul.f32 1.0614054, %v3656_v54 }
 0x171   : > { %v3660_v21 = vpop.eup %2471  ;;  %v991_v19 = vadd.f32 1.4214138, %v990_v53  ;;  %v1045_v4 = vadd.f32 -1.4531521, %v1044_v36  ;;  %v3663_v63 = vmul.f32 %v2466_v13, %v1098_v11  ;;  %2483 = vrcp.f32 %v3651_v32 }
 0x172   : > { %v2474_v7 = vpop.eup %2473  ;;  %v1019_v48 = vadd.f32 1.4214138, %v1018_v6  ;;  %v1126_v57 = vsub.f32 2.0, %v1125_v31  ;;  %v3667_v17 = vmul.f32 0.5, %v3624_v43  ;;  %v1073_v5 = vadd.f32 -1.4531521, %v1072_v3 }
 0x173   : > { %v992_v60 = vmul.f32 %v991_v19, %v3631_v37  ;;  %v1046_v14 = vmul.f32 %v1045_v4, %v3647_v47  ;;  %v1100_v53 = vmul.f32 1.0614054, %v3663_v63  ;;  %v1153_v23 = vmul.f32 %v2474_v7, %v3620_v33 }
 0x174   : > { %v3672_v34 = vpop.eup %2475  ;;  %v1020_v13 = vmul.f32 %v1019_v48, %v3634_v40  ;;  %v3675_v27 = vmul.f32 %v2470_v58, %v1126_v57  ;;  %v1223_v38 = vmul.f32 1.442695, %v1222_v12  ;;  %v1074_v31 = vmul.f32 %v1073_v5, %v3656_v54 }
 0x175   : > { %v2478_v36 = vpop.eup %2477  ;;  %v993_v11 = vadd.f32 -0.28449672, %v992_v60  ;;  %v1047_v6 = vadd.f32 1.4214138, %v1046_v14  ;;  %v1101_v19 = vadd.f32 -1.4531521, %v1100_v53 }
 0x176   : > { %v3679_v35 = vpop.eup %2479  ;;  %v1021_v3 = vadd.f32 -0.28449672, %v1020_v13  ;;  %v1128_v4 = vmul.f32 1.0614054, %v3675_v27  ;;  %v1154_v44 = vsub.f32 2.0, %v1153_v23  ;;  %v1181_v52 = vmul.f32 %v2478_v36, %v3627_v0 }
 0x177   : > { %v994_v48 = vmul.f32 %v993_v11, %v3631_v37  ;;  %v1048_v57 = vmul.f32 %v1047_v6, %v3647_v47  ;;  %v1075_v58 = vadd.f32 1.4214138, %v1074_v31  ;;  %v1102_v33 = vmul.f32 %v1101_v19, %v3663_v63 }
 0x178   : > { %v1022_v12 = vmul.f32 %v1021_v3, %v3634_v40  ;;  %v1129_v60 = vadd.f32 -1.4531521, %v1128_v4  ;;  %v3687_v14 = vmul.f32 %v2474_v7, %v1154_v44  ;;  %v1182_v5 = vsub.f32 2.0, %v1181_v52 }
 0x179   : > { %v995_v53 = vadd.f32 0.2548296, %v994_v48  ;;  %v1049_v13 = vadd.f32 -0.28449672, %v1048_v57  ;;  %v1076_v10 = vmul.f32 %v1075_v58, %v3656_v54  ;;  %v1103_v23 = vadd.f32 1.4214138, %v1102_v33  ;;  %v3690_v46 = vpop.eup %2481 }
 0x17a   : > { %v1023_v0 = vadd.f32 0.2548296, %v1022_v12  ;;  %v1130_v11 = vmul.f32 %v1129_v60, %v3675_v27  ;;  %v1156_v6 = vmul.f32 1.0614054, %v3687_v14  ;;  %v3694_v31 = vmul.f32 %v2478_v36, %v1182_v5 }
 0x17b   : > { %v996_v19 = vmul.f32 %v995_v53, %v3631_v37  ;;  %v1050_v44 = vmul.f32 %v1049_v13, %v3647_v47  ;;  %v1077_v7 = vadd.f32 -0.28449672, %v1076_v10  ;;  %v1104_v52 = vmul.f32 %v1103_v23, %v3663_v63  ;;  %v2484_v3 = vpop.eup %2483 }
 0x17c   : > { %v1024_v4 = vmul.f32 %v1023_v0, %v3634_v40  ;;  %v1131_v48 = vadd.f32 1.4214138, %v1130_v11  ;;  %v1157_v57 = vadd.f32 -1.4531521, %v1156_v6  ;;  %v1184_v58 = vmul.f32 1.0614054, %v3694_v31 }
 0x17d   : > { %v1001_v33 = vmul.f32 %v3622_v8, %v996_v19  ;;  %v1051_v12 = vadd.f32 0.2548296, %v1050_v44  ;;  %v1078_v36 = vmul.f32 %v1077_v7, %v3656_v54  ;;  %v1105_v60 = vadd.f32 -0.28449672, %v1104_v52 }
 0x17e   : > { %v1132_v37 = vmul.f32 %v1131_v48, %v3675_v27  ;;  %v1158_v5 = vmul.f32 %v1157_v57, %v3687_v14  ;;  %v1185_v10 = vadd.f32 -1.4531521, %v1184_v58  ;;  %v1259_v53 = vsub.f32 0.0, %v3639_v29 }
 0x17f   : > { %v1052_v13 = vmul.f32 %v1051_v12, %v3647_v47  ;;  %v1079_v40 = vadd.f32 0.2548296, %v1078_v36  ;;  %v1106_v23 = vmul.f32 %v1105_v60, %v3663_v63  ;;  %2485 = vpow2.f32 %v1223_v38 }
 0x180   : > { %v1029_v0 = vmul.f32 %v3629_v16, %v1024_v4  ;;  %v1133_v8 = vadd.f32 -0.28449672, %v1132_v37  ;;  %v1159_v11 = vadd.f32 1.4214138, %v1158_v5  ;;  %v1186_v6 = vmul.f32 %v1185_v10, %v3694_v31 }
 0x181   : > { %v3711_v19 = vmul.f32 %v1001_v33, %v3591_v20  ;;  %v1080_v44 = vmul.f32 %v1079_v40, %v3656_v54  ;;  %v1107_v7 = vadd.f32 0.2548296, %v1106_v23  ;;  %v1209_v52 = vmul.f32 %v2484_v3, %v3651_v32 }
 0x182   : > { %v1134_v47 = vmul.f32 %v1133_v8, %v3675_v27  ;;  %v1160_v48 = vmul.f32 %v1159_v11, %v3687_v14  ;;  %v1187_v57 = vadd.f32 1.4214138, %v1186_v6  ;;  %v1232_v16 = vmul.f32 0.70710677, %v1231_v55 }
 0x183   : > { %v1057_v38 = vmul.f32 %v3641_v30, %v1052_v13  ;;  %v1085_v4 = vmul.f32 %v3649_v15, %v1080_v44  ;;  %v1108_v20 = vmul.f32 %v1107_v7, %v3663_v63  ;;  %v1210_v58 = vsub.f32 2.0, %v1209_v52 }
 0x184   : > { %v1135_v33 = vadd.f32 0.2548296, %v1134_v47  ;;  %v1161_v54 = vadd.f32 -0.28449672, %v1160_v48  ;;  %v1188_v12 = vmul.f32 %v1187_v57, %v3694_v31  ;;  %v1234_v32 = vmul.f32 0.3275911, %v1232_v16 }
 0x185   : > { %v3724_v36 = vmul.f32 %v1029_v0, %v3593_v56  ;;  %v1113_v60 = vmul.f32 %v3660_v21, %v1108_v20  ;;  %v3727_v37 = vmul.f32 %v2484_v3, %v1210_v58  ;;  %v1249_v43 = vsub.f32 0.0, %v1232_v16 }
 0x186   : > { %v1136_v30 = vmul.f32 %v1135_v33, %v3675_v27  ;;  %v1162_v15 = vmul.f32 %v1161_v54, %v3687_v14  ;;  %v1189_v55 = vadd.f32 -0.28449672, %v1188_v12  ;;  %v1235_v63 = vadd.f32 1.0, %v1234_v32 }
 0x187   : > { %v3732_v5 = vmul.f32 %v1057_v38, %v3597_v24  ;;  %v1212_v10 = vmul.f32 1.0614054, %v3727_v37  ;;  %v1250_v13 = vmul.f32 %v1249_v43, %v1232_v16  ;;  %v1260_v40 = vmul.f32 0.70710677, %v1259_v53 }
 0x188   : > { %v3736_v56 = vmul.f32 %v1085_v4, %v3601_v26  ;;  %v1163_v21 = vadd.f32 0.2548296, %v1162_v15  ;;  %v1190_v3 = vmul.f32 %v1189_v55, %v3694_v31  ;;  %2487 = vrcp.f32 %v1235_v63 }
 0x189   : > { %v3739_v23 = vpop.eup %2485  ;;  %v3742_v27 = vmul.f32 %v1113_v60, %v3605_v25  ;;  %v1213_v0 = vadd.f32 -1.4531521, %v1212_v10  ;;  %v1251_v24 = vmul.f32 1.442695, %v1250_v13  ;;  %v1277_v8 = vsub.f32 0.0, %v1260_v40 }
 0x18a   : > { %v1141_v11 = vmul.f32 %v3672_v34, %v1136_v30  ;;  %v1164_v53 = vmul.f32 %v1163_v21, %v3687_v14  ;;  %v1191_v6 = vadd.f32 0.2548296, %v1190_v3  ;;  %v1262_v26 = vmul.f32 0.3275911, %v1260_v40 }
 0x18b   : > { %v1214_v44 = vmul.f32 %v1213_v0, %v3727_v37  ;;  %v3748_v7 = vmul.f32 0.5, %v3639_v29  ;;  %v1278_v52 = vmul.f32 %v1277_v8, %v1260_v40  ;;  %v2206_v47 = vadd.f32 -1.0, %v3607_v18 }
 0x18c   : > { %v1169_v25 = vmul.f32 %v3679_v35, %v1164_v53  ;;  %v1192_v48 = vmul.f32 %v1191_v6, %v3694_v31  ;;  %v1263_v57 = vadd.f32 1.0, %v1262_v26  ;;  %v1313_v34 = vmul.f32 %v1312_v59, %v3711_v19 }
 0x18d   : > { %v1215_v14 = vadd.f32 1.4214138, %v1214_v44  ;;  %2489 = vpow2.f32 %v1251_v24  ;;  %v1279_v16 = vmul.f32 1.442695, %v1278_v52  ;;  %v1287_v38 = vsub.f32 0.0, %v2206_v47 }
 0x18e   : > { %v3757_v29 = vmul.f32 %v1141_v11, %v3611_v2  ;;  %v1197_v4 = vmul.f32 %v3690_v46, %v1192_v48  ;;  %2491 = vrcp.f32 %v1263_v57  ;;  %v1316_v35 = vmul.f32 %v1315_v39, %v3724_v36 }
 0x18f   : > { %v1216_v18 = vmul.f32 %v1215_v14, %v3727_v37  ;;  %v1288_v59 = vmul.f32 0.70710677, %v1287_v38  ;;  %v3764_v31 = vmul.f32 0.5, %v2206_v47  ;;  %v1320_v20 = vmul.f32 %v1319_v28, %v3732_v5 }
 0x190   : > { %v3770_v2 = vmul.f32 %v1169_v25, %v3615_v50  ;;  %2493 = vpow2.f32 %v1279_v16  ;;  %v1317_v46 = vadd.f32 %v1316_v35, %v1313_v34  ;;  %v1324_v58 = vmul.f32 %v1323_v1, %v3736_v56 }
 0x191   : > { %v3776_v39 = vmul.f32 %v1197_v4, %v3617_v22  ;;  %v1217_v33 = vadd.f32 -0.28449672, %v1216_v18  ;;  %v1290_v54 = vmul.f32 0.3275911, %v1288_v59  ;;  %v1305_v12 = vsub.f32 0.0, %v1288_v59 }
 0x192   : > { %v2488_v32 = vpop.eup %2487  ;;  %v1321_v60 = vadd.f32 %v1320_v20, %v1317_v46  ;;  %v1328_v28 = vmul.f32 %v1327_v45, %v3742_v27  ;;  %v1332_v50 = vmul.f32 %v1331_v49, %v3757_v29  ;;  %v1392_v1 = vmul.f32 %v1391_v41, %v3711_v19 }
 0x193   : > { %v1218_v22 = vmul.f32 %v1217_v33, %v3727_v37  ;;  %v1237_v43 = vmul.f32 %v2488_v32, %v1235_v63  ;;  %v1291_v30 = vadd.f32 1.0, %v1290_v54  ;;  %v1306_v15 = vmul.f32 %v1305_v12, %v1288_v59 }
 0x194   : > { %v1325_v55 = vadd.f32 %v1324_v58, %v1321_v60  ;;  %v1336_v10 = vmul.f32 %v1335_v51, %v3770_v2  ;;  %v1395_v45 = vmul.f32 %v1394_v42, %v3724_v36  ;;  %v1399_v49 = vmul.f32 %v1398_v9, %v3732_v5 }
 0x195   : > { %v1219_v13 = vadd.f32 0.2548296, %v1218_v22  ;;  %v1238_v41 = vsub.f32 2.0, %v1237_v43  ;;  %2495 = vrcp.f32 %v1291_v30  ;;  %v1307_v40 = vmul.f32 1.442695, %v1306_v15 }
 0x196   : > { %v1329_v63 = vadd.f32 %v1328_v28, %v1325_v55  ;;  %v1340_v21 = vmul.f32 %v1339_v62, %v3776_v39  ;;  %v1396_v3 = vadd.f32 %v1395_v45, %v1392_v1  ;;  %v4390_v0 = vstv %s4385_s9  ;;  %s4400_s9 = sld [smem:[#allocation38_spill]] }
 0x197   : > { %v1403_v51 = vmul.f32 %v4390_v0, %v3736_v56  ;;  %v3803_v24 = vpop.eup %2489  ;;  %v1220_v42 = vmul.f32 %v1219_v13, %v3727_v37  ;;  %v3806_v9 = vmul.f32 %v2488_v32, %v1238_v41  ;;  %v4392_v8 = vstv %s4386_s16  ;;  %s4401_s16 = sld [smem:[#allocation43_spill]] }
 0x198   : > { %v1407_v11 = vmul.f32 %v4392_v8, %v3742_v27  ;;  %v4394_v53 = vstv %s4387_s15  ;;  %v2492_v62 = vpop.eup %2491  ;;  %2497 = vpow2.f32 %v1307_v40  ;;  %v1333_v26 = vadd.f32 %v1332_v50, %v1329_v63  ;;  %s4404_s15 = sld [smem:[#allocation44_spill]] }
 0x199   : > { %v1411_v6 = vmul.f32 %v4394_v53, %v3757_v29  ;;  %v1400_v44 = vadd.f32 %v1399_v49, %v1396_v3  ;;  %v4395_v52 = vstv %s4388_s18  ;;  %v1225_v37 = vmul.f32 %v3739_v23, %v1220_v42  ;;  %s4405_s18 = sld [smem:[#allocation41_spill]] }
 0x19a   : > { %v1471_v47 = vmul.f32 %v4395_v52, %v3711_v19  ;;  %v1240_v25 = vmul.f32 1.0614054, %v3806_v9  ;;  %v1265_v48 = vmul.f32 %v2492_v62, %v1263_v57  ;;  %v4398_v34 = vstv %s4389_s29  ;;  %v3822_v16 = vpop.eup %2493  ;;  %s4406_s29 = sld [smem:[#allocation45_spill]] }
 0x19b   : > { %v1474_v14 = vmul.f32 %v4398_v34, %v3724_v36  ;;  %v1337_v38 = vadd.f32 %v1336_v10, %v1333_v26  ;;  %v1404_v4 = vadd.f32 %v1403_v51, %v1400_v44  ;;  %v4402_v35 = vstv %s4391_s2  ;;  %s4409_s2 = sld [smem:[#allocation33_spill]] }
 0x19c   : > { %v1415_v18 = vmul.f32 %v4402_v35, %v3770_v2  ;;  %v4403_v59 = vstv %s4393_s11  ;;  %v3831_v20 = vmul.f32 %v1225_v37, %v3636_v61  ;;  %v1241_v57 = vadd.f32 -1.4531521, %v1240_v25  ;;  %s4413_s11 = sld [smem:[#allocation36_spill]] }
 0x19d   : > { %v1478_v23 = vmul.f32 %v4403_v59, %v3732_v5  ;;  %v1266_v46 = vsub.f32 2.0, %v1265_v48  ;;  %v1475_v58 = vadd.f32 %v1474_v14, %v1471_v47  ;;  %v1341_v33 = vadd.f32 %v1340_v21, %v1337_v38 }
 0x19e   : > { %v1408_v54 = vadd.f32 %v1407_v11, %v1404_v4  ;;  %v4407_v12 = vstv %s4396_s6  ;;  %v4408_v60 = vstv %s4397_s20  ;;  %v1242_v50 = vmul.f32 %v1241_v57, %v3806_v9  ;;  %s4414_s6 = sld [smem:[#allocation39_spill]]  ;;  %s4418_s20 = sld [smem:[#allocation42_spill]] }
 0x19f   : > { %v1419_v32 = vmul.f32 %v4407_v12, %v3776_v39  ;;  %v1482_v28 = vmul.f32 %v4408_v60, %v3736_v56  ;;  %v3840_v1 = vmul.f32 %v2492_v62, %v1266_v46  ;;  %v4410_v61 = vstv %s4399_s5  ;;  %v2496_v40 = vpop.eup %2495  ;;  %s4420_s5 = sld [smem:[#allocation49_spill]] }
 0x1a0   : > { %v1486_v22 = vmul.f32 %v4410_v61, %v3742_v27  ;;  %v4411_v43 = vstv %s4400_s9  ;;  %v4412_v55 = vstv %s4401_s16  ;;  %v1412_v45 = vadd.f32 %v1411_v6, %v1408_v54  ;;  %s4421_s9 = sld [smem:[#allocation46_spill]]  ;;  %s4424_s16 = sld [smem:[#allocation51_spill]] }
 0x1a1   : > { %v1490_v15 = vmul.f32 %v4411_v43, %v3757_v29  ;;  %v1344_v10 = vmul.f32 %v4412_v55, %v3831_v20  ;;  %v4415_v49 = vstv %s4404_s15  ;;  %v1479_v41 = vadd.f32 %v1478_v23, %v1475_v58  ;;  %s4049_s15 = sld [smem:[#allocation7 + $0x46]] }
 0x1a2   : > { %v1423_v13 = vmul.f32 %v4415_v49, %v3831_v20  ;;  %v1243_v63 = vadd.f32 1.4214138, %v1242_v50  ;;  %v1268_v21 = vmul.f32 1.0614054, %v3840_v1  ;;  %v4416_v3 = vstv %s4405_s18  ;;  %v3871_v48 = vpop.eup %2497  ;;  %s4065_s18 = sld [smem:[#allocation7 + $0x47]] }
 0x1a3   : > { %v1494_v0 = vmul.f32 %v4416_v3, %v3770_v2  ;;  %v4417_v51 = vstv %s4406_s29  ;;  %v1293_v8 = vmul.f32 %v2496_v40, %v1291_v30  ;;  %v1416_v11 = vadd.f32 %v1415_v18, %v1412_v45  ;;  %s2287_s29 = sld [smem:[#allocation8 + $0x5]] }
 0x1a4   : > { %v1498_v42 = vmul.f32 %v4417_v51, %v3776_v39  ;;  %v1483_v53 = vadd.f32 %v1482_v28, %v1479_v41  ;;  %v4419_v6 = vstv %s4409_s2  ;;  %v1244_v26 = vmul.f32 %v1243_v63, %v3806_v9  ;;  %s4096_s2 = sld [smem:[#allocation10]] }
 0x1a5   : > { %v1550_v62 = vmul.f32 %v4419_v6, %v3711_v19  ;;  %v1269_v44 = vadd.f32 -1.4531521, %v1268_v21  ;;  %v4422_v52 = vstv %s4413_s11  ;;  %v4423_v37 = vstv %s4414_s6  ;;  %s4103_s11 = sld [smem:[#allocation10 + $0x1]]  ;;  %s4109_s6 = sld [smem:[#allocation10 + $0x2]] }
 0x1a6   : > { %v1553_v47 = vmul.f32 %v4422_v52, %v3724_v36  ;;  %v1557_v25 = vmul.f32 %v4423_v37, %v3732_v5  ;;  %v1294_v30 = vsub.f32 2.0, %v1293_v8  ;;  %v3873_v34 = vadd.f32 %v1344_v10, %v1341_v33 }
 0x1a7   : > { %v1420_v14 = vadd.f32 %v1419_v32, %v1416_v11  ;;  %v1487_v38 = vadd.f32 %v1486_v22, %v1483_v53  ;;  %v1245_v4 = vadd.f32 -0.28449672, %v1244_v26  ;;  %v1270_v35 = vmul.f32 %v1269_v44, %v3840_v1 }
 0x1a8   : > { %v1554_v18 = vadd.f32 %v1553_v47, %v1550_v62  ;;  %v4425_v59 = vstv %s4418_s20  ;;  %v3879_v57 = vmul.f32 %v2496_v40, %v1294_v30  ;;  %v4426_v58 = vstv %s4420_s5  ;;  %s4143_s20 = sld [smem:[#allocation10 + $0x6]]  ;;  %s4162_s5 = sld [smem:[#allocation10 + $0x7]] }
 0x1a9   : > { %v1561_v23 = vmul.f32 %v4425_v59, %v3736_v56  ;;  %v1491_v46 = vadd.f32 %v1490_v15, %v1487_v38  ;;  %v1502_v54 = vmul.f32 %v4426_v58, %v3831_v20  ;;  %v4427_v33 = vstv %s4421_s9  ;;  %s4169_s9 = sld [smem:[#allocation10 + $0xc]] }
 0x1aa   : > { %v1565_v12 = vmul.f32 %v4427_v33, %v3742_v27  ;;  %v1246_v32 = vmul.f32 %v1245_v4, %v3806_v9  ;;  %v1271_v60 = vadd.f32 1.4214138, %v1270_v35  ;;  %v1424_v28 = vadd.f32 %v1423_v13, %v1420_v14 }
 0x1ab   : > { %v1558_v50 = vadd.f32 %v1557_v25, %v1554_v18  ;;  %v1296_v61 = vmul.f32 1.0614054, %v3879_v57  ;;  %v1495_v22 = vadd.f32 %v1494_v0, %v1491_v46  ;;  %v4428_v43 = vstv %s4424_s16  ;;  %s4172_s16 = sld [smem:[#allocation10 + $0xd]] }
 0x1ac   : > { %v1569_v15 = vmul.f32 %v4428_v43, %v3757_v29  ;;  %v4429_v55 = vstv %s3498_s23  ;;  %v1247_v45 = vadd.f32 0.2548296, %v1246_v32  ;;  %v1272_v49 = vmul.f32 %v1271_v60, %v3840_v1  ;;  %s4038_s23 = sld [smem:[#allocation7 + $0x45]] }
 0x1ad   : > { %v1573_v10 = vmul.f32 %v4429_v55, %v3770_v2  ;;  %v1562_v41 = vadd.f32 %v1561_v23, %v1558_v50  ;;  %v4430_v40 = vstv %s3522_s8  ;;  %v1297_v63 = vadd.f32 -1.4531521, %v1296_v61  ;;  %s4436_s8 = sld [smem:[#allocation47_spill]] }
 0x1ae   : > { %v1629_v13 = vmul.f32 %v4430_v40, %v3711_v19  ;;  %v1499_v21 = vadd.f32 %v1498_v42, %v1495_v22  ;;  %v4431_v3 = vstv %s3528_s19  ;;  %v4432_v51 = vstv %s3530_s13  ;;  %s4450_s19 = sld [smem:[#allocation50_spill]]  ;;  %s3966_s13 = sld [smem:[#allocation7 + $0x3b]] }
 0x1af   : > { %v1632_v0 = vmul.f32 %v4431_v3, %v3724_v36  ;;  %v1636_v8 = vmul.f32 %v4432_v51, %v3732_v5  ;;  %v1248_v11 = vmul.f32 %v1247_v45, %v3806_v9  ;;  %v1273_v53 = vadd.f32 -0.28449672, %v1272_v49 }
 0x1b0   : > { %v1566_v6 = vadd.f32 %v1565_v12, %v1562_v41  ;;  %v4433_v62 = vstv %s3512_s28  ;;  %v1298_v44 = vmul.f32 %v1297_v63, %v3879_v57  ;;  %v4434_v42 = vstv %s3514_s25  ;;  %s4437_s28 = sld [smem:[#allocation48_spill]]  ;;  %s4439_s25 = sld [smem:[#allocation53_spill]] }
 0x1b1   : > { %v1577_v26 = vmul.f32 %v4433_v62, %v3776_v39  ;;  %v1581_v52 = vmul.f32 %v4434_v42, %v3831_v20  ;;  %v1633_v47 = vadd.f32 %v1632_v0, %v1629_v13  ;;  %v4435_v37 = vstv %s3536_s24  ;;  %s3931_s24 = sld [smem:[#allocation7 + $0x23]] }
 0x1b2   : > { %v1640_v25 = vmul.f32 %v4435_v37, %v3736_v56  ;;  %v1253_v30 = vmul.f32 %v3803_v24, %v1248_v11  ;;  %v1274_v9 = vmul.f32 %v1273_v53, %v3840_v1  ;;  %v1503_v14 = vadd.f32 %v1502_v54, %v1499_v21 }
 0x1b3   : > { %v1570_v38 = vadd.f32 %v1569_v15, %v1566_v6  ;;  %v1299_v4 = vadd.f32 1.4214138, %v1298_v44  ;;  %v1637_v35 = vadd.f32 %v1636_v8, %v1633_v47  ;;  %v4438_v18 = vstv %s3538_s10  ;;  %s3956_s10 = sld [smem:[#allocation7 + $0x41]] }
 0x1b4   : > { %v1644_v59 = vmul.f32 %v4438_v18, %v3742_v27  ;;  %v4440_v23 = vstv %s3542_s27  ;;  %v3925_v58 = vmul.f32 %v1253_v30, %v3667_v17  ;;  %v1275_v24 = vadd.f32 0.2548296, %v1274_v9  ;;  %s3951_s27 = sld [smem:[#allocation7 + $0x2f]] }
 0x1b5   : > { %v1648_v46 = vmul.f32 %v4440_v23, %v3757_v29  ;;  %v1574_v33 = vadd.f32 %v1573_v10, %v1570_v38  ;;  %v4441_v12 = vstv %s3544_s7  ;;  %v1300_v32 = vmul.f32 %v1299_v4, %v3879_v57  ;;  %s3943_s7 = sld [smem:[#allocation8]] }
 0x1b6   : > { %v1652_v54 = vmul.f32 %v4441_v12, %v3770_v2  ;;  %v1641_v60 = vadd.f32 %v1640_v25, %v1637_v35  ;;  %v4442_v50 = vstv %s3559_s14  ;;  %v4443_v22 = vstv %s3561_s22  ;;  %s4451_s14 = sld [smem:[#allocation52_spill]]  ;;  %s3972_s22 = sld [smem:[#allocation8 + $0x1]] }
 0x1b7   : > { %v1708_v61 = vmul.f32 %v4442_v50, %v3711_v19  ;;  %v1711_v17 = vmul.f32 %v4443_v22, %v3724_v36  ;;  %v1276_v43 = vmul.f32 %v1275_v24, %v3840_v1  ;;  %v4444_v15 = vstv %s4436_s8  ;;  %s4180_s8 = sld [smem:[#allocation10 + $0x8]] }
 0x1b8   : > { %v1348_v55 = vmul.f32 %v4444_v15, %v3925_v58  ;;  %v4445_v10 = vstv %s4437_s28  ;;  %v4446_v49 = vstv %s4439_s25  ;;  %v1301_v19 = vadd.f32 -0.28449672, %v1300_v32  ;;  %s4184_s28 = sld [smem:[#allocation10 + $0xe]]  ;;  %s4189_s25 = sld [smem:[#allocation10 + $0x3]] }
 0x1b9   : > { %v1427_v45 = vmul.f32 %v4445_v10, %v3925_v58  ;;  %v1506_v41 = vmul.f32 %v4446_v49, %v3925_v58  ;;  %v1578_v40 = vadd.f32 %v1577_v26, %v1574_v33  ;;  %v1645_v13 = vadd.f32 %v1644_v59, %v1641_v60 }
 0x1ba   : > { %v4447_v36 = vstv %s3546_s0  ;;  %v1281_v63 = vmul.f32 %v3822_v16, %v1276_v43  ;;  %v1349_v21 = vadd.f32 %v1348_v55, %v3873_v34  ;;  %v4448_v3 = vstv %s3520_s30  ;;  %s4458_s0 = sld [smem:[#allocation56_spill]]  ;;  %s4024_s30 = sld [smem:[#allocation7 + $0x44]] }
 0x1bb   : > { %v1656_v1 = vmul.f32 %v4447_v36, %v3776_v39  ;;  %v1585_v0 = vmul.f32 %v4448_v3, %v3925_v58  ;;  %v4449_v51 = vstv %s3550_s21  ;;  %v1302_v11 = vmul.f32 %v1301_v19, %v3879_v57  ;;  %s3977_s21 = sld [smem:[#allocation7 + $0x42]] }
 0x1bc   : > { %v1660_v8 = vmul.f32 %v4449_v51, %v3831_v20  ;;  %v1428_v53 = vadd.f32 %v1427_v45, %v1424_v28  ;;  %v1582_v6 = vadd.f32 %v1581_v52, %v1578_v40  ;;  %v1649_v16 = vadd.f32 %v1648_v46, %v1645_v13 }
 0x1bd   : > { %v3970_v34 = vmul.f32 %v1281_v63, %v3748_v7  ;;  %v1507_v62 = vadd.f32 %v1506_v41, %v1503_v14  ;;  %v1712_v26 = vadd.f32 %v1711_v17, %v1708_v61  ;;  %v4452_v44 = vstv %s3564_s26  ;;  %s3994_s26 = sld [smem:[#allocation8 + $0x2]] }
 0x1be   : > { %v1715_v42 = vmul.f32 %v4452_v44, %v3732_v5  ;;  %v1303_v47 = vadd.f32 0.2548296, %v1302_v11  ;;  %v1653_v28 = vadd.f32 %v1652_v54, %v1649_v16  ;;  %v4453_v52 = vstv %s3552_s1  ;;  %s3996_s1 = sld [smem:[#allocation8 + $0x3]] }
 0x1bf   : > { %v1664_v7 = vmul.f32 %v4453_v52, %v3925_v58  ;;  %v4454_v37 = vstv %s3569_s17  ;;  %v4455_v30 = vstv %s4450_s19  ;;  %v4456_v14 = vstv %s4451_s14  ;;  %s4462_s17 = sld [smem:[#allocation55_spill]]  ;;  %s4217_s19 = sld [smem:[#allocation10 + $0x10]] }
 0x1c0   : > { %v1719_v25 = vmul.f32 %v4454_v37, %v3736_v56  ;;  %v1352_v9 = vmul.f32 %v4455_v30, %v3970_v34  ;;  %v1431_v5 = vmul.f32 %v4456_v14, %v3970_v34  ;;  %v4457_v38 = vstv %s3506_s4  ;;  %s4461_s4 = sld [smem:[#allocation54_spill]]  ;;  %s4230_s14 = sld [smem:[#allocation10 + $0xb]] }
 0x1c1   : > { %v1510_v4 = vmul.f32 %v4457_v38, %v3970_v34  ;;  %v1586_v35 = vadd.f32 %v1585_v0, %v1582_v6  ;;  %v1304_v18 = vmul.f32 %v1303_v47, %v3879_v57  ;;  %v4459_v56 = vstv %s3524_s3  ;;  %s4014_s3 = sld [smem:[#allocation7 + $0x43]] }
 0x1c2   : > { %v1589_v59 = vmul.f32 %v4459_v56, %v3970_v34  ;;  %v1657_v23 = vadd.f32 %v1656_v1, %v1653_v28  ;;  %v1716_v46 = vadd.f32 %v1715_v42, %v1712_v26  ;;  %v1359_v24 = vstv %s3943_s7  ;;  %s4203_s7 = sld [smem:[#allocation10 + $0xf]] }
 0x1c3   : > { %v1513_v33 = vstv %s3931_s24  ;;  %v1592_v12 = vstv %s3951_s27  ;;  %v4460_v54 = vstv %s3571_s12  ;;  %v1309_v60 = vmul.f32 %v3871_v48, %v1304_v18  ;;  %s4020_s12 = sld [smem:[#allocation8 + $0x4]]  ;;  %s4195_s24 = sld [smem:[#allocation10 + $0x9]] }
 0x1c4   : > { %v1723_v32 = vmul.f32 %v4460_v54, %v3742_v27  ;;  %v1661_v50 = vadd.f32 %v1660_v8, %v1657_v23  ;;  %v1720_v61 = vadd.f32 %v1719_v25, %v1716_v46  ;;  %v1726_v22 = vstv %s3956_s10  ;;  %s4209_s27 = sld [smem:[#allocation10 + $0x4]]  ;;  %s4214_s10 = sld [smem:[#allocation10 + $0xa]] }
 0x1c5   : > { %v1353_v57 = vadd.f32 %v1352_v9, %v1349_v21  ;;  %v1432_v17 = vadd.f32 %v1431_v5, %v1428_v53  ;;  %v4463_v43 = vstv %s4458_s0  ;;  %v1671_v55 = vstv %s3966_s13  ;;  %s4227_s13 = sld [smem:[#allocation10 + $0x5]]  ;;  %s2308_s0 = sld [smem:[#allocation11 + $0x2]] }
 0x1c6   : > { %v1668_v15 = vmul.f32 %v4463_v43, %v3970_v34  ;;  %v4017_v27 = vmul.f32 %v1309_v60, %v3764_v31  ;;  %v1511_v48 = vadd.f32 %v1510_v4, %v1507_v62  ;;  %v1590_v10 = vadd.f32 %v1589_v59, %v1586_v35 }
 0x1c7   : > { %v1665_v45 = vadd.f32 %v1664_v7, %v1661_v50  ;;  %v1438_v49 = vstv %s3972_s22  ;;  %v1724_v41 = vadd.f32 %v1723_v32, %v1720_v61  ;;  %v1727_v19 = vmul.f32 %v1726_v22, %v3757_v29  ;;  %s4232_s22 = sld [smem:[#allocation10 + $0x11]] }
 0x1c8   : > { %v1730_v40 = vstv %s3977_s21  ;;  %v4464_v13 = vstv %s4461_s4  ;;  %v4465_v1 = vstv %s4462_s17  ;;  %v1514_v31 = vmul.f32 %v1513_v33, %v4017_v27  ;;  %s4239_s21 = sld [smem:[#allocation11]] }
 0x1c9   : > { %v1356_v36 = vmul.f32 %v4464_v13, %v4017_v27  ;;  %v1435_v63 = vmul.f32 %v4465_v1, %v4017_v27  ;;  %v1593_v21 = vmul.f32 %v1592_v12, %v4017_v27  ;;  %v1517_v3 = vstv %s3994_s26  ;;  %s2300_s26 = sld [smem:[#allocation11 + $0x1]] }
 0x1ca   : > { %v1596_v0 = vstv %s3996_s1  ;;  %v1669_v51 = vadd.f32 %v1668_v15, %v1665_v45  ;;  %v1672_v8 = vmul.f32 %v1671_v55, %v4017_v27  ;;  %v1515_v53 = vadd.f32 %v1514_v31, %v1511_v48  ;;  %s4466_s1 = sld [smem:[#allocation18_spill]] }
 0x1cb   : > { %v1357_v29 = vadd.f32 %v1356_v36, %v1353_v57  ;;  %v1436_v11 = vadd.f32 %v1435_v63, %v1432_v17  ;;  %v1594_v6 = vadd.f32 %v1593_v21, %v1590_v10  ;;  %v1728_v16 = vadd.f32 %v1727_v19, %v1724_v41 }
 0x1cc   : > { %v1731_v62 = vmul.f32 %v1730_v40, %v3770_v2  ;;  %v4044_v42 = vadd.f32 %v1517_v3, %v1515_v53  ;;  %v1734_v28 = vstv %s4014_s3  ;;  %v1673_v2 = vadd.f32 %v1672_v8, %v1669_v51 }
 0x1cd   : > { %v4040_v26 = vadd.f32 %v1359_v24, %v1357_v29  ;;  %v4042_v44 = vadd.f32 %v1438_v49, %v1436_v11  ;;  %v4046_v47 = vadd.f32 %v1596_v0, %v1594_v6  ;;  %v1675_v30 = vstv %s4020_s12  ;;  %s4468_s12 = sld [smem:[#allocation23_spill]] }
 0x1ce   : > { %v4058_v37 = vmul.f32 0.70710677, %v4044_v42  ;;  %v1738_v9 = vstv %s4024_s30  ;;  %v1732_v38 = vadd.f32 %v1731_v62, %v1728_v16  ;;  %v1735_v4 = vmul.f32 %v1734_v28, %v3776_v39 }
 0x1cf   : > { %v4052_v52 = vmul.f32 0.70710677, %v4040_v26  ;;  %v4055_v7 = vmul.f32 0.70710677, %v4042_v44  ;;  %v4061_v25 = vmul.f32 0.70710677, %v4046_v47  ;;  %v4074_v23 = vadd.f32 %v1675_v30, %v1673_v2 }
 0x1d0   : > { %v1520_v35 = vand.u32 2147483647, %v4058_v37  ;;  %v1739_v24 = vmul.f32 %v1738_v9, %v3831_v20  ;;  %v1742_v33 = vstv %s4038_s23  ;;  %v1736_v60 = vadd.f32 %v1735_v4, %v1732_v38  ;;  %s4467_s4 = sand.u32 1, %s4466_s1  }
 0x1d1   : > { %v1362_v14 = vand.u32 2147483647, %v4052_v52  ;;  %v1441_v5 = vand.u32 2147483647, %v4055_v7  ;;  %v4072_v18 = vand.u32 2147483647, %v4061_v25  ;;  %v1746_v39 = vstv %s4049_s15 }
 0x1d2   : > { %v1521_v46 = vmul.f32 0.3275911, %v1520_v35  ;;  %v4081_v61 = vmul.f32 0.70710677, %v4074_v23  ;;  %v1743_v22 = vmul.f32 %v1742_v33, %v3925_v58  ;;  %v1750_v57 = vstv %s4065_s18  ;;  %s2315_s17 = smul.u32 24, %s4467_s4 }
 0x1d3   : > { %v1363_v56 = vmul.f32 0.3275911, %v1362_v14  ;;  %v1442_v59 = vmul.f32 0.3275911, %v1441_v5  ;;  %v1600_v32 = vmul.f32 0.3275911, %v4072_v18  ;;  %v1740_v43 = vadd.f32 %v1739_v24, %v1736_v60 }
 0x1d4   : > { %v1522_v50 = vadd.f32 1.0, %v1521_v46  ;;  %v4086_v20 = vand.u32 2147483647, %v4081_v61  ;;  %v1747_v15 = vmul.f32 %v1746_v39, %v3970_v34  ;;  %v1751_v10 = vmul.f32 %v1750_v57, %v4017_v27  ;;  %s415_s3 = scalar_lea.vmem [#allocation13], %s2315_s17  ;;  %p4469_p2 = scmp.ne.s32.totalorder %s4468_s12, 0 }
 0x1d5   : > { %v1364_v12 = vadd.f32 1.0, %v1363_v56  ;;  %v1443_v54 = vadd.f32 1.0, %v1442_v59  ;;  %v1601_v17 = vadd.f32 1.0, %v1600_v32  ;;  %v1744_v48 = vadd.f32 %v1743_v22, %v1740_v43  ;;  %s4470_s30 = sld [smem:[#allocation20_spill]] (%p4469_p2) }
 0x1d6   : > { %v1679_v55 = vmul.f32 0.3275911, %v4086_v20  ;;  %v1378_v45 = vsub.f32 0.0, %v1362_v14  ;;  %v1754_v58 = vstv %s2287_s29  ;;  %v1457_v40 = vsub.f32 0.0, %v1441_v5  ;;  %s4471_s29 = sld [smem:[#allocation64_spill]] (%p4469_p2) }
 0x1d7   : > { %2499 = vrcp.f32 %v1364_v12  ;;  %v1748_v41 = vadd.f32 %v1747_v15, %v1744_v48  ;;  %v1536_v21 = vsub.f32 0.0, %v1520_v35  ;;  %v1615_v2 = vsub.f32 0.0, %v4072_v18 }
 0x1d8   : > { %2501 = vrcp.f32 %v1443_v54  ;;  %v1680_v49 = vadd.f32 1.0, %v1679_v55  ;;  %v1379_v36 = vmul.f32 %v1378_v45, %v1362_v14  ;;  %v1458_v0 = vmul.f32 %v1457_v40, %v1441_v5 }
 0x1d9   : > { %2503 = vrcp.f32 %v1522_v50  ;;  %v1752_v19 = vadd.f32 %v1751_v10, %v1748_v41  ;;  %v1537_v28 = vmul.f32 %v1536_v21, %v1520_v35  ;;  %v1694_v59 = vsub.f32 0.0, %v4086_v20 }
 0x1da   : > { %2505 = vrcp.f32 %v1601_v17  ;;  %v1380_v8 = vmul.f32 1.442695, %v1379_v36  ;;  %v1459_v14 = vmul.f32 1.442695, %v1458_v0  ;;  %v1616_v32 = vmul.f32 %v1615_v2, %v4072_v18 }
 0x1db   : > { %2507 = vrcp.f32 %v1680_v49  ;;  %v4091_v1 = vadd.f32 %v1754_v58, %v1752_v19  ;;  %v1786_v60 = vstv %s4096_s2  ;;  %v1538_v43 = vmul.f32 1.442695, %v1537_v28  ;;  %s2310_s23 = sshll.u32 (%p4469_p2), %s4470_s30, 3 }
 0x1dc   : > { %2509 = vpow2.f32 %v1380_v8  ;;  %v1695_v15 = vmul.f32 %v1694_v59, %v4086_v20  ;;  %v1789_v41 = vstv %s4103_s11  ;;  %v1793_v58 = vstv %s4109_s6  ;;  %s1882_s2 = scalar_lea.vmem (%p4469_p2), %s4471_s29, %s2310_s23 }
 0x1dd   : > { %v4094_v3 = vmul.f32 0.70710677, %v4091_v1  ;;  %vm1383_vm0 = vcmp.ge.f32.partialorder %v4052_v52, 0.0  ;;  %vm1462_vm1 = vcmp.ge.f32.partialorder %v4055_v7, 0.0  ;;  %vm1541_vm2 = vcmp.ge.f32.partialorder %v4058_v37, 0.0 }
 0x1de   : > { %vm1620_vm3 = vcmp.ge.f32.partialorder %v4061_v25, 0.0  ;;  %vm1699_vm4 = vcmp.ge.f32.partialorder %v4081_v61, 0.0  ;;  %v1818_v7 = vstv %s4162_s5 }
 0x1df   : > { %v4099_v11 = vand.u32 2147483647, %v4094_v3  ;;  %vm1778_vm5 = vcmp.ge.f32.partialorder %v4094_v3, 0.0  ;;  %v1805_v3 = vstv %s4227_s13 }
 0x1e1   : > { %v2500_v13 = vpop.eup %2499  ;;  %v1758_v30 = vmul.f32 0.3275911, %v4099_v11 }
 0x1e2   : > { %v2502_v63 = vpop.eup %2501  ;;  %v1366_v34 = vmul.f32 %v2500_v13, %v1364_v12 }
 0x1e3   : > { %v1445_v31 = vmul.f32 %v2502_v63, %v1443_v54  ;;  %v2504_v51 = vpop.eup %2503  ;;  %v1759_v46 = vadd.f32 1.0, %v1758_v30 }
 0x1e4   : > { %v1367_v27 = vsub.f32 2.0, %v1366_v34  ;;  %v1524_v6 = vmul.f32 %v2504_v51, %v1522_v50  ;;  %v2506_v16 = vpop.eup %2505  ;;  %v1696_v34 = vmul.f32 1.442695, %v1695_v15 }
 0x1e5   : > { %v1446_v29 = vsub.f32 2.0, %v1445_v31  ;;  %v1603_v38 = vmul.f32 %v2506_v16, %v1601_v17  ;;  %v2508_v4 = vpop.eup %2507  ;;  %2511 = vrcp.f32 %v1759_v46 }
 0x1e6   : > { %v4101_v53 = vmul.f32 %v2500_v13, %v1367_v27  ;;  %v1525_v5 = vsub.f32 2.0, %v1524_v6  ;;  %v1682_v12 = vmul.f32 %v2508_v4, %v1680_v49  ;;  %2513 = vpow2.f32 %v1459_v14 }
 0x1e7   : > { %v4105_v62 = vmul.f32 %v2502_v63, %v1446_v29  ;;  %v1604_v33 = vsub.f32 2.0, %v1603_v38  ;;  %v1617_v49 = vmul.f32 1.442695, %v1616_v32  ;;  %v4133_v63 = vmul.f32 0.5, %v4040_v26 }
 0x1e8   : > { %v1369_v9 = vmul.f32 1.0614054, %v4101_v53  ;;  %v4114_v24 = vmul.f32 %v2504_v51, %v1525_v5  ;;  %v1683_v57 = vsub.f32 2.0, %v1682_v12  ;;  %2515 = vpow2.f32 %v1538_v43  ;;  %v2510_v51 = vpop.eup %2509 }
 0x1e9   : > { %v1448_v56 = vmul.f32 1.0614054, %v4105_v62  ;;  %v4120_v22 = vmul.f32 %v2506_v16, %v1604_v33  ;;  %v4138_v29 = vmul.f32 0.5, %v4042_v44  ;;  %v4141_v6 = vmul.f32 0.5, %v4044_v42 }
 0x1ea   : > { %v1370_v35 = vadd.f32 -1.4531521, %v1369_v9  ;;  %v1527_v50 = vmul.f32 1.0614054, %v4114_v24  ;;  %v4125_v10 = vmul.f32 %v2508_v4, %v1683_v57  ;;  %2517 = vpow2.f32 %v1617_v49 }
 0x1eb   : > { %v1449_v54 = vadd.f32 -1.4531521, %v1448_v56  ;;  %v1606_v18 = vmul.f32 1.0614054, %v4120_v22  ;;  %v4150_v14 = vmul.f32 0.5, %v4046_v47  ;;  %2519 = vpow2.f32 %v1696_v34 }
 0x1ec   : > { %v1371_v39 = vmul.f32 %v1370_v35, %v4101_v53  ;;  %v1528_v48 = vadd.f32 -1.4531521, %v1527_v50  ;;  %v1685_v36 = vmul.f32 1.0614054, %v4125_v10  ;;  %v1773_v44 = vsub.f32 0.0, %v4099_v11 }
 0x1ed   : > { %v1450_v17 = vmul.f32 %v1449_v54, %v4105_v62  ;;  %v1607_v13 = vadd.f32 -1.4531521, %v1606_v18 }
 0x1ee   : > { %v1372_v55 = vadd.f32 1.4214138, %v1371_v39  ;;  %v1529_v40 = vmul.f32 %v1528_v48, %v4114_v24  ;;  %v1686_v0 = vadd.f32 -1.4531521, %v1685_v36  ;;  %v1774_v50 = vmul.f32 %v1773_v44, %v4099_v11 }
 0x1ef   : > { %v1451_v45 = vadd.f32 1.4214138, %v1450_v17  ;;  %v1608_v27 = vmul.f32 %v1607_v13, %v4120_v22  ;;  %v2512_v30 = vpop.eup %2511  ;;  %v1815_v48 = vstv %s4143_s20 }
 0x1f0   : > { %v1373_v19 = vmul.f32 %v1372_v55, %v4101_v53  ;;  %v1530_v21 = vadd.f32 1.4214138, %v1529_v40  ;;  %v1687_v2 = vmul.f32 %v1686_v0, %v4125_v10  ;;  %v2514_v56 = vpop.eup %2513  ;;  %v1761_v35 = vmul.f32 %v2512_v30, %v1759_v46 }
 0x1f1   : > { %v1452_v20 = vmul.f32 %v1451_v45, %v4105_v62  ;;  %v1609_v28 = vadd.f32 1.4214138, %v1608_v27 }
 0x1f2   : > { %v1374_v31 = vadd.f32 -0.28449672, %v1373_v19  ;;  %v1531_v16 = vmul.f32 %v1530_v21, %v4114_v24  ;;  %v1688_v4 = vadd.f32 1.4214138, %v1687_v2  ;;  %v1762_v39 = vsub.f32 2.0, %v1761_v35  ;;  %v2516_v43 = vpop.eup %2515 }
 0x1f3   : > { %v1453_v8 = vadd.f32 -0.28449672, %v1452_v20  ;;  %v1610_v38 = vmul.f32 %v1609_v28, %v4120_v22  ;;  %v1775_v21 = vmul.f32 1.442695, %v1774_v50 }
 0x1f4   : > { %v1375_v26 = vmul.f32 %v1374_v31, %v4101_v53  ;;  %v1532_v5 = vadd.f32 -0.28449672, %v1531_v16  ;;  %v1689_v54 = vmul.f32 %v1688_v4, %v4125_v10  ;;  %v4166_v55 = vmul.f32 %v2512_v30, %v1762_v39  ;;  %v2518_v49 = vpop.eup %2517 }
 0x1f5   : > { %v1454_v9 = vmul.f32 %v1453_v8, %v4105_v62  ;;  %v1611_v12 = vadd.f32 -0.28449672, %v1610_v38  ;;  %2521 = vpow2.f32 %v1775_v21 }
 0x1f6   : > { %v1376_v42 = vadd.f32 0.2548296, %v1375_v26  ;;  %v1533_v47 = vmul.f32 %v1532_v5, %v4114_v24  ;;  %v1764_v36 = vmul.f32 1.0614054, %v4166_v55 }
 0x1f7   : > { %v1455_v59 = vadd.f32 0.2548296, %v1454_v9  ;;  %v1612_v46 = vmul.f32 %v1611_v12, %v4120_v22 }
 0x1f8   : > { %v1377_v33 = vmul.f32 %v1376_v42, %v4101_v53  ;;  %v1534_v17 = vadd.f32 0.2548296, %v1533_v47  ;;  %v1690_v53 = vadd.f32 -0.28449672, %v1689_v54  ;;  %v1765_v8 = vadd.f32 -1.4531521, %v1764_v36 }
 0x1f9   : > { %v1456_v32 = vmul.f32 %v1455_v59, %v4105_v62  ;;  %v1613_v45 = vadd.f32 0.2548296, %v1612_v46  ;;  %v1845_v59 = vstv %s4169_s9 }
 0x1fa   : > { %v1382_v57 = vmul.f32 %v2510_v51, %v1377_v33  ;;  %v1535_v11 = vmul.f32 %v1534_v17, %v4114_v24  ;;  %v1691_v13 = vmul.f32 %v1690_v53, %v4125_v10  ;;  %v2520_v24 = vpop.eup %2519  ;;  %v1766_v30 = vmul.f32 %v1765_v8, %v4166_v55 }
 0x1fb   : > { %v1461_v15 = vmul.f32 %v2514_v56, %v1456_v32  ;;  %v1614_v31 = vmul.f32 %v1613_v45, %v4120_v22  ;;  %v1703_v17 = vmul.f32 0.5, %v4074_v23 }
 0x1fc   : > { %v1384_v62 = vsub.f32 1.0, %v1382_v57  ;;  %v2218_v18 = vadd.f32 -1.0, %v1382_v57  ;;  %v1540_v34 = vmul.f32 %v2516_v43, %v1535_v11  ;;  %v1692_v51 = vadd.f32 0.2548296, %v1691_v13 }
 0x1fd   : > { %v1463_v19 = vsub.f32 1.0, %v1461_v15  ;;  %v2232_v40 = vadd.f32 -1.0, %v1461_v15  ;;  %v1619_v2 = vmul.f32 %v2518_v49, %v1614_v31  ;;  %v1797_v43 = vstv %s4189_s25 }
 0x1fe   : > { %v1386_v20 = vsel %vm1383_vm0, %v1384_v62, %v2218_v18  ;;  %v1542_v16 = vsub.f32 1.0, %v1540_v34  ;;  %v2246_v28 = vadd.f32 -1.0, %v1540_v34  ;;  %v1693_v22 = vmul.f32 %v1692_v51, %v4125_v10 }
 0x1ff   : > { %v1388_v27 = vadd.f32 1.0, %v1386_v20  ;;  %v1465_v0 = vsel %vm1462_vm1, %v1463_v19, %v2232_v40  ;;  %v1621_v42 = vsub.f32 1.0, %v1619_v2  ;;  %v2260_v5 = vadd.f32 -1.0, %v1619_v2  ;;  %v2522_v23 = vpop.eup %2521 }
 0x200   : > { %v1467_v26 = vadd.f32 1.0, %v1465_v0  ;;  %v1544_v44 = vsel %vm1541_vm2, %v1542_v16, %v2246_v28  ;;  %v1698_v4 = vmul.f32 %v2520_v24, %v1693_v22  ;;  %v1826_v11 = vstv %s4195_s24 }
 0x201   : > { %v1389_v52 = vmul.f32 %v1388_v27, %v4133_v63  ;;  %v1546_v38 = vadd.f32 1.0, %v1544_v44  ;;  %v1767_v63 = vadd.f32 1.4214138, %v1766_v30  ;;  %v1623_v10 = vsel %vm1620_vm3, %v1621_v42, %v2260_v5 }
 0x202   : > { %v1468_v9 = vmul.f32 %v1467_v26, %v4138_v29  ;;  %v1848_v29 = vstv %s4172_s16  ;;  %v1700_v35 = vsub.f32 1.0, %v1698_v4  ;;  %v2274_v33 = vadd.f32 -1.0, %v1698_v4 }
 0x203   : > { %v1787_v56 = vmul.f32 %v1786_v60, %v1389_v52  ;;  %v1547_v37 = vmul.f32 %v1546_v38, %v4141_v6  ;;  %v1625_v12 = vadd.f32 1.0, %v1623_v10  ;;  %v1768_v54 = vmul.f32 %v1767_v63, %v4166_v55 }
 0x204   : > { %v1790_v47 = vmul.f32 %v1789_v41, %v1468_v9  ;;  %v1816_v25 = vmul.f32 %v1815_v48, %v1389_v52  ;;  %v1819_v32 = vmul.f32 %v1818_v7, %v1468_v9  ;;  %v1822_v60 = vstv %s4180_s8 }
 0x205   : > { %v1846_v39 = vmul.f32 %v1845_v59, %v1389_v52  ;;  %v1702_v50 = vsel %vm1699_vm4, %v1700_v35, %v2274_v33  ;;  %v1769_v6 = vadd.f32 -0.28449672, %v1768_v54  ;;  %v1849_v57 = vmul.f32 %v1848_v29, %v1468_v9 }
 0x206   : > { %v1852_v41 = vstv %s4184_s28  ;;  %v1791_v46 = vadd.f32 %v1790_v47, %v1787_v56  ;;  %v1794_v53 = vmul.f32 %v1793_v58, %v1547_v37  ;;  %v1626_v15 = vmul.f32 %v1625_v12, %v4150_v14 }
 0x207   : > { %v1770_v61 = vmul.f32 %v1769_v6, %v4166_v55  ;;  %v1820_v48 = vadd.f32 %v1819_v32, %v1816_v25  ;;  %v1823_v62 = vmul.f32 %v1822_v60, %v1547_v37  ;;  %v1704_v18 = vadd.f32 1.0, %v1702_v50 }
 0x208   : > { %v1850_v45 = vadd.f32 %v1849_v57, %v1846_v39  ;;  %v1853_v49 = vmul.f32 %v1852_v41, %v1547_v37  ;;  %v1856_v40 = vstv %s4203_s7  ;;  %v1795_v13 = vadd.f32 %v1794_v53, %v1791_v46 }
 0x209   : > { %v1771_v19 = vadd.f32 0.2548296, %v1770_v61  ;;  %v1798_v14 = vmul.f32 %v1797_v43, %v1626_v15  ;;  %v1824_v36 = vadd.f32 %v1823_v62, %v1820_v48  ;;  %v1827_v20 = vmul.f32 %v1826_v11, %v1626_v15 }
 0x20a   : > { %v1705_v34 = vmul.f32 %v1704_v18, %v1703_v17  ;;  %v1854_v31 = vadd.f32 %v1853_v49, %v1850_v45  ;;  %v1857_v21 = vmul.f32 %v1856_v40, %v1626_v15  ;;  %v1801_v27 = vstv %s4209_s27 }
 0x20b   : > { %v1772_v58 = vmul.f32 %v1771_v19, %v4166_v55  ;;  %v1830_v0 = vstv %s4214_s10  ;;  %v1860_v51 = vstv %s4217_s19  ;;  %v1782_v55 = vmul.f32 0.5, %v4091_v1 }
 0x20c   : > { %v1799_v16 = vadd.f32 %v1798_v14, %v1795_v13  ;;  %v1828_v28 = vadd.f32 %v1827_v20, %v1824_v36  ;;  %v1802_v2 = vmul.f32 %v1801_v27, %v1705_v34  ;;  %v1831_v52 = vmul.f32 %v1830_v0, %v1705_v34 }
 0x20d   : > { %v1777_v24 = vmul.f32 %v2522_v23, %v1772_v58  ;;  %v1858_v22 = vadd.f32 %v1857_v21, %v1854_v31  ;;  %v1861_v30 = vmul.f32 %v1860_v51, %v1705_v34  ;;  %v1834_v44 = vstv %s4230_s14 }
 0x20e   : > { %v1864_v1 = vstv %s4232_s22  ;;  %v1803_v5 = vadd.f32 %v1802_v2, %v1799_v16  ;;  %v1832_v38 = vadd.f32 %v1831_v52, %v1828_v28  ;;  %v1809_v59 = vstv %s4239_s21 }
 0x20f   : > { %v1779_v8 = vsub.f32 1.0, %v1777_v24  ;;  %v2288_v26 = vadd.f32 -1.0, %v1777_v24  ;;  %v1862_v4 = vadd.f32 %v1861_v30, %v1858_v22  ;;  %v1838_v29 = vstv %s2300_s26 }
 0x210   : > { %v1868_v37 = vstv %s2308_s0 }
 0x211   : > { %v1781_v7 = vsel %vm1778_vm5, %v1779_v8, %v2288_v26 }
 0x212   : > { %v1783_v9 = vadd.f32 1.0, %v1781_v7 }
 0x214   : > { %v1784_v42 = vmul.f32 %v1783_v9, %v1782_v55 }
 0x216   : > { %v1806_v63 = vmul.f32 %v1805_v3, %v1784_v42  ;;  %v1835_v10 = vmul.f32 %v1834_v44, %v1784_v42  ;;  %v1865_v56 = vmul.f32 %v1864_v1, %v1784_v42 }
 0x218   : > { %v1807_v35 = vadd.f32 %v1806_v63, %v1803_v5  ;;  %v1836_v33 = vadd.f32 %v1835_v10, %v1832_v38  ;;  %v1866_v47 = vadd.f32 %v1865_v56, %v1862_v4 }
 0x21a   : > { %v1810_v12 = vadd.f32 %v1809_v59, %v1807_v35  ;;  %v1839_v54 = vadd.f32 %v1838_v29, %v1836_v33  ;;  %v1869_v25 = vadd.f32 %v1868_v37, %v1866_v47 }
 0x21b   : > { %1880 = sbr.rel (!%p4469_p2) target bundleno = 554 (0x22a), region = 114 }
 0x21c   : > { %v1811_v32 = vmax.f32 %v1810_v12, 0.0  ;;  %v1840_v60 = vmax.f32 %v1839_v54, 0.0  ;;  %v1870_v39 = vmax.f32 %v1869_v25, 0.0 }
 0x21e   : > { %v1812_v50 = vmin.f32 %v1811_v32, 6.0  ;;  %v1841_v6 = vmin.f32 %v1840_v60, 6.0  ;;  %v1871_v57 = vmin.f32 %v1870_v39, 6.0 }
 0x220   : > { %1813 = vst [vmem:[%s415_s3] sm:$0xff] %v1812_v50  ;;  %2301 = vst [vmem:[%s415_s3 + $0x8] sm:$0xff] %v1841_v6 }
 0x221   : > { %2309 = vst [vmem:[%s415_s3 + $0x10] sm:$0xff] %v1871_v57 }
 0x227   : > { %v1914_v41 = vld [vmem:[%s415_s3] sm:$0xff]  ;;  %v1916_v17 = vld [vmem:[%s415_s3 + $0x8] sm:$0xff] }
 0x228   : > { %v1918_v46 = vld [vmem:[%s415_s3 + $0x10] sm:$0xff]  ;;  %1915 = vst [vmem:[%s1882_s2] sm:$0xff] %v1914_v41  ;;  %1917 = vst [vmem:[%s1882_s2 + $0x10] sm:$0xff] %v1916_v17 }
 0x229   : > { %1919 = vst [vmem:[%s1882_s2 + $0x20] sm:$0xff] %v1918_v46 }
 0x22a PF: > { %s4472_s26 = sld [smem:[#allocation21_spill]]  ;;  %s4473_s24 = sld [smem:[#allocation19_spill]] }
 0x22b   : > { %s4474_s25 = sld [smem:[#allocation22_spill]] }
 0x230   : > { %p18_p3 = scmp.ge.s32.totalorder %s4472_s26, 4  }
 0x232   :  { %20 = sbr.rel (!%p18_p3) target bundleno = 14 (0xe), region = 194 }
 0x239   :  { %1935 = vsyncpa [#allocation4], 1 }
 0x23a   :  { %1937 = vsyncpa [#allocation4 + $0x1], 1 }
 0x23b   :  { %1938 = vsyncpa [#allocation6], 1 }
 0x23c   :  { %1939 = vsyncpa [#allocation9], 1 }
 0x23d   :  { %1940 = vsyncpa [#allocation12], 1 }

</bundles_post_ra>
